<compile_context>
chip_gen: v7x
topology: tpu7x:2x2x1
jax: 0.10.0
libtpu: 0.0.40
codegen_flags: <defaults>
</compile_context>

<pallas_src>
import functools

import numpy as np
import jax
import jax.numpy as jnp
from jax.experimental import pallas as pl
from jax.experimental.pallas import tpu as pltpu

EPS = 1e-5  # BatchNorm1d default eps


def _round_up(x, m):
    return ((x + m - 1) // m) * m


# --------------------------------------------------------------------------------- #
# Kernel 1: fused per-point MLP (3 -> c1 -> c2 -> c3) + max over points.
# Optional 3x3 input transform folded into layer 1.  Running partial max lives in an
# (8, c3) VMEM scratch (VPU-only updates); the cross-sublane reduce + output store
# happen only on the last point tile.
# --------------------------------------------------------------------------------- #
def _pp_trunk_kernel(*refs, relu_last, has_trans, c3_chunk):
    if has_trans:
        (x_ref, t_ref, w1_ref, b1_ref, w2_ref, b2_ref,
         w3_ref, b3_ref, o_ref, mx_ref) = refs
    else:
        (x_ref, w1_ref, b1_ref, w2_ref, b2_ref,
         w3_ref, b3_ref, o_ref, mx_ref) = refs
        t_ref = None

    j = pl.program_id(1)

    @pl.when(j == 0)
    def _init():
        mx_ref[...] = jnp.full(mx_ref.shape, -jnp.inf, dtype=mx_ref.dtype)

    x = x_ref[...]                                  # (tn, 3) f32
    w1 = w1_ref[...]                                # (3, c1) f32
    if has_trans:
        t = t_ref[...]                              # (3, 3) f32
        # w1_eff = trans @ w1 via 3 rank-1 updates (tiny, pure VPU)
        w1 = (t[:, 0:1] * w1[0:1, :]
              + t[:, 1:2] * w1[1:2, :]
              + t[:, 2:3] * w1[2:3, :])

    # layer 1 (cin=3): rank-1 broadcast MACs on the VPU instead of an MXU matmul
    h = (b1_ref[...]
         + x[:, 0:1] * w1[0:1, :]
         + x[:, 1:2] * w1[1:2, :]
         + x[:, 2:3] * w1[2:3, :])
    h = jnp.maximum(h, 0.0)

    # layer 2: bf16 MXU matmul, f32 accumulation
    h = jnp.dot(h.astype(jnp.bfloat16), w2_ref[...],
                preferred_element_type=jnp.float32) + b2_ref[...]
    h = jnp.maximum(h, 0.0)
    h_bf = h.astype(jnp.bfloat16)

    tn = x_ref.shape[0]
    c3 = w3_ref.shape[1]
    # layer 3: chunk output channels; never materialize the full (tn, c3) f32 h3.
    for c0 in range(0, c3, c3_chunk):
        hc = jnp.dot(h_bf, w3_ref[:, c0:c0 + c3_chunk],
                     preferred_element_type=jnp.float32)
        hc = hc + b3_ref[:, c0:c0 + c3_chunk]
        if relu_last:
            hc = jnp.maximum(hc, 0.0)
        # two-stage max: elementwise (VPU) max over groups of 8 rows
        part = jnp.max(hc.reshape(tn // 8, 8, c3_chunk), axis=0)       # (8, chunk)
        mx_ref[:, c0:c0 + c3_chunk] = jnp.maximum(mx_ref[:, c0:c0 + c3_chunk], part)

    @pl.when(j == pl.num_programs(1) - 1)
    def _finalize():
        # single cross-sublane (XLU) reduce per batch element
        o_ref[...] = jnp.max(mx_ref[...], axis=0, keepdims=True)


def pp_trunk_max(pts, trans, w1, b1, w2, b2, w3, b3, *, relu_last, tile_n=None):
    """pts: (B, N, 3) f32; trans: optional (B, 3, 3) f32 folded into layer 1.
    w1: (3, c1) f32; w2/w3: bf16.  Returns max over points: (B, c3) f32."""
    B, N, cin = pts.shape
    c3 = w3.shape[1]

    # Default tile: as large as reasonable (per-grid-step overhead dominates small
    # tiles); 2048 keeps live intermediates well under v7x's smaller VMEM.
    tn = 2048 if tile_n is None else tile_n
    tn = min(_round_up(tn, 8), _round_up(N, 8))
    Np = _round_up(N, tn)
    if Np != N:
        # edge-pad: duplicate the last valid point — duplicates don't change the max,
        # so no in-kernel masking is needed.
        pts = jnp.pad(pts, ((0, 0), (0, Np - N), (0, 0)), mode="edge")

    has_trans = trans is not None
    c3_chunk = min(256, c3)
    assert c3 % c3_chunk == 0

    kernel = functools.partial(_pp_trunk_kernel, relu_last=relu_last,
                               has_trans=has_trans, c3_chunk=c3_chunk)

    in_specs = [pl.BlockSpec((None, tn, cin), lambda b, j: (b, j, 0))]
    inputs = [pts]
    if has_trans:
        in_specs.append(pl.BlockSpec((None, 3, 3), lambda b, j: (b, 0, 0)))
        inputs.append(trans)
    in_specs += [
        pl.BlockSpec(w1.shape, lambda b, j: (0, 0)),
        pl.BlockSpec((1, b1.shape[0]), lambda b, j: (0, 0)),
        pl.BlockSpec(w2.shape, lambda b, j: (0, 0)),
        pl.BlockSpec((1, b2.shape[0]), lambda b, j: (0, 0)),
        pl.BlockSpec(w3.shape, lambda b, j: (0, 0)),
        pl.BlockSpec((1, b3.shape[0]), lambda b, j: (0, 0)),
    ]
    inputs += [w1, b1.reshape(1, -1), w2, b2.reshape(1, -1), w3, b3.reshape(1, -1)]

    out = pl.pallas_call(
        kernel,
        out_shape=jax.ShapeDtypeStruct((B, 1, c3), jnp.float32),
        grid=(B, Np // tn),
        in_specs=in_specs,
        out_specs=pl.BlockSpec((None, 1, c3), lambda b, j: (b, 0, 0)),
        scratch_shapes=[pltpu.VMEM((8, c3), jnp.float32)],
        compiler_params=pltpu.CompilerParams(
            dimension_semantics=("parallel", "arbitrary")),
    )(*inputs)
    return out.reshape(B, c3)


# --------------------------------------------------------------------------------- #
# Kernel 2: fused 3-layer FC micro-kernel on (B, *) rows (B is tiny).
# Weights are bf16 in VMEM; activations cast to bf16 at the MXU, f32 accumulation.
# mode="plain"       -> relu(fc1) -> relu(fc2) -> fc3
# mode="log_softmax" -> same, then log_softmax over the last dim.
# --------------------------------------------------------------------------------- #
def _fc3_kernel(x_ref, w1_ref, b1_ref, w2_ref, b2_ref, w3_ref, b3_ref, o_ref, *, mode):
    def mm(a, w_ref):
        return jnp.dot(a.astype(jnp.bfloat16), w_ref[...],
                       preferred_element_type=jnp.float32)

    h = mm(x_ref[...], w1_ref) + b1_ref[...]
    h = jnp.maximum(h, 0.0)
    h = mm(h, w2_ref) + b2_ref[...]
    h = jnp.maximum(h, 0.0)
    y = mm(h, w3_ref) + b3_ref[...]
    if mode == "log_softmax":
        m = jnp.max(y, axis=-1, keepdims=True)
        s = y - m
        y = s - jnp.log(jnp.sum(jnp.exp(s), axis=-1, keepdims=True))
    o_ref[...] = y


def fused_fc3(x, w1, b1, w2, b2, w3, b3, *, mode="plain"):
    B = x.shape[0]
    cout = w3.shape[1]
    vmem = pl.BlockSpec(memory_space=pltpu.MemorySpace.VMEM)  # explicit VMEM placement
    return pl.pallas_call(
        functools.partial(_fc3_kernel, mode=mode),
        out_shape=jax.ShapeDtypeStruct((B, cout), jnp.float32),
        in_specs=[vmem] * 7,
        out_specs=vmem,
    )(x, w1, b1.reshape(1, -1), w2, b2.reshape(1, -1), w3, b3.reshape(1, -1))


# ----------------------------- parameters (deterministic) ------------------------ #

def _init_linear(key, cin, cout):
    kw, kb = jax.random.split(key)
    w = jax.random.normal(kw, (cin, cout), jnp.float32) / np.sqrt(cin)
    b = 0.05 * jax.random.normal(kb, (cout,), jnp.float32)
    return w, b


def _init_bn(key, c):
    k1, k2, k3, k4 = jax.random.split(key, 4)
    gamma = 1.0 + 0.1 * jax.random.normal(k1, (c,), jnp.float32)
    beta = 0.1 * jax.random.normal(k2, (c,), jnp.float32)
    mean = 0.1 * jax.random.normal(k3, (c,), jnp.float32)
    var = jax.random.uniform(k4, (c,), jnp.float32, minval=0.5, maxval=1.5)
    return gamma, beta, mean, var


def _fold_bn(w, b, bn):
    """Fold eval-mode BatchNorm1d into the preceding 1x1 conv / linear (f32)."""
    gamma, beta, mean, var = bn
    scale = gamma / jnp.sqrt(var + EPS)
    return w * scale[None, :], (b - mean) * scale + beta


def init_params(key, num_classes=2):
    keys = iter(jax.random.split(key, 64))

    def conv_bn(cin, cout, wdtype=jnp.bfloat16):
        w, b = _init_linear(next(keys), cin, cout)
        w, b = _fold_bn(w, b, _init_bn(next(keys), cout))
        return w.astype(wdtype), b           # weights bf16 for MXU layers; bias f32

    def linear(cin, cout, wdtype=jnp.bfloat16):
        w, b = _init_linear(next(keys), cin, cout)
        return w.astype(wdtype), b

    p = {}
    # STN3d
    p["stn_c1"] = conv_bn(3, 64, jnp.float32)    # rank-1 VPU layer -> keep f32
    p["stn_c2"] = conv_bn(64, 128)
    p["stn_c3"] = conv_bn(128, 1024)
    p["stn_f1"] = conv_bn(1024, 512)
    p["stn_f2"] = conv_bn(512, 256)
    p["stn_f3"] = linear(256, 9)
    # PointNetfeat (global_feat=True, feature_transform=False)
    p["feat_c1"] = conv_bn(3, 64, jnp.float32)   # rank-1 VPU layer -> keep f32
    p["feat_c2"] = conv_bn(64, 128)
    p["feat_c3"] = conv_bn(128, 1024)            # bn3, no ReLU
    # PointNetCls head (dropout is identity in eval; fold bn into fc)
    p["cls_f1"] = conv_bn(1024, 512)
    p["cls_f2"] = conv_bn(512, 256)
    p["cls_f3"] = linear(256, num_classes)
    return p


# ----------------------------- forward pass -------------------------------------- #

def pointnet_cls_forward(x, params, *, tile_n=None):
    """Eval-mode PointNetCls forward.

    x: (B, 3, N) float32 (PyTorch Conv1d layout).
    Returns (log_probs (B, k), trans (B, 3, 3), trans_feat=None).
    """
    B, _, N = x.shape
    pts = jnp.transpose(x, (0, 2, 1))                              # (B, N, 3)

    # ---- STN3d: per-point MLP + max (one fused kernel), then FC tail ----
    g = pp_trunk_max(pts, None, *params["stn_c1"], *params["stn_c2"],
                     *params["stn_c3"], relu_last=True, tile_n=tile_n)   # (B, 1024)
    t9 = fused_fc3(g, *params["stn_f1"], *params["stn_f2"], *params["stn_f3"],
                   mode="plain")                                   # (B, 9)
    trans = t9.reshape(B, 3, 3) + jnp.eye(3, dtype=jnp.float32)[None]

    # ---- PointNetfeat: trans folded into layer 1 inside the kernel ----
    gf = pp_trunk_max(pts, trans, *params["feat_c1"], *params["feat_c2"],
                      *params["feat_c3"], relu_last=False, tile_n=tile_n)  # (B, 1024)

    # ---- classification head (fused micro-kernel incl. log_softmax) ----
    logp = fused_fc3(gf, *params["cls_f1"], *params["cls_f2"], *params["cls_f3"],
                     mode="log_softmax")                           # (B, k)

    # TODO(synk): training-mode Dropout / batch-statistics BatchNorm are not part of
    # the eval forward path and are intentionally not implemented.
    return logp, trans, None                                       # trans_feat is None


# ----------------------------- pure-JAX reference (sanity check) ----------------- #
# Mirrors the kernels' precision policy (bf16 weights / bf16 MXU inputs, f32 accum)
# so the comparison isolates kernel correctness rather than float-policy drift.

def _mm(a, w):
    if w.dtype == jnp.bfloat16:
        a = a.astype(jnp.bfloat16)
    return jnp.dot(a, w, preferred_element_type=jnp.float32)


def _ref_forward(x, params):
    def lin(h, wb, relu):
        w, b = wb
        y = _mm(h, w) + b
        return jnp.maximum(y, 0.0) if relu else y

    B, _, N = x.shape
    pts = jnp.transpose(x, (0, 2, 1))
    M = B * N
    h = lin(pts.reshape(M, 3), params["stn_c1"], True)
    h = lin(h, params["stn_c2"], True)
    h = lin(h, params["stn_c3"], True)
    g = jnp.max(h.reshape(B, N, 1024), axis=1)
    g = lin(g, params["stn_f1"], True)
    g = lin(g, params["stn_f2"], True)
    t = lin(g, params["stn_f3"], False)
    trans = t.reshape(B, 3, 3) + jnp.eye(3, dtype=jnp.float32)[None]
    xt = jnp.einsum("bnk,bkm->bnm", pts, trans)
    h = lin(xt.reshape(M, 3), params["feat_c1"], True)
    h = lin(h, params["feat_c2"], True)
    h = lin(h, params["feat_c3"], False)
    gf = jnp.max(h.reshape(B, N, 1024), axis=1)
    c = lin(gf, params["cls_f1"], True)
    c = lin(c, params["cls_f2"], True)
    logits = lin(c, params["cls_f3"], False)
    return jax.nn.log_softmax(logits, axis=1), trans


# ----------------------------- main ----------------------------------------------- #

if __name__ == "__main__":
    key = jax.random.PRNGKey(0)
    kp, kx = jax.random.split(key)

    B, N, NUM_CLASSES = 2, 200, 2          # small shapes; N not a tile multiple on purpose
    params = init_params(kp, num_classes=NUM_CLASSES)
    x = jax.random.normal(kx, (B, 3, N), jnp.float32)   # PyTorch (B, C, N) layout

    logp_ref, trans_ref = _ref_forward(x, params)

    # 1) small tile: exercises multi-tile accumulation + edge padding + finalize step
    fwd_small = jax.jit(functools.partial(pointnet_cls_forward, tile_n=64))
    logp, trans, trans_feat = fwd_small(x, params)
    jax.block_until_ready((logp, trans))

    assert logp.shape == (B, NUM_CLASSES), logp.shape
    assert trans.shape == (B, 3, 3), trans.shape
    assert trans_feat is None

    np.testing.assert_allclose(np.asarray(trans), np.asarray(trans_ref), rtol=2e-2, atol=2e-2)
    np.testing.assert_allclose(np.asarray(logp), np.asarray(logp_ref), rtol=2e-2, atol=2e-2)

    # 2) default (large) tile path: single-tile per batch element here
    fwd_default = jax.jit(pointnet_cls_forward)
    logp2, trans2, _ = fwd_default(x, params)
    jax.block_until_ready((logp2, trans2))
    np.testing.assert_allclose(np.asarray(trans2), np.asarray(trans_ref), rtol=2e-2, atol=2e-2)
    np.testing.assert_allclose(np.asarray(logp2), np.asarray(logp_ref), rtol=2e-2, atol=2e-2)

    print("KERNEL_OK")
</pallas_src>

<mosaic_0001>
module attributes {stable_mosaic.version = 11 : i64} {
  func.func @_pp_trunk_kernel(%arg0: i32, %arg1: i32, %arg2: memref<1x64x3xf32, #tpu.memory_space<vmem>>, %arg3: memref<3x64xf32, #tpu.memory_space<vmem>>, %arg4: memref<1x64xf32, #tpu.memory_space<vmem>>, %arg5: memref<64x128xbf16, #tpu.memory_space<vmem>>, %arg6: memref<1x128xf32, #tpu.memory_space<vmem>>, %arg7: memref<128x1024xbf16, #tpu.memory_space<vmem>>, %arg8: memref<1x1024xf32, #tpu.memory_space<vmem>>, %arg9: memref<1x1x1024xf32, #tpu.memory_space<vmem>>, %arg10: memref<8x1024xf32, #tpu.memory_space<vmem>>) attributes {dimension_semantics = [#tpu.dimension_semantics<parallel>, #tpu.dimension_semantics<arbitrary>], iteration_bounds = array<i64: 2, 4>, scalar_prefetch = 0 : i64, scratch_operands = 1 : i64, tpu.core_type = #tpu.core_type<tc>, window_params = [{transform_indices = @transform_0, window_bounds = array<i64: 1, 64, 3>}, {pipeline_mode = #tpu.pipeline_mode<synchronous>, transform_indices = @transform_1, window_bounds = array<i64: 3, 64>}, {pipeline_mode = #tpu.pipeline_mode<synchronous>, transform_indices = @transform_2, window_bounds = array<i64: 1, 64>}, {pipeline_mode = #tpu.pipeline_mode<synchronous>, transform_indices = @transform_3, window_bounds = array<i64: 64, 128>}, {pipeline_mode = #tpu.pipeline_mode<synchronous>, transform_indices = @transform_4, window_bounds = array<i64: 1, 128>}, {pipeline_mode = #tpu.pipeline_mode<synchronous>, transform_indices = @transform_5, window_bounds = array<i64: 128, 1024>}, {pipeline_mode = #tpu.pipeline_mode<synchronous>, transform_indices = @transform_6, window_bounds = array<i64: 1, 1024>}, {transform_indices = @transform_7, window_bounds = array<i64: 1, 1, 1024>}]} {
    %c0_i32 = arith.constant 0 : i32
    %0 = arith.cmpi eq, %arg1, %c0_i32 : i32
    %1 = arith.extui %0 : i1 to i32
    %c0_i32_0 = arith.constant 0 : i32
    %2 = arith.cmpi ne, %1, %c0_i32_0 : i32
    scf.if %2 {
      %cst_55 = arith.constant 0xFF800000 : f32
      %88 = vector.broadcast %cst_55 : f32 to vector<8x1024xf32>
      %c0_56 = arith.constant 0 : index
      %c0_57 = arith.constant 0 : index
      %89 = vector.load %arg10[%c0_56, %c0_57] : memref<8x1024xf32, #tpu.memory_space<vmem>>, vector<8x1024xf32>
      tpu.vector_store %arg10[%c0_56, %c0_57], %88 {strides = array<i32>} : memref<8x1024xf32, #tpu.memory_space<vmem>>, vector<8x1024xf32>,
    } else {
    }
    %c0 = arith.constant 0 : index
    %c0_1 = arith.constant 0 : index
    %c0_2 = arith.constant 0 : index
    %3 = vector.load %arg2[%c0, %c0_1, %c0_2] : memref<1x64x3xf32, #tpu.memory_space<vmem>>, vector<1x64x3xf32>
    %4 = vector.shape_cast %3 : vector<1x64x3xf32> to vector<64x3xf32>
    %c0_3 = arith.constant 0 : index
    %c0_4 = arith.constant 0 : index
    %5 = vector.load %arg3[%c0_3, %c0_4] : memref<3x64xf32, #tpu.memory_space<vmem>>, vector<3x64xf32>
    %c0_5 = arith.constant 0 : index
    %c0_6 = arith.constant 0 : index
    %6 = vector.load %arg4[%c0_5, %c0_6] : memref<1x64xf32, #tpu.memory_space<vmem>>, vector<1x64xf32>
    %7 = vector.extract_strided_slice %4 {offsets = [0, 0], sizes = [64, 1], strides = [1, 1]} : vector<64x3xf32> to vector<64x1xf32>
    %8 = vector.extract_strided_slice %5 {offsets = [0, 0], sizes = [1, 64], strides = [1, 1]} : vector<3x64xf32> to vector<1x64xf32>
    %9 = vector.broadcast %7 : vector<64x1xf32> to vector<64x64xf32>
    %10 = vector.broadcast %8 : vector<1x64xf32> to vector<64x64xf32>
    %11 = arith.mulf %9, %10 : vector<64x64xf32>
    %12 = vector.broadcast %6 : vector<1x64xf32> to vector<64x64xf32>
    %13 = arith.addf %12, %11 : vector<64x64xf32>
    %14 = vector.extract_strided_slice %4 {offsets = [0, 1], sizes = [64, 1], strides = [1, 1]} : vector<64x3xf32> to vector<64x1xf32>
    %15 = vector.extract_strided_slice %5 {offsets = [1, 0], sizes = [1, 64], strides = [1, 1]} : vector<3x64xf32> to vector<1x64xf32>
    %16 = vector.broadcast %14 : vector<64x1xf32> to vector<64x64xf32>
    %17 = vector.broadcast %15 : vector<1x64xf32> to vector<64x64xf32>
    %18 = arith.mulf %16, %17 : vector<64x64xf32>
    %19 = arith.addf %13, %18 : vector<64x64xf32>
    %20 = vector.extract_strided_slice %4 {offsets = [0, 2], sizes = [64, 1], strides = [1, 1]} : vector<64x3xf32> to vector<64x1xf32>
    %21 = vector.extract_strided_slice %5 {offsets = [2, 0], sizes = [1, 64], strides = [1, 1]} : vector<3x64xf32> to vector<1x64xf32>
    %22 = vector.broadcast %20 : vector<64x1xf32> to vector<64x64xf32>
    %23 = vector.broadcast %21 : vector<1x64xf32> to vector<64x64xf32>
    %24 = arith.mulf %22, %23 : vector<64x64xf32>
    %25 = arith.addf %19, %24 : vector<64x64xf32>
    %cst = arith.constant 0.000000e+00 : f32
    %26 = vector.broadcast %cst : f32 to vector<64x64xf32>
    %27 = arith.maximumf %25, %26 : vector<64x64xf32>
    %28 = arith.truncf %27 : vector<64x64xf32> to vector<64x64xbf16>
    %c0_7 = arith.constant 0 : index
    %c0_8 = arith.constant 0 : index
    %29 = vector.load %arg5[%c0_7, %c0_8] : memref<64x128xbf16, #tpu.memory_space<vmem>>, vector<64x128xbf16>
    %cst_9 = arith.constant dense<0.000000e+00> : vector<64x128xf32>
    %30 = tpu.matmul %28, %29, %cst_9 {dimension_numbers = #tpu.dot_dimension_numbers<[1], [0], [0], [1], [0, 0, 1, 1], [], []>} : vector<64x64xbf16>, vector<64x128xbf16>, vector<64x128xf32> -> vector<64x128xf32>
    %c0_10 = arith.constant 0 : index
    %c0_11 = arith.constant 0 : index
    %31 = vector.load %arg6[%c0_10, %c0_11] : memref<1x128xf32, #tpu.memory_space<vmem>>, vector<1x128xf32>
    %32 = vector.broadcast %31 : vector<1x128xf32> to vector<64x128xf32>
    %33 = arith.addf %30, %32 : vector<64x128xf32>
    %cst_12 = arith.constant 0.000000e+00 : f32
    %34 = vector.broadcast %cst_12 : f32 to vector<64x128xf32>
    %35 = arith.maximumf %33, %34 : vector<64x128xf32>
    %36 = arith.truncf %35 : vector<64x128xf32> to vector<64x128xbf16>
    %c0_13 = arith.constant 0 : index
    %c0_14 = arith.constant 0 : index
    %37 = vector.load %arg7[%c0_13, %c0_14] : memref<128x1024xbf16, #tpu.memory_space<vmem>>, vector<128x256xbf16>
    %cst_15 = arith.constant dense<0.000000e+00> : vector<64x256xf32>
    %38 = tpu.matmul %36, %37, %cst_15 {dimension_numbers = #tpu.dot_dimension_numbers<[1], [0], [0], [1], [0, 0, 1, 1], [], []>} : vector<64x128xbf16>, vector<128x256xbf16>, vector<64x256xf32> -> vector<64x256xf32>
    %c0_16 = arith.constant 0 : index
    %c0_17 = arith.constant 0 : index
    %39 = vector.load %arg8[%c0_16, %c0_17] : memref<1x1024xf32, #tpu.memory_space<vmem>>, vector<1x256xf32>
    %40 = vector.broadcast %39 : vector<1x256xf32> to vector<64x256xf32>
    %41 = arith.addf %38, %40 : vector<64x256xf32>
    %cst_18 = arith.constant 0.000000e+00 : f32
    %42 = vector.broadcast %cst_18 : f32 to vector<64x256xf32>
    %43 = arith.maximumf %41, %42 : vector<64x256xf32>
    %44 = vector.shape_cast %43 : vector<64x256xf32> to vector<8x8x256xf32>
    %cst_19 = arith.constant dense<0xFF800000> : vector<8x256xf32>
    %45 = vector.multi_reduction <maximumf>, %44, %cst_19 [0] : vector<8x8x256xf32> to vector<8x256xf32>
    %c0_20 = arith.constant 0 : index
    %c0_21 = arith.constant 0 : index
    %46 = vector.load %arg10[%c0_20, %c0_21] : memref<8x1024xf32, #tpu.memory_space<vmem>>, vector<8x256xf32>
    %47 = arith.maximumf %46, %45 : vector<8x256xf32>
    %c0_22 = arith.constant 0 : index
    %c0_23 = arith.constant 0 : index
    %48 = vector.load %arg10[%c0_22, %c0_23] : memref<8x1024xf32, #tpu.memory_space<vmem>>, vector<8x256xf32>
    tpu.vector_store %arg10[%c0_22, %c0_23], %47 {strides = array<i32>} : memref<8x1024xf32, #tpu.memory_space<vmem>>, vector<8x256xf32>,
    %c0_24 = arith.constant 0 : index
    %c256 = arith.constant 256 : index
    %49 = vector.load %arg7[%c0_24, %c256] : memref<128x1024xbf16, #tpu.memory_space<vmem>>, vector<128x256xbf16>
    %cst_25 = arith.constant dense<0.000000e+00> : vector<64x256xf32>
    %50 = tpu.matmul %36, %49, %cst_25 {dimension_numbers = #tpu.dot_dimension_numbers<[1], [0], [0], [1], [0, 0, 1, 1], [], []>} : vector<64x128xbf16>, vector<128x256xbf16>, vector<64x256xf32> -> vector<64x256xf32>
    %c0_26 = arith.constant 0 : index
    %c256_27 = arith.constant 256 : index
    %51 = vector.load %arg8[%c0_26, %c256_27] : memref<1x1024xf32, #tpu.memory_space<vmem>>, vector<1x256xf32>
    %52 = vector.broadcast %51 : vector<1x256xf32> to vector<64x256xf32>
    %53 = arith.addf %50, %52 : vector<64x256xf32>
    %cst_28 = arith.constant 0.000000e+00 : f32
    %54 = vector.broadcast %cst_28 : f32 to vector<64x256xf32>
    %55 = arith.maximumf %53, %54 : vector<64x256xf32>
    %56 = vector.shape_cast %55 : vector<64x256xf32> to vector<8x8x256xf32>
    %cst_29 = arith.constant dense<0xFF800000> : vector<8x256xf32>
    %57 = vector.multi_reduction <maximumf>, %56, %cst_29 [0] : vector<8x8x256xf32> to vector<8x256xf32>
    %c0_30 = arith.constant 0 : index
    %c256_31 = arith.constant 256 : index
    %58 = vector.load %arg10[%c0_30, %c256_31] : memref<8x1024xf32, #tpu.memory_space<vmem>>, vector<8x256xf32>
    %59 = arith.maximumf %58, %57 : vector<8x256xf32>
    %c0_32 = arith.constant 0 : index
    %c256_33 = arith.constant 256 : index
    %60 = vector.load %arg10[%c0_32, %c256_33] : memref<8x1024xf32, #tpu.memory_space<vmem>>, vector<8x256xf32>
    tpu.vector_store %arg10[%c0_32, %c256_33], %59 {strides = array<i32>} : memref<8x1024xf32, #tpu.memory_space<vmem>>, vector<8x256xf32>,
    %c0_34 = arith.constant 0 : index
    %c512 = arith.constant 512 : index
    %61 = vector.load %arg7[%c0_34, %c512] : memref<128x1024xbf16, #tpu.memory_space<vmem>>, vector<128x256xbf16>
    %cst_35 = arith.constant dense<0.000000e+00> : vector<64x256xf32>
    %62 = tpu.matmul %36, %61, %cst_35 {dimension_numbers = #tpu.dot_dimension_numbers<[1], [0], [0], [1], [0, 0, 1, 1], [], []>} : vector<64x128xbf16>, vector<128x256xbf16>, vector<64x256xf32> -> vector<64x256xf32>
    %c0_36 = arith.constant 0 : index
    %c512_37 = arith.constant 512 : index
    %63 = vector.load %arg8[%c0_36, %c512_37] : memref<1x1024xf32, #tpu.memory_space<vmem>>, vector<1x256xf32>
    %64 = vector.broadcast %63 : vector<1x256xf32> to vector<64x256xf32>
    %65 = arith.addf %62, %64 : vector<64x256xf32>
    %cst_38 = arith.constant 0.000000e+00 : f32
    %66 = vector.broadcast %cst_38 : f32 to vector<64x256xf32>
    %67 = arith.maximumf %65, %66 : vector<64x256xf32>
    %68 = vector.shape_cast %67 : vector<64x256xf32> to vector<8x8x256xf32>
    %cst_39 = arith.constant dense<0xFF800000> : vector<8x256xf32>
    %69 = vector.multi_reduction <maximumf>, %68, %cst_39 [0] : vector<8x8x256xf32> to vector<8x256xf32>
    %c0_40 = arith.constant 0 : index
    %c512_41 = arith.constant 512 : index
    %70 = vector.load %arg10[%c0_40, %c512_41] : memref<8x1024xf32, #tpu.memory_space<vmem>>, vector<8x256xf32>
    %71 = arith.maximumf %70, %69 : vector<8x256xf32>
    %c0_42 = arith.constant 0 : index
    %c512_43 = arith.constant 512 : index
    %72 = vector.load %arg10[%c0_42, %c512_43] : memref<8x1024xf32, #tpu.memory_space<vmem>>, vector<8x256xf32>
    tpu.vector_store %arg10[%c0_42, %c512_43], %71 {strides = array<i32>} : memref<8x1024xf32, #tpu.memory_space<vmem>>, vector<8x256xf32>,
    %c0_44 = arith.constant 0 : index
    %c768 = arith.constant 768 : index
    %73 = vector.load %arg7[%c0_44, %c768] : memref<128x1024xbf16, #tpu.memory_space<vmem>>, vector<128x256xbf16>
    %cst_45 = arith.constant dense<0.000000e+00> : vector<64x256xf32>
    %74 = tpu.matmul %36, %73, %cst_45 {dimension_numbers = #tpu.dot_dimension_numbers<[1], [0], [0], [1], [0, 0, 1, 1], [], []>} : vector<64x128xbf16>, vector<128x256xbf16>, vector<64x256xf32> -> vector<64x256xf32>
    %c0_46 = arith.constant 0 : index
    %c768_47 = arith.constant 768 : index
    %75 = vector.load %arg8[%c0_46, %c768_47] : memref<1x1024xf32, #tpu.memory_space<vmem>>, vector<1x256xf32>
    %76 = vector.broadcast %75 : vector<1x256xf32> to vector<64x256xf32>
    %77 = arith.addf %74, %76 : vector<64x256xf32>
    %cst_48 = arith.constant 0.000000e+00 : f32
    %78 = vector.broadcast %cst_48 : f32 to vector<64x256xf32>
    %79 = arith.maximumf %77, %78 : vector<64x256xf32>
    %80 = vector.shape_cast %79 : vector<64x256xf32> to vector<8x8x256xf32>
    %cst_49 = arith.constant dense<0xFF800000> : vector<8x256xf32>
    %81 = vector.multi_reduction <maximumf>, %80, %cst_49 [0] : vector<8x8x256xf32> to vector<8x256xf32>
    %c0_50 = arith.constant 0 : index
    %c768_51 = arith.constant 768 : index
    %82 = vector.load %arg10[%c0_50, %c768_51] : memref<8x1024xf32, #tpu.memory_space<vmem>>, vector<8x256xf32>
    %83 = arith.maximumf %82, %81 : vector<8x256xf32>
    %c0_52 = arith.constant 0 : index
    %c768_53 = arith.constant 768 : index
    %84 = vector.load %arg10[%c0_52, %c768_53] : memref<8x1024xf32, #tpu.memory_space<vmem>>, vector<8x256xf32>
    tpu.vector_store %arg10[%c0_52, %c768_53], %83 {strides = array<i32>} : memref<8x1024xf32, #tpu.memory_space<vmem>>, vector<8x256xf32>,
    %c3_i32 = arith.constant 3 : i32
    %85 = arith.cmpi eq, %arg1, %c3_i32 : i32
    %86 = arith.extui %85 : i1 to i32
    %c0_i32_54 = arith.constant 0 : i32
    %87 = arith.cmpi ne, %86, %c0_i32_54 : i32
    scf.if %87 {
      %c0_55 = arith.constant 0 : index
      %c0_56 = arith.constant 0 : index
      %88 = vector.load %arg10[%c0_55, %c0_56] : memref<8x1024xf32, #tpu.memory_space<vmem>>, vector<8x1024xf32>
      %cst_57 = arith.constant dense<0xFF800000> : vector<1024xf32>
      %89 = vector.multi_reduction <maximumf>, %88, %cst_57 [0] : vector<8x1024xf32> to vector<1024xf32>
      %90 = vector.shape_cast %89 : vector<1024xf32> to vector<1x1024xf32>
      %c0_58 = arith.constant 0 : index
      %c0_59 = arith.constant 0 : index
      %c0_60 = arith.constant 0 : index
      %91 = vector.load %arg9[%c0_58, %c0_59, %c0_60] : memref<1x1x1024xf32, #tpu.memory_space<vmem>>, vector<1x1x1024xf32>
      %92 = vector.shape_cast %91 : vector<1x1x1024xf32> to vector<1x1024xf32>
      %93 = vector.shape_cast %90 : vector<1x1024xf32> to vector<1x1x1024xf32>
      tpu.vector_store %arg9[%c0_58, %c0_59, %c0_60], %93 {strides = array<i32>} : memref<1x1x1024xf32, #tpu.memory_space<vmem>>, vector<1x1x1024xf32>,
    } else {
    }
    return
  }
  func.func @transform_0(%arg0: i32, %arg1: i32) -> (i32, i32, i32) {
    %c0_i32 = arith.constant 0 : i32
    %c0_i32_0 = arith.constant 0 : i32
    return %arg0, %arg1, %c0_i32 : i32, i32, i32
  }
  func.func @transform_1(%arg0: i32, %arg1: i32) -> (i32, i32) {
    %c0_i32 = arith.constant 0 : i32
    %c0_i32_0 = arith.constant 0 : i32
    %c0_i32_1 = arith.constant 0 : i32
    return %c0_i32, %c0_i32_0 : i32, i32
  }
  func.func @transform_2(%arg0: i32, %arg1: i32) -> (i32, i32) {
    %c0_i32 = arith.constant 0 : i32
    %c0_i32_0 = arith.constant 0 : i32
    %c0_i32_1 = arith.constant 0 : i32
    return %c0_i32, %c0_i32_0 : i32, i32
  }
  func.func @transform_3(%arg0: i32, %arg1: i32) -> (i32, i32) {
    %c0_i32 = arith.constant 0 : i32
    %c0_i32_0 = arith.constant 0 : i32
    %c0_i32_1 = arith.constant 0 : i32
    return %c0_i32, %c0_i32_0 : i32, i32
  }
  func.func @transform_4(%arg0: i32, %arg1: i32) -> (i32, i32) {
    %c0_i32 = arith.constant 0 : i32
    %c0_i32_0 = arith.constant 0 : i32
    %c0_i32_1 = arith.constant 0 : i32
    return %c0_i32, %c0_i32_0 : i32, i32
  }
  func.func @transform_5(%arg0: i32, %arg1: i32) -> (i32, i32) {
    %c0_i32 = arith.constant 0 : i32
    %c0_i32_0 = arith.constant 0 : i32
    %c0_i32_1 = arith.constant 0 : i32
    return %c0_i32, %c0_i32_0 : i32, i32
  }
  func.func @transform_6(%arg0: i32, %arg1: i32) -> (i32, i32) {
    %c0_i32 = arith.constant 0 : i32
    %c0_i32_0 = arith.constant 0 : i32
    %c0_i32_1 = arith.constant 0 : i32
    return %c0_i32, %c0_i32_0 : i32, i32
  }
  func.func @transform_7(%arg0: i32, %arg1: i32) -> (i32, i32, i32) {
    %c0_i32 = arith.constant 0 : i32
    %c0_i32_0 = arith.constant 0 : i32
    %c0_i32_1 = arith.constant 0 : i32
    return %arg0, %c0_i32, %c0_i32_0 : i32, i32, i32
  }
}

module attributes {stable_mosaic.version = 11 : i64} {
  func.func @_fc3_kernel(%arg0: memref<2x1024xf32, #tpu.memory_space<vmem>>, %arg1: memref<1024x512xbf16, #tpu.memory_space<vmem>>, %arg2: memref<1x512xf32, #tpu.memory_space<vmem>>, %arg3: memref<512x256xbf16, #tpu.memory_space<vmem>>, %arg4: memref<1x256xf32, #tpu.memory_space<vmem>>, %arg5: memref<256x9xbf16, #tpu.memory_space<vmem>>, %arg6: memref<1x9xf32, #tpu.memory_space<vmem>>, %arg7: memref<2x9xf32, #tpu.memory_space<vmem>>) attributes {dimension_semantics = [], scalar_prefetch = 0 : i64, scratch_operands = 0 : i64, tpu.core_type = #tpu.core_type<tc>} {
    %c0 = arith.constant 0 : index
    %c0_0 = arith.constant 0 : index
    %0 = vector.load %arg0[%c0, %c0_0] : memref<2x1024xf32, #tpu.memory_space<vmem>>, vector<2x1024xf32>
    %1 = arith.truncf %0 : vector<2x1024xf32> to vector<2x1024xbf16>
    %c0_1 = arith.constant 0 : index
    %c0_2 = arith.constant 0 : index
    %2 = vector.load %arg1[%c0_1, %c0_2] : memref<1024x512xbf16, #tpu.memory_space<vmem>>, vector<1024x512xbf16>
    %cst = arith.constant dense<0.000000e+00> : vector<2x512xf32>
    %3 = tpu.matmul %1, %2, %cst {dimension_numbers = #tpu.dot_dimension_numbers<[1], [0], [0], [1], [0, 0, 1, 1], [], []>} : vector<2x1024xbf16>, vector<1024x512xbf16>, vector<2x512xf32> -> vector<2x512xf32>
    %c0_3 = arith.constant 0 : index
    %c0_4 = arith.constant 0 : index
    %4 = vector.load %arg2[%c0_3, %c0_4] : memref<1x512xf32, #tpu.memory_space<vmem>>, vector<1x512xf32>
    %5 = vector.broadcast %4 : vector<1x512xf32> to vector<2x512xf32>
    %6 = arith.addf %3, %5 : vector<2x512xf32>
    %cst_5 = arith.constant 0.000000e+00 : f32
    %7 = vector.broadcast %cst_5 : f32 to vector<2x512xf32>
    %8 = arith.maximumf %6, %7 : vector<2x512xf32>
    %9 = arith.truncf %8 : vector<2x512xf32> to vector<2x512xbf16>
    %c0_6 = arith.constant 0 : index
    %c0_7 = arith.constant 0 : index
    %10 = vector.load %arg3[%c0_6, %c0_7] : memref<512x256xbf16, #tpu.memory_space<vmem>>, vector<512x256xbf16>
    %cst_8 = arith.constant dense<0.000000e+00> : vector<2x256xf32>
    %11 = tpu.matmul %9, %10, %cst_8 {dimension_numbers = #tpu.dot_dimension_numbers<[1], [0], [0], [1], [0, 0, 1, 1], [], []>} : vector<2x512xbf16>, vector<512x256xbf16>, vector<2x256xf32> -> vector<2x256xf32>
    %c0_9 = arith.constant 0 : index
    %c0_10 = arith.constant 0 : index
    %12 = vector.load %arg4[%c0_9, %c0_10] : memref<1x256xf32, #tpu.memory_space<vmem>>, vector<1x256xf32>
    %13 = vector.broadcast %12 : vector<1x256xf32> to vector<2x256xf32>
    %14 = arith.addf %11, %13 : vector<2x256xf32>
    %cst_11 = arith.constant 0.000000e+00 : f32
    %15 = vector.broadcast %cst_11 : f32 to vector<2x256xf32>
    %16 = arith.maximumf %14, %15 : vector<2x256xf32>
    %17 = arith.truncf %16 : vector<2x256xf32> to vector<2x256xbf16>
    %c0_12 = arith.constant 0 : index
    %c0_13 = arith.constant 0 : index
    %18 = vector.load %arg5[%c0_12, %c0_13] : memref<256x9xbf16, #tpu.memory_space<vmem>>, vector<256x9xbf16>
    %cst_14 = arith.constant dense<0.000000e+00> : vector<2x9xf32>
    %19 = tpu.matmul %17, %18, %cst_14 {dimension_numbers = #tpu.dot_dimension_numbers<[1], [0], [0], [1], [0, 0, 1, 1], [], []>} : vector<2x256xbf16>, vector<256x9xbf16>, vector<2x9xf32> -> vector<2x9xf32>
    %c0_15 = arith.constant 0 : index
    %c0_16 = arith.constant 0 : index
    %20 = vector.load %arg6[%c0_15, %c0_16] : memref<1x9xf32, #tpu.memory_space<vmem>>, vector<1x9xf32>
    %21 = vector.broadcast %20 : vector<1x9xf32> to vector<2x9xf32>
    %22 = arith.addf %19, %21 : vector<2x9xf32>
    %c0_17 = arith.constant 0 : index
    %c0_18 = arith.constant 0 : index
    %23 = vector.load %arg7[%c0_17, %c0_18] : memref<2x9xf32, #tpu.memory_space<vmem>>, vector<2x9xf32>
    tpu.vector_store %arg7[%c0_17, %c0_18], %22 {strides = array<i32>} : memref<2x9xf32, #tpu.memory_space<vmem>>, vector<2x9xf32>,
    return
  }
}

module attributes {stable_mosaic.version = 11 : i64} {
  func.func @_pp_trunk_kernel(%arg0: i32, %arg1: i32, %arg2: memref<1x64x3xf32, #tpu.memory_space<vmem>>, %arg3: memref<1x3x3xf32, #tpu.memory_space<vmem>>, %arg4: memref<3x64xf32, #tpu.memory_space<vmem>>, %arg5: memref<1x64xf32, #tpu.memory_space<vmem>>, %arg6: memref<64x128xbf16, #tpu.memory_space<vmem>>, %arg7: memref<1x128xf32, #tpu.memory_space<vmem>>, %arg8: memref<128x1024xbf16, #tpu.memory_space<vmem>>, %arg9: memref<1x1024xf32, #tpu.memory_space<vmem>>, %arg10: memref<1x1x1024xf32, #tpu.memory_space<vmem>>, %arg11: memref<8x1024xf32, #tpu.memory_space<vmem>>) attributes {dimension_semantics = [#tpu.dimension_semantics<parallel>, #tpu.dimension_semantics<arbitrary>], iteration_bounds = array<i64: 2, 4>, scalar_prefetch = 0 : i64, scratch_operands = 1 : i64, tpu.core_type = #tpu.core_type<tc>, window_params = [{transform_indices = @transform_0, window_bounds = array<i64: 1, 64, 3>}, {transform_indices = @transform_1, window_bounds = array<i64: 1, 3, 3>}, {pipeline_mode = #tpu.pipeline_mode<synchronous>, transform_indices = @transform_2, window_bounds = array<i64: 3, 64>}, {pipeline_mode = #tpu.pipeline_mode<synchronous>, transform_indices = @transform_3, window_bounds = array<i64: 1, 64>}, {pipeline_mode = #tpu.pipeline_mode<synchronous>, transform_indices = @transform_4, window_bounds = array<i64: 64, 128>}, {pipeline_mode = #tpu.pipeline_mode<synchronous>, transform_indices = @transform_5, window_bounds = array<i64: 1, 128>}, {pipeline_mode = #tpu.pipeline_mode<synchronous>, transform_indices = @transform_6, window_bounds = array<i64: 128, 1024>}, {pipeline_mode = #tpu.pipeline_mode<synchronous>, transform_indices = @transform_7, window_bounds = array<i64: 1, 1024>}, {transform_indices = @transform_8, window_bounds = array<i64: 1, 1, 1024>}]} {
    %c0_i32 = arith.constant 0 : i32
    %0 = arith.cmpi eq, %arg1, %c0_i32 : i32
    %1 = arith.extui %0 : i1 to i32
    %c0_i32_0 = arith.constant 0 : i32
    %2 = arith.cmpi ne, %1, %c0_i32_0 : i32
    scf.if %2 {
      %cst_54 = arith.constant 0xFF800000 : f32
      %99 = vector.broadcast %cst_54 : f32 to vector<8x1024xf32>
      %c0_55 = arith.constant 0 : index
      %c0_56 = arith.constant 0 : index
      %100 = vector.load %arg11[%c0_55, %c0_56] : memref<8x1024xf32, #tpu.memory_space<vmem>>, vector<8x1024xf32>
      tpu.vector_store %arg11[%c0_55, %c0_56], %99 {strides = array<i32>} : memref<8x1024xf32, #tpu.memory_space<vmem>>, vector<8x1024xf32>,
    } else {
    }
    %c0 = arith.constant 0 : index
    %c0_1 = arith.constant 0 : index
    %c0_2 = arith.constant 0 : index
    %3 = vector.load %arg2[%c0, %c0_1, %c0_2] : memref<1x64x3xf32, #tpu.memory_space<vmem>>, vector<1x64x3xf32>
    %4 = vector.shape_cast %3 : vector<1x64x3xf32> to vector<64x3xf32>
    %c0_3 = arith.constant 0 : index
    %c0_4 = arith.constant 0 : index
    %5 = vector.load %arg4[%c0_3, %c0_4] : memref<3x64xf32, #tpu.memory_space<vmem>>, vector<3x64xf32>
    %c0_5 = arith.constant 0 : index
    %c0_6 = arith.constant 0 : index
    %c0_7 = arith.constant 0 : index
    %6 = vector.load %arg3[%c0_5, %c0_6, %c0_7] : memref<1x3x3xf32, #tpu.memory_space<vmem>>, vector<1x3x3xf32>
    %7 = vector.shape_cast %6 : vector<1x3x3xf32> to vector<3x3xf32>
    %8 = vector.extract_strided_slice %7 {offsets = [0, 0], sizes = [3, 1], strides = [1, 1]} : vector<3x3xf32> to vector<3x1xf32>
    %9 = vector.extract_strided_slice %5 {offsets = [0, 0], sizes = [1, 64], strides = [1, 1]} : vector<3x64xf32> to vector<1x64xf32>
    %10 = vector.broadcast %8 : vector<3x1xf32> to vector<3x64xf32>
    %11 = vector.broadcast %9 : vector<1x64xf32> to vector<3x64xf32>
    %12 = arith.mulf %10, %11 : vector<3x64xf32>
    %13 = vector.extract_strided_slice %7 {offsets = [0, 1], sizes = [3, 1], strides = [1, 1]} : vector<3x3xf32> to vector<3x1xf32>
    %14 = vector.extract_strided_slice %5 {offsets = [1, 0], sizes = [1, 64], strides = [1, 1]} : vector<3x64xf32> to vector<1x64xf32>
    %15 = vector.broadcast %13 : vector<3x1xf32> to vector<3x64xf32>
    %16 = vector.broadcast %14 : vector<1x64xf32> to vector<3x64xf32>
    %17 = arith.mulf %15, %16 : vector<3x64xf32>
    %18 = arith.addf %12, %17 : vector<3x64xf32>
    %19 = vector.extract_strided_slice %7 {offsets = [0, 2], sizes = [3, 1], strides = [1, 1]} : vector<3x3xf32> to vector<3x1xf32>
    %20 = vector.extract_strided_slice %5 {offsets = [2, 0], sizes = [1, 64], strides = [1, 1]} : vector<3x64xf32> to vector<1x64xf32>
    %21 = vector.broadcast %19 : vector<3x1xf32> to vector<3x64xf32>
    %22 = vector.broadcast %20 : vector<1x64xf32> to vector<3x64xf32>
    %23 = arith.mulf %21, %22 : vector<3x64xf32>
    %24 = arith.addf %18, %23 : vector<3x64xf32>
    %c0_8 = arith.constant 0 : index
    %c0_9 = arith.constant 0 : index
    %25 = vector.load %arg5[%c0_8, %c0_9] : memref<1x64xf32, #tpu.memory_space<vmem>>, vector<1x64xf32>
    %26 = vector.extract_strided_slice %4 {offsets = [0, 0], sizes = [64, 1], strides = [1, 1]} : vector<64x3xf32> to vector<64x1xf32>
    %27 = vector.extract_strided_slice %24 {offsets = [0, 0], sizes = [1, 64], strides = [1, 1]} : vector<3x64xf32> to vector<1x64xf32>
    %28 = vector.broadcast %26 : vector<64x1xf32> to vector<64x64xf32>
    %29 = vector.broadcast %27 : vector<1x64xf32> to vector<64x64xf32>
    %30 = arith.mulf %28, %29 : vector<64x64xf32>
    %31 = vector.broadcast %25 : vector<1x64xf32> to vector<64x64xf32>
    %32 = arith.addf %31, %30 : vector<64x64xf32>
    %33 = vector.extract_strided_slice %4 {offsets = [0, 1], sizes = [64, 1], strides = [1, 1]} : vector<64x3xf32> to vector<64x1xf32>
    %34 = vector.extract_strided_slice %24 {offsets = [1, 0], sizes = [1, 64], strides = [1, 1]} : vector<3x64xf32> to vector<1x64xf32>
    %35 = vector.broadcast %33 : vector<64x1xf32> to vector<64x64xf32>
    %36 = vector.broadcast %34 : vector<1x64xf32> to vector<64x64xf32>
    %37 = arith.mulf %35, %36 : vector<64x64xf32>
    %38 = arith.addf %32, %37 : vector<64x64xf32>
    %39 = vector.extract_strided_slice %4 {offsets = [0, 2], sizes = [64, 1], strides = [1, 1]} : vector<64x3xf32> to vector<64x1xf32>
    %40 = vector.extract_strided_slice %24 {offsets = [2, 0], sizes = [1, 64], strides = [1, 1]} : vector<3x64xf32> to vector<1x64xf32>
    %41 = vector.broadcast %39 : vector<64x1xf32> to vector<64x64xf32>
    %42 = vector.broadcast %40 : vector<1x64xf32> to vector<64x64xf32>
    %43 = arith.mulf %41, %42 : vector<64x64xf32>
    %44 = arith.addf %38, %43 : vector<64x64xf32>
    %cst = arith.constant 0.000000e+00 : f32
    %45 = vector.broadcast %cst : f32 to vector<64x64xf32>
    %46 = arith.maximumf %44, %45 : vector<64x64xf32>
    %47 = arith.truncf %46 : vector<64x64xf32> to vector<64x64xbf16>
    %c0_10 = arith.constant 0 : index
    %c0_11 = arith.constant 0 : index
    %48 = vector.load %arg6[%c0_10, %c0_11] : memref<64x128xbf16, #tpu.memory_space<vmem>>, vector<64x128xbf16>
    %cst_12 = arith.constant dense<0.000000e+00> : vector<64x128xf32>
    %49 = tpu.matmul %47, %48, %cst_12 {dimension_numbers = #tpu.dot_dimension_numbers<[1], [0], [0], [1], [0, 0, 1, 1], [], []>} : vector<64x64xbf16>, vector<64x128xbf16>, vector<64x128xf32> -> vector<64x128xf32>
    %c0_13 = arith.constant 0 : index
    %c0_14 = arith.constant 0 : index
    %50 = vector.load %arg7[%c0_13, %c0_14] : memref<1x128xf32, #tpu.memory_space<vmem>>, vector<1x128xf32>
    %51 = vector.broadcast %50 : vector<1x128xf32> to vector<64x128xf32>
    %52 = arith.addf %49, %51 : vector<64x128xf32>
    %cst_15 = arith.constant 0.000000e+00 : f32
    %53 = vector.broadcast %cst_15 : f32 to vector<64x128xf32>
    %54 = arith.maximumf %52, %53 : vector<64x128xf32>
    %55 = arith.truncf %54 : vector<64x128xf32> to vector<64x128xbf16>
    %c0_16 = arith.constant 0 : index
    %c0_17 = arith.constant 0 : index
    %56 = vector.load %arg8[%c0_16, %c0_17] : memref<128x1024xbf16, #tpu.memory_space<vmem>>, vector<128x256xbf16>
    %cst_18 = arith.constant dense<0.000000e+00> : vector<64x256xf32>
    %57 = tpu.matmul %55, %56, %cst_18 {dimension_numbers = #tpu.dot_dimension_numbers<[1], [0], [0], [1], [0, 0, 1, 1], [], []>} : vector<64x128xbf16>, vector<128x256xbf16>, vector<64x256xf32> -> vector<64x256xf32>
    %c0_19 = arith.constant 0 : index
    %c0_20 = arith.constant 0 : index
    %58 = vector.load %arg9[%c0_19, %c0_20] : memref<1x1024xf32, #tpu.memory_space<vmem>>, vector<1x256xf32>
    %59 = vector.broadcast %58 : vector<1x256xf32> to vector<64x256xf32>
    %60 = arith.addf %57, %59 : vector<64x256xf32>
    %61 = vector.shape_cast %60 : vector<64x256xf32> to vector<8x8x256xf32>
    %cst_21 = arith.constant dense<0xFF800000> : vector<8x256xf32>
    %62 = vector.multi_reduction <maximumf>, %61, %cst_21 [0] : vector<8x8x256xf32> to vector<8x256xf32>
    %c0_22 = arith.constant 0 : index
    %c0_23 = arith.constant 0 : index
    %63 = vector.load %arg11[%c0_22, %c0_23] : memref<8x1024xf32, #tpu.memory_space<vmem>>, vector<8x256xf32>
    %64 = arith.maximumf %63, %62 : vector<8x256xf32>
    %c0_24 = arith.constant 0 : index
    %c0_25 = arith.constant 0 : index
    %65 = vector.load %arg11[%c0_24, %c0_25] : memref<8x1024xf32, #tpu.memory_space<vmem>>, vector<8x256xf32>
    tpu.vector_store %arg11[%c0_24, %c0_25], %64 {strides = array<i32>} : memref<8x1024xf32, #tpu.memory_space<vmem>>, vector<8x256xf32>,
    %c0_26 = arith.constant 0 : index
    %c256 = arith.constant 256 : index
    %66 = vector.load %arg8[%c0_26, %c256] : memref<128x1024xbf16, #tpu.memory_space<vmem>>, vector<128x256xbf16>
    %cst_27 = arith.constant dense<0.000000e+00> : vector<64x256xf32>
    %67 = tpu.matmul %55, %66, %cst_27 {dimension_numbers = #tpu.dot_dimension_numbers<[1], [0], [0], [1], [0, 0, 1, 1], [], []>} : vector<64x128xbf16>, vector<128x256xbf16>, vector<64x256xf32> -> vector<64x256xf32>
    %c0_28 = arith.constant 0 : index
    %c256_29 = arith.constant 256 : index
    %68 = vector.load %arg9[%c0_28, %c256_29] : memref<1x1024xf32, #tpu.memory_space<vmem>>, vector<1x256xf32>
    %69 = vector.broadcast %68 : vector<1x256xf32> to vector<64x256xf32>
    %70 = arith.addf %67, %69 : vector<64x256xf32>
    %71 = vector.shape_cast %70 : vector<64x256xf32> to vector<8x8x256xf32>
    %cst_30 = arith.constant dense<0xFF800000> : vector<8x256xf32>
    %72 = vector.multi_reduction <maximumf>, %71, %cst_30 [0] : vector<8x8x256xf32> to vector<8x256xf32>
    %c0_31 = arith.constant 0 : index
    %c256_32 = arith.constant 256 : index
    %73 = vector.load %arg11[%c0_31, %c256_32] : memref<8x1024xf32, #tpu.memory_space<vmem>>, vector<8x256xf32>
    %74 = arith.maximumf %73, %72 : vector<8x256xf32>
    %c0_33 = arith.constant 0 : index
    %c256_34 = arith.constant 256 : index
    %75 = vector.load %arg11[%c0_33, %c256_34] : memref<8x1024xf32, #tpu.memory_space<vmem>>, vector<8x256xf32>
    tpu.vector_store %arg11[%c0_33, %c256_34], %74 {strides = array<i32>} : memref<8x1024xf32, #tpu.memory_space<vmem>>, vector<8x256xf32>,
    %c0_35 = arith.constant 0 : index
    %c512 = arith.constant 512 : index
    %76 = vector.load %arg8[%c0_35, %c512] : memref<128x1024xbf16, #tpu.memory_space<vmem>>, vector<128x256xbf16>
    %cst_36 = arith.constant dense<0.000000e+00> : vector<64x256xf32>
    %77 = tpu.matmul %55, %76, %cst_36 {dimension_numbers = #tpu.dot_dimension_numbers<[1], [0], [0], [1], [0, 0, 1, 1], [], []>} : vector<64x128xbf16>, vector<128x256xbf16>, vector<64x256xf32> -> vector<64x256xf32>
    %c0_37 = arith.constant 0 : index
    %c512_38 = arith.constant 512 : index
    %78 = vector.load %arg9[%c0_37, %c512_38] : memref<1x1024xf32, #tpu.memory_space<vmem>>, vector<1x256xf32>
    %79 = vector.broadcast %78 : vector<1x256xf32> to vector<64x256xf32>
    %80 = arith.addf %77, %79 : vector<64x256xf32>
    %81 = vector.shape_cast %80 : vector<64x256xf32> to vector<8x8x256xf32>
    %cst_39 = arith.constant dense<0xFF800000> : vector<8x256xf32>
    %82 = vector.multi_reduction <maximumf>, %81, %cst_39 [0] : vector<8x8x256xf32> to vector<8x256xf32>
    %c0_40 = arith.constant 0 : index
    %c512_41 = arith.constant 512 : index
    %83 = vector.load %arg11[%c0_40, %c512_41] : memref<8x1024xf32, #tpu.memory_space<vmem>>, vector<8x256xf32>
    %84 = arith.maximumf %83, %82 : vector<8x256xf32>
    %c0_42 = arith.constant 0 : index
    %c512_43 = arith.constant 512 : index
    %85 = vector.load %arg11[%c0_42, %c512_43] : memref<8x1024xf32, #tpu.memory_space<vmem>>, vector<8x256xf32>
    tpu.vector_store %arg11[%c0_42, %c512_43], %84 {strides = array<i32>} : memref<8x1024xf32, #tpu.memory_space<vmem>>, vector<8x256xf32>,
    %c0_44 = arith.constant 0 : index
    %c768 = arith.constant 768 : index
    %86 = vector.load %arg8[%c0_44, %c768] : memref<128x1024xbf16, #tpu.memory_space<vmem>>, vector<128x256xbf16>
    %cst_45 = arith.constant dense<0.000000e+00> : vector<64x256xf32>
    %87 = tpu.matmul %55, %86, %cst_45 {dimension_numbers = #tpu.dot_dimension_numbers<[1], [0], [0], [1], [0, 0, 1, 1], [], []>} : vector<64x128xbf16>, vector<128x256xbf16>, vector<64x256xf32> -> vector<64x256xf32>
    %c0_46 = arith.constant 0 : index
    %c768_47 = arith.constant 768 : index
    %88 = vector.load %arg9[%c0_46, %c768_47] : memref<1x1024xf32, #tpu.memory_space<vmem>>, vector<1x256xf32>
    %89 = vector.broadcast %88 : vector<1x256xf32> to vector<64x256xf32>
    %90 = arith.addf %87, %89 : vector<64x256xf32>
    %91 = vector.shape_cast %90 : vector<64x256xf32> to vector<8x8x256xf32>
    %cst_48 = arith.constant dense<0xFF800000> : vector<8x256xf32>
    %92 = vector.multi_reduction <maximumf>, %91, %cst_48 [0] : vector<8x8x256xf32> to vector<8x256xf32>
    %c0_49 = arith.constant 0 : index
    %c768_50 = arith.constant 768 : index
    %93 = vector.load %arg11[%c0_49, %c768_50] : memref<8x1024xf32, #tpu.memory_space<vmem>>, vector<8x256xf32>
    %94 = arith.maximumf %93, %92 : vector<8x256xf32>
    %c0_51 = arith.constant 0 : index
    %c768_52 = arith.constant 768 : index
    %95 = vector.load %arg11[%c0_51, %c768_52] : memref<8x1024xf32, #tpu.memory_space<vmem>>, vector<8x256xf32>
    tpu.vector_store %arg11[%c0_51, %c768_52], %94 {strides = array<i32>} : memref<8x1024xf32, #tpu.memory_space<vmem>>, vector<8x256xf32>,
    %c3_i32 = arith.constant 3 : i32
    %96 = arith.cmpi eq, %arg1, %c3_i32 : i32
    %97 = arith.extui %96 : i1 to i32
    %c0_i32_53 = arith.constant 0 : i32
    %98 = arith.cmpi ne, %97, %c0_i32_53 : i32
    scf.if %98 {
      %c0_54 = arith.constant 0 : index
      %c0_55 = arith.constant 0 : index
      %99 = vector.load %arg11[%c0_54, %c0_55] : memref<8x1024xf32, #tpu.memory_space<vmem>>, vector<8x1024xf32>
      %cst_56 = arith.constant dense<0xFF800000> : vector<1024xf32>
      %100 = vector.multi_reduction <maximumf>, %99, %cst_56 [0] : vector<8x1024xf32> to vector<1024xf32>
      %101 = vector.shape_cast %100 : vector<1024xf32> to vector<1x1024xf32>
      %c0_57 = arith.constant 0 : index
      %c0_58 = arith.constant 0 : index
      %c0_59 = arith.constant 0 : index
      %102 = vector.load %arg10[%c0_57, %c0_58, %c0_59] : memref<1x1x1024xf32, #tpu.memory_space<vmem>>, vector<1x1x1024xf32>
      %103 = vector.shape_cast %102 : vector<1x1x1024xf32> to vector<1x1024xf32>
      %104 = vector.shape_cast %101 : vector<1x1024xf32> to vector<1x1x1024xf32>
      tpu.vector_store %arg10[%c0_57, %c0_58, %c0_59], %104 {strides = array<i32>} : memref<1x1x1024xf32, #tpu.memory_space<vmem>>, vector<1x1x1024xf32>,
    } else {
    }
    return
  }
  func.func @transform_0(%arg0: i32, %arg1: i32) -> (i32, i32, i32) {
    %c0_i32 = arith.constant 0 : i32
    %c0_i32_0 = arith.constant 0 : i32
    return %arg0, %arg1, %c0_i32 : i32, i32, i32
  }
  func.func @transform_1(%arg0: i32, %arg1: i32) -> (i32, i32, i32) {
    %c0_i32 = arith.constant 0 : i32
    %c0_i32_0 = arith.constant 0 : i32
    %c0_i32_1 = arith.constant 0 : i32
    return %arg0, %c0_i32, %c0_i32_0 : i32, i32, i32
  }
  func.func @transform_2(%arg0: i32, %arg1: i32) -> (i32, i32) {
    %c0_i32 = arith.constant 0 : i32
    %c0_i32_0 = arith.constant 0 : i32
    %c0_i32_1 = arith.constant 0 : i32
    return %c0_i32, %c0_i32_0 : i32, i32
  }
  func.func @transform_3(%arg0: i32, %arg1: i32) -> (i32, i32) {
    %c0_i32 = arith.constant 0 : i32
    %c0_i32_0 = arith.constant 0 : i32
    %c0_i32_1 = arith.constant 0 : i32
    return %c0_i32, %c0_i32_0 : i32, i32
  }
  func.func @transform_4(%arg0: i32, %arg1: i32) -> (i32, i32) {
    %c0_i32 = arith.constant 0 : i32
    %c0_i32_0 = arith.constant 0 : i32
    %c0_i32_1 = arith.constant 0 : i32
    return %c0_i32, %c0_i32_0 : i32, i32
  }
  func.func @transform_5(%arg0: i32, %arg1: i32) -> (i32, i32) {
    %c0_i32 = arith.constant 0 : i32
    %c0_i32_0 = arith.constant 0 : i32
    %c0_i32_1 = arith.constant 0 : i32
    return %c0_i32, %c0_i32_0 : i32, i32
  }
  func.func @transform_6(%arg0: i32, %arg1: i32) -> (i32, i32) {
    %c0_i32 = arith.constant 0 : i32
    %c0_i32_0 = arith.constant 0 : i32
    %c0_i32_1 = arith.constant 0 : i32
    return %c0_i32, %c0_i32_0 : i32, i32
  }
  func.func @transform_7(%arg0: i32, %arg1: i32) -> (i32, i32) {
    %c0_i32 = arith.constant 0 : i32
    %c0_i32_0 = arith.constant 0 : i32
    %c0_i32_1 = arith.constant 0 : i32
    return %c0_i32, %c0_i32_0 : i32, i32
  }
  func.func @transform_8(%arg0: i32, %arg1: i32) -> (i32, i32, i32) {
    %c0_i32 = arith.constant 0 : i32
    %c0_i32_0 = arith.constant 0 : i32
    %c0_i32_1 = arith.constant 0 : i32
    return %arg0, %c0_i32, %c0_i32_0 : i32, i32, i32
  }
}

module attributes {stable_mosaic.version = 11 : i64} {
  func.func @_fc3_kernel(%arg0: memref<2x1024xf32, #tpu.memory_space<vmem>>, %arg1: memref<1024x512xbf16, #tpu.memory_space<vmem>>, %arg2: memref<1x512xf32, #tpu.memory_space<vmem>>, %arg3: memref<512x256xbf16, #tpu.memory_space<vmem>>, %arg4: memref<1x256xf32, #tpu.memory_space<vmem>>, %arg5: memref<256x2xbf16, #tpu.memory_space<vmem>>, %arg6: memref<1x2xf32, #tpu.memory_space<vmem>>, %arg7: memref<2x2xf32, #tpu.memory_space<vmem>>) attributes {dimension_semantics = [], scalar_prefetch = 0 : i64, scratch_operands = 0 : i64, tpu.core_type = #tpu.core_type<tc>} {
    %c0 = arith.constant 0 : index
    %c0_0 = arith.constant 0 : index
    %0 = vector.load %arg0[%c0, %c0_0] : memref<2x1024xf32, #tpu.memory_space<vmem>>, vector<2x1024xf32>
    %1 = arith.truncf %0 : vector<2x1024xf32> to vector<2x1024xbf16>
    %c0_1 = arith.constant 0 : index
    %c0_2 = arith.constant 0 : index
    %2 = vector.load %arg1[%c0_1, %c0_2] : memref<1024x512xbf16, #tpu.memory_space<vmem>>, vector<1024x512xbf16>
    %cst = arith.constant dense<0.000000e+00> : vector<2x512xf32>
    %3 = tpu.matmul %1, %2, %cst {dimension_numbers = #tpu.dot_dimension_numbers<[1], [0], [0], [1], [0, 0, 1, 1], [], []>} : vector<2x1024xbf16>, vector<1024x512xbf16>, vector<2x512xf32> -> vector<2x512xf32>
    %c0_3 = arith.constant 0 : index
    %c0_4 = arith.constant 0 : index
    %4 = vector.load %arg2[%c0_3, %c0_4] : memref<1x512xf32, #tpu.memory_space<vmem>>, vector<1x512xf32>
    %5 = vector.broadcast %4 : vector<1x512xf32> to vector<2x512xf32>
    %6 = arith.addf %3, %5 : vector<2x512xf32>
    %cst_5 = arith.constant 0.000000e+00 : f32
    %7 = vector.broadcast %cst_5 : f32 to vector<2x512xf32>
    %8 = arith.maximumf %6, %7 : vector<2x512xf32>
    %9 = arith.truncf %8 : vector<2x512xf32> to vector<2x512xbf16>
    %c0_6 = arith.constant 0 : index
    %c0_7 = arith.constant 0 : index
    %10 = vector.load %arg3[%c0_6, %c0_7] : memref<512x256xbf16, #tpu.memory_space<vmem>>, vector<512x256xbf16>
    %cst_8 = arith.constant dense<0.000000e+00> : vector<2x256xf32>
    %11 = tpu.matmul %9, %10, %cst_8 {dimension_numbers = #tpu.dot_dimension_numbers<[1], [0], [0], [1], [0, 0, 1, 1], [], []>} : vector<2x512xbf16>, vector<512x256xbf16>, vector<2x256xf32> -> vector<2x256xf32>
    %c0_9 = arith.constant 0 : index
    %c0_10 = arith.constant 0 : index
    %12 = vector.load %arg4[%c0_9, %c0_10] : memref<1x256xf32, #tpu.memory_space<vmem>>, vector<1x256xf32>
    %13 = vector.broadcast %12 : vector<1x256xf32> to vector<2x256xf32>
    %14 = arith.addf %11, %13 : vector<2x256xf32>
    %cst_11 = arith.constant 0.000000e+00 : f32
    %15 = vector.broadcast %cst_11 : f32 to vector<2x256xf32>
    %16 = arith.maximumf %14, %15 : vector<2x256xf32>
    %17 = arith.truncf %16 : vector<2x256xf32> to vector<2x256xbf16>
    %c0_12 = arith.constant 0 : index
    %c0_13 = arith.constant 0 : index
    %18 = vector.load %arg5[%c0_12, %c0_13] : memref<256x2xbf16, #tpu.memory_space<vmem>>, vector<256x2xbf16>
    %cst_14 = arith.constant dense<0.000000e+00> : vector<2x2xf32>
    %19 = tpu.matmul %17, %18, %cst_14 {dimension_numbers = #tpu.dot_dimension_numbers<[1], [0], [0], [1], [0, 0, 1, 1], [], []>} : vector<2x256xbf16>, vector<256x2xbf16>, vector<2x2xf32> -> vector<2x2xf32>
    %c0_15 = arith.constant 0 : index
    %c0_16 = arith.constant 0 : index
    %20 = vector.load %arg6[%c0_15, %c0_16] : memref<1x2xf32, #tpu.memory_space<vmem>>, vector<1x2xf32>
    %21 = vector.broadcast %20 : vector<1x2xf32> to vector<2x2xf32>
    %22 = arith.addf %19, %21 : vector<2x2xf32>
    %cst_17 = arith.constant dense<0xFF800000> : vector<2xf32>
    %23 = vector.multi_reduction <maximumf>, %22, %cst_17 [1] : vector<2x2xf32> to vector<2xf32>
    %24 = vector.shape_cast %23 : vector<2xf32> to vector<2x1xf32>
    %25 = vector.broadcast %24 : vector<2x1xf32> to vector<2x2xf32>
    %26 = arith.subf %22, %25 : vector<2x2xf32>
    %27 = math.exp %26 : vector<2x2xf32>
    %cst_18 = arith.constant dense<0.000000e+00> : vector<2xf32>
    %28 = vector.multi_reduction <add>, %27, %cst_18 [1] : vector<2x2xf32> to vector<2xf32>
    %29 = vector.shape_cast %28 : vector<2xf32> to vector<2x1xf32>
    %30 = math.log %29 : vector<2x1xf32>
    %31 = vector.broadcast %30 : vector<2x1xf32> to vector<2x2xf32>
    %32 = arith.subf %26, %31 : vector<2x2xf32>
    %c0_19 = arith.constant 0 : index
    %c0_20 = arith.constant 0 : index
    %33 = vector.load %arg7[%c0_19, %c0_20] : memref<2x2xf32, #tpu.memory_space<vmem>>, vector<2x2xf32>
    tpu.vector_store %arg7[%c0_19, %c0_20], %32 {strides = array<i32>} : memref<2x2xf32, #tpu.memory_space<vmem>>, vector<2x2xf32>,
    return
  }
}

</mosaic_0001>

<bundles_post_ra>
// kernel: pointnet_cls_forward.4
= control target key start
LH: loop header
LB: loop body
LE: loop exit
PB: predicated region body
PF: predicated region fallthrough
CT: control target
= control target key end

     0   :  { %s1968_s24 = smov 0   ;;  %s1970_s25 = smov 0   ;;  %s2510_s0 = inlined_call_operand.vmem [shape: f32[2,256,3], index: 0, kind: input, shape index: {}]   ;;  %s2511_s1 = inlined_call_operand.vmem [shape: f32[3,64], index: 1, kind: input, shape index: {}]   ;;  %s2512_s2 = inlined_call_operand.vmem [shape: f32[1,64], index: 2, kind: input, shape index: {}]   ;;  %s2513_s3 = inlined_call_operand.vmem [shape: bf16[64,128], index: 3, kind: input, shape index: {}]   ;;  %s2514_s4 = inlined_call_operand.vmem [shape: f32[1,128], index: 4, kind: input, shape index: {}]   ;;  %s2515_s5 = inlined_call_operand.vmem [shape: bf16[128,1024], index: 5, kind: input, shape index: {}]   ;;  %s2516_s6 = inlined_call_operand.vmem [shape: f32[1,1024], index: 6, kind: input, shape index: {}]   ;;  %s2517_s7 = inlined_call_operand.vmem [shape: f32[2,1,1024], index: 7, kind: output, shape index: {}]  }
   0x1   :  { %s1972_s26 = smov 0   ;;  %s1974_s27 = smov 0  }
   0x2   :  { %s1976_s28 = smov 0  }
   0x3 LB: > { %s26_s29 = sadd.s32 1, %s1913_s26  ;;  %s29_s30 = sadd.s32 1, %s1917_s27  ;;  %s1921_s28 = sphi %s1976_s28, %s17_s28   ;;  %s1917_s27 = sphi %s1974_s27, %s2521_s27   ;;  %s1913_s26 = sphi %s1972_s26, %s2520_s26   ;;  %s1909_s25 = sphi %s1970_s25, %s2519_s25   ;;  %s1905_s24 = sphi %s1968_s24, %s2518_s24  }
   0x4   : > { %p27_p0 = scmp.ge.s32.totalorder %s26_s29, 4  ;;  %p1700_p1 = scmp.ge.s32.totalorder %s1921_s28, 1 }
   0x5   : > { %p256_p2 = scmp.lt.s32.totalorder %s1921_s28, 9 }
   0x6   : > { %s2523_s29 = smov (%p27_p0, %s26_s29), 0  ;;  %s2525_s30 = smov (!%p27_p0, %s29_s30), %s1917_s27 }
   0x7   : > { %p257_p3 = pnand %p1700_p1, %p256_p2  ;;  %p31_p4 = scmp.ge.s32.totalorder %s2525_s30, 2 }
   0x8   : > { %s1701_s8 = sshll.u32 (!%p257_p3), %s1905_s24, 3  ;;  %p292_p5 = scmp.lt.s32.totalorder (!%p257_p3), %s1909_s25, 1 }
   0x9   : > { %s2527_s30 = smov (%p31_p4, %s2525_s30), 0  ;;  %260 = sbr.rel (%p257_p3) target bundleno = 746 (0x2ea), region = 48 }
   0xa   : > { %p294_p6 = scmp.lt.s32.totalorder (!%p257_p3), %s1701_s8, 31  ;;  %p1705_p7 = scmp.ne.s32.totalorder (!%p257_p3), %s1905_s24, 0 }
  0x10   : > { %s2529_s25 = smov (!%p292_p5, %s1909_s25), 1  ;;  %s2531_s8 = smov (!%p294_p6, %s1701_s8), 31 }
  0x11   : > { %s1702_s9 = sshll.u32 %s2529_s25, 5  ;;  %s1704_s10 = sshll.u32 %s2529_s25, 3  ;;  %v1923_v0 = vmov (!%p1705_p7), -inf  }
  0x12   : > { %s297_s11 = sadd.s32 %s1702_s9, %s2531_s8  ;;  %s2004_s14 = scalar_lea.vmem %s2517_s7, %s1704_s10  ;;  %310 = vst [vmem:[#allocation2] sm:$0xff] (!%p1705_p7), %v1923_v0  ;;  %311 = vst [vmem:[#allocation2 + $0x8] sm:$0xff] (!%p1705_p7), %v1923_v0 }
  0x13   : > { %s1703_s15 = sshll.u32 %s297_s11, 3  ;;  %309 = sbr.rel (%p1705_p7) target bundleno = 26 (0x1a), region = 52  ;;  %312 = vst [vmem:[#allocation2 + $0x10] sm:$0xff] (!%p1705_p7), %v1923_v0  ;;  %313 = vst [vmem:[#allocation2 + $0x18] sm:$0xff] (!%p1705_p7), %v1923_v0 }
  0x14   : > { %s2009_s18 = scalar_lea.vmem %s2510_s0, %s1703_s15  ;;  %314 = vst [vmem:[#allocation2 + $0x20] sm:$0xff] (!%p1705_p7), %v1923_v0  ;;  %315 = vst [vmem:[#allocation2 + $0x28] sm:$0xff] (!%p1705_p7), %v1923_v0 }
  0x15   : > { %316 = vst [vmem:[#allocation2 + $0x30] sm:$0xff] (!%p1705_p7), %v1923_v0  ;;  %317 = vst [vmem:[#allocation2 + $0x38] sm:$0xff] (!%p1705_p7), %v1923_v0 }
  0x1a PF: > { %v320_v1 = vld [vmem:[%s2009_s18 + $0x10] sm:$0xff]  ;;  %v318_v2 = vld [vmem:[%s2009_s18] sm:$0xff]  ;;  %v1924_v3 = vmov 1   ;;  %v1925_v4 = vmov 0   ;;  %v321_v5 = vld [vmem:[%s2009_s18 + $0x18] sm:$0xff]  ;;  %v1926_v7 = vmov 2   ;;  %v368_v46 = vlaneseq }
  0x1b   : > { %1869 = vset.pattern.permute.xlu0 %v1924_v3  ;;  %1868 = vset.pattern.permute.xlu1 %v1925_v4  ;;  %v319_v6 = vld [vmem:[%s2009_s18 + $0x8] sm:$0xff]  ;;  %v1879_v8 = vld [vmem:[%s2513_s3] sm:$0xff]   ;;  %v325_v11 = vld [vmem:[%s2009_s18 + $0x38] sm:$0xff]  ;;  %vm549_vm0 = vcmask 523264   ;;  %p1780_p8 = scmp.ne.s32.totalorder %s1905_s24, 3 }
  0x1c   : > { %340 = vperm.xlu1 %1868, %v320_v1   ;;  %395 = vperm.xlu0 %1869, %v318_v2   ;;  %v322_v9 = vld [vmem:[%s2009_s18 + $0x20] sm:$0xff]  ;;  %v1880_v10 = vld [vmem:[%s2513_s3 + $0x8] sm:$0xff]   ;;  %v1881_v12 = vld [vmem:[%s2513_s3 + $0x10] sm:$0xff]   ;;  %v2086_v49 = vshrl.u32 %v368_v46, 7 }
  0x1d   : > { %779 = vmatprep.mubr.bf16.mxu1 %v1925_v4  ;;  %1791 = vmatprep.subr.bf16.mxu0 %v1879_v8  ;;  %v323_v13 = vld [vmem:[%s2009_s18 + $0x28] sm:$0xff]  ;;  %v1882_v14 = vld [vmem:[%s2513_s3 + $0x18] sm:$0xff]   ;;  %v324_v15 = vld [vmem:[%s2009_s18 + $0x30] sm:$0xff] }
  0x1e   : > { %1792 = vmatpush3.bf16.msra.mxu0 %v1879_v8  ;;  %v639_v16 = vld [vmem:[%s2515_s5] sm:$0xff]  ;;  %v2045_v18 = vld [vmem:[%s2515_s5 + $0x8] sm:$0xff]  ;;  %v2089_v50 = vsub.s32 0, %v2086_v49  ;;  %v2092_v51 = vsub.s32 1, %v2086_v49  ;;  %v480_v55 = vsub.s32 2, %v2086_v49 }
  0x1f   : > { %1793 = vmatprep.subr.bf16.mxu0 %v1880_v10  ;;  %v640_v17 = vld [vmem:[%s2515_s5 + $0x20] sm:$0xff]  ;;  %v2050_v20 = vld [vmem:[%s2515_s5 + $0x28] sm:$0xff] }
  0x20   : > { %345 = vperm.xlu1 %1868, %v321_v5   ;;  %407 = vperm.xlu0 %1869, %v321_v5   ;;  %v1717_v19 = vcombine.high %v639_v16, %v640_v17  ;;  %v1716_v21 = vcombine.low %v639_v16, %v640_v17  ;;  %v641_v22 = vld [vmem:[%s2515_s5 + $0x40] sm:$0xff]  ;;  %v1732_v24 = vcombine.low %v2045_v18, %v2050_v20 }
  0x21   : > { %v642_v23 = vld [vmem:[%s2515_s5 + $0x60] sm:$0xff]  ;;  %v1733_v25 = vcombine.high %v2045_v18, %v2050_v20  ;;  %v864_v18 = vld [vmem:[%s2515_s5 + $0x108] sm:$0xff] }
  0x22   : > { %1794 = vmatpush3.bf16.msra.mxu0 %v1880_v10  ;;  %v1719_v26 = vcombine.high %v641_v22, %v642_v23  ;;  %v643_v27 = vld [vmem:[%s2515_s5 + $0x80] sm:$0xff]  ;;  %747 = vmatprep.subr.bf16.mxu1 %v1717_v19  ;;  %v1718_v29 = vcombine.low %v641_v22, %v642_v23  ;;  %v865_v20 = vld [vmem:[%s2515_s5 + $0x128] sm:$0xff] }
  0x23   : > { %1795 = vmatprep.subr.bf16.mxu0 %v1881_v12  ;;  %v644_v28 = vld [vmem:[%s2515_s5 + $0xa0] sm:$0xff]  ;;  %748 = vmatpush1.bf16.msra.mxu1 %v1716_v21 }
  0x24   : > { %1870 = vset.pattern.permute.xlu1 %v1924_v3  ;;  %1872 = vset.pattern.permute.xlu0 %v1926_v7  ;;  %v1721_v30 = vcombine.high %v643_v27, %v644_v28  ;;  %v645_v31 = vld [vmem:[%s2515_s5 + $0xc0] sm:$0xff]  ;;  %v1720_v33 = vcombine.low %v643_v27, %v644_v28 }
  0x25   : > { %399 = vperm.xlu1 %1870, %v319_v6   ;;  %451 = vperm.xlu0 %1872, %v319_v6   ;;  %v646_v32 = vld [vmem:[%s2515_s5 + $0xe0] sm:$0xff] }
  0x26   : > { %1796 = vmatpush3.bf16.msra.mxu0 %v1881_v12  ;;  %749 = vmatprep.subr.bf16.mxu1 %v1719_v26  ;;  %v1723_v34 = vcombine.high %v645_v31, %v646_v32  ;;  %v647_v35 = vld [vmem:[%s2515_s5 + $0x100] sm:$0xff]  ;;  %v1722_v37 = vcombine.low %v645_v31, %v646_v32 }
  0x27   : > { %1797 = vmatprep.subr.bf16.mxu0 %v1882_v14  ;;  %750 = vmatpush1.bf16.msra.mxu1 %v1718_v29  ;;  %v648_v36 = vld [vmem:[%s2515_s5 + $0x120] sm:$0xff] }
  0x28   : > { %751 = vmatprep.subr.bf16.mxu1 %v1721_v30  ;;  %v1725_v38 = vcombine.high %v647_v35, %v648_v36  ;;  %v649_v39 = vld [vmem:[%s2515_s5 + $0x140] sm:$0xff]  ;;  %v1724_v41 = vcombine.low %v647_v35, %v648_v36  ;;  %v859_v35 = vld [vmem:[%s2515_s5 + $0x68] sm:$0xff] }
  0x29   : > { %403 = vperm.xlu1 %1870, %v320_v1   ;;  %1873 = vset.pattern.permute.xlu0 %v1925_v4  ;;  %v650_v40 = vld [vmem:[%s2515_s5 + $0x160] sm:$0xff] }
  0x2a   : > { %330 = vperm.xlu0 %1873, %v318_v2   ;;  %1798 = vmatpush3.bf16.msra.mxu0 %v1882_v14  ;;  %v1727_v42 = vcombine.high %v649_v39, %v650_v40  ;;  %v1726_v43 = vcombine.low %v649_v39, %v650_v40  ;;  %v326_v54 = vld [vmem:[%s2511_s1] sm:$0x7] }
  0x2b   : > { %964 = vmatprep.subr.bf16.mxu0 %v1733_v25  ;;  %752 = vmatpush1.bf16.msra.mxu1 %v1720_v33  ;;  %v2099_v56 = vrot.slane %v326_v54, %v2089_v50  ;;  %v2102_v57 = vrot.slane %v326_v54, %v2092_v51  ;;  %v2105_v61 = vrot.slane %v326_v54, %v480_v55  ;;  %v2111_v63 = vld [vmem:[%s2512_s2] ss:$0 sm:$0xff] }
  0x2c   : > { %753 = vmatprep.subr.bf16.mxu1 %v1723_v34  ;;  %v858_v34 = vld [vmem:[%s2515_s5 + $0x48] sm:$0xff] }
  0x2d   : > { %1871 = vset.pattern.permute.xlu1 %v1926_v7  ;;  %v1735_v40 = vcombine.high %v858_v34, %v859_v35 }
  0x2e   : > { %447 = vperm.xlu1 %1871, %v318_v2   ;;  %335 = vperm.xlu0 %1873, %v319_v6  }
  0x2f   : > { %754 = vmatpush1.bf16.msra.mxu1 %v1722_v37 }
  0x30   : > { %755 = vmatprep.subr.bf16.mxu1 %v1725_v38 }
  0x32   : > { %455 = vperm.xlu1 %1871, %v320_v1   ;;  %350 = vperm.xlu0 %1873, %v322_v9  }
  0x33   : > { %756 = vmatpush1.bf16.msra.mxu1 %v1724_v41  ;;  %v860_v41 = vld [vmem:[%s2515_s5 + $0x88] sm:$0xff] }
  0x34   : > { %757 = vmatprep.subr.bf16.mxu1 %v1727_v42  ;;  %v861_v42 = vld [vmem:[%s2515_s5 + $0xa8] sm:$0xff] }
  0x35   : > { %v1737_v46 = vcombine.high %v860_v41, %v861_v42 }
  0x36   : > { %459 = vperm.xlu1 %1871, %v321_v5   ;;  %365 = vperm.xlu0 %1873, %v325_v11  }
  0x37   : > { %758 = vmatpush1.bf16.msra.mxu1 %v1726_v43 }
  0x3a   : > { %1874 = vset.pattern.permute.xlu1 %v1925_v4  ;;  %1876 = vset.pattern.permute.xlu0 %v1924_v3 }
  0x3b   : > { %355 = vperm.xlu1 %1874, %v323_v13   ;;  %415 = vperm.xlu0 %1876, %v323_v13  }
  0x3f   : > { %360 = vperm.xlu1 %1874, %v324_v15   ;;  %1877 = vset.pattern.permute.xlu0 %v1926_v7 }
  0x40   : > { %463 = vperm.xlu0 %1877, %v322_v9  }
  0x43   : > { %1875 = vset.pattern.permute.xlu1 %v1924_v3 }
  0x44   : > { %411 = vperm.xlu1 %1875, %v322_v9   ;;  %475 = vperm.xlu0 %1877, %v325_v11  }
  0x48   : > { %419 = vperm.xlu1 %1875, %v324_v15  }
  0x4c   : > { %423 = vperm.xlu1 %1875, %v325_v11  }
  0x50   : > { %1878 = vset.pattern.permute.xlu1 %v1926_v7 }
  0x51   : > { %467 = vperm.xlu1 %1878, %v323_v13  }
  0x55   : > { %471 = vperm.xlu1 %1878, %v324_v15  }
  0x9b   : > { %v341_v44 = vpop.permute.xlu1 %340  ;;  %v396_v45 = vpop.permute.xlu0 %395 }
  0x9c   : > { %v430_v60 = vmul.f32 %v2102_v57, %v396_v45  ;;  %v374_v5 = vmul.f32 %v2099_v56, %v341_v44  ;;  %v1734_v45 = vcombine.low %v858_v34, %v859_v35 }
  0x9e   : > { %v388_v16 = vadd.f32 %v2111_v63, %v374_v5 }
  0x9f   : > { %v346_v47 = vpop.permute.xlu1 %345  ;;  %v408_v48 = vpop.permute.xlu0 %407 }
  0xa0   : > { %v375_v1 = vmul.f32 %v2099_v56, %v346_v47  ;;  %v433_v14 = vmul.f32 %v2102_v57, %v408_v48  ;;  %v862_v47 = vld [vmem:[%s2515_s5 + $0xc8] sm:$0xff] }
  0xa1   : > { %v863_v48 = vld [vmem:[%s2515_s5 + $0xe8] sm:$0xff] }
  0xa2   : > { %v389_v13 = vadd.f32 %v2111_v63, %v375_v1  ;;  %v1739_v54 = vcombine.high %v862_v47, %v863_v48  ;;  %v866_v1 = vld [vmem:[%s2515_s5 + $0x148] sm:$0xff] }
  0xa4   : > { %v400_v52 = vpop.permute.xlu1 %399  ;;  %v452_v53 = vpop.permute.xlu0 %451  ;;  %v441_v25 = vadd.f32 %v433_v14, %v389_v13 }
  0xa5   : > { %v431_v9 = vmul.f32 %v2102_v57, %v400_v52  ;;  %v483_v10 = vmul.f32 %v2105_v61, %v452_v53  ;;  %v1736_v53 = vcombine.low %v860_v41, %v861_v42  ;;  %v869_v42 = vld [vmem:[%s2515_s5 + $0x1a8] sm:$0xff] }
  0xa8   : > { %v404_v58 = vpop.permute.xlu1 %403 }
  0xa9   : > { %v331_v59 = vpop.permute.xlu0 %330  ;;  %v432_v11 = vmul.f32 %v2102_v57, %v404_v58 }
  0xaa   : > { %v372_v62 = vmul.f32 %v2099_v56, %v331_v59  ;;  %v1738_v59 = vcombine.low %v862_v47, %v863_v48  ;;  %v654_v47 = vld [vmem:[%s2515_s5 + $0x1e0] sm:$0xff]  ;;  %v870_v48 = vld [vmem:[%s2515_s5 + $0x1c8] sm:$0xff] }
  0xab   : > { %v440_v22 = vadd.f32 %v432_v11, %v388_v16 }
  0xac   : > { %v386_v0 = vadd.f32 %v2111_v63, %v372_v62 }
  0xad   : > { %v448_v2 = vpop.permute.xlu1 %447  ;;  %v336_v3 = vpop.permute.xlu0 %335 }
  0xae   : > { %v438_v6 = vadd.f32 %v430_v60, %v386_v0  ;;  %v482_v7 = vmul.f32 %v2105_v61, %v448_v2  ;;  %v373_v8 = vmul.f32 %v2099_v56, %v336_v3  ;;  %v1741_v0 = vcombine.high %v864_v18, %v865_v20  ;;  %v867_v2 = vld [vmem:[%s2515_s5 + $0x168] sm:$0xff] }
  0xb0   : > { %v387_v12 = vadd.f32 %v2111_v63, %v373_v8  ;;  %v490_v17 = vadd.f32 %v482_v7, %v438_v6  ;;  %v1740_v8 = vcombine.low %v864_v18, %v865_v20  ;;  %v1073_v20 = vld [vmem:[%s2515_s5 + $0x10] sm:$0xff] }
  0xb1   : > { %v456_v15 = vpop.permute.xlu1 %455  ;;  %v351_v33 = vpop.permute.xlu0 %350 }
  0xb2   : > { %v439_v19 = vadd.f32 %v431_v9, %v387_v12  ;;  %v484_v21 = vmul.f32 %v2105_v61, %v456_v15  ;;  %v498_v27 = vmax.f32 %v490_v17, 0.0  ;;  %v1743_v9 = vcombine.high %v866_v1, %v867_v2 }
  0xb4   : > { %v491_v23 = vadd.f32 %v483_v10, %v439_v19  ;;  %v492_v28 = vadd.f32 %v484_v21, %v440_v22  ;;  %v1742_v19 = vcombine.low %v866_v1, %v867_v2  ;;  %v2225_v2 = vld [vmem:[%s2514_s4] ss:$0 sm:$0xff] }
  0xb5   : > { %v460_v26 = vpop.permute.xlu1 %459  ;;  %v366_v44 = vpop.permute.xlu0 %365 }
  0xb6   : > { %v485_v29 = vmul.f32 %v2105_v61, %v460_v26  ;;  %v499_v30 = vmax.f32 %v491_v23, 0.0  ;;  %v500_v36 = vmax.f32 %v492_v28, 0.0  ;;  %v379_v6 = vmul.f32 %v2099_v56, %v366_v44 }
  0xb8   : > { %v493_v31 = vadd.f32 %v485_v29, %v441_v25  ;;  %v506_v32 = vpack.c.bf16 %v499_v30, %v498_v27  ;;  %v393_v16 = vadd.f32 %v2111_v63, %v379_v6 }
  0xba   : > { %v501_v37 = vmax.f32 %v493_v31, 0.0  ;;  %v356_v38 = vpop.permute.xlu1 %355  ;;  %1799 = vmatprep.mubr.msk.bf16.mxu0 %vm549_vm0, %v506_v32  ;;  %v416_v55 = vpop.permute.xlu0 %415 }
  0xbb   : > { %v377_v60 = vmul.f32 %v2099_v56, %v356_v38  ;;  %v435_v11 = vmul.f32 %v2102_v57, %v416_v55 }
  0xbc   : > { %v507_v39 = vpack.c.bf16 %v501_v37, %v500_v36 }
  0xbd   : > { %v391_v10 = vadd.f32 %v2111_v63, %v377_v60 }
  0xbe   : > { %v361_v43 = vpop.permute.xlu1 %360  ;;  %1800 = vmatmul.mubr.msk.bf16.vlgmr.msra.gmra.mrb[0].mxu0 %vm549_vm0, %v507_v39 }
  0xbf   : > { %965 = vmatpush1.bf16.msra.mxu0 %v1732_v24  ;;  %v376_v24 = vmul.f32 %v2099_v56, %v351_v33  ;;  %v464_v3 = vpop.permute.xlu0 %463  ;;  %v378_v17 = vmul.f32 %v2099_v56, %v361_v43  ;;  %v443_v21 = vadd.f32 %v435_v11, %v391_v10 }
  0xc0   : > { %966 = vmatprep.subr.bf16.mxu0 %v1735_v40  ;;  %v486_v13 = vmul.f32 %v2105_v61, %v464_v3  ;;  %v652_v40 = vld [vmem:[%s2515_s5 + $0x1a0] sm:$0xff] }
  0xc1   : > { %v390_v5 = vadd.f32 %v2111_v63, %v376_v24  ;;  %v392_v29 = vadd.f32 %v2111_v63, %v378_v17  ;;  %v651_v63 = vld [vmem:[%s2515_s5 + $0x180] sm:$0xff]  ;;  %v1074_v24 = vld [vmem:[%s2515_s5 + $0x30] sm:$0xff] }
  0xc2   : > { %v1729_v41 = vcombine.high %v651_v63, %v652_v40  ;;  %v1749_v60 = vcombine.high %v1073_v20, %v1074_v24  ;;  %v1076_v17 = vld [vmem:[%s2515_s5 + $0x70] sm:$0xff] }
  0xc3   : > { %v412_v52 = vpop.permute.xlu1 %411  ;;  %967 = vmatpush1.bf16.msra.mxu0 %v1734_v45  ;;  %v476_v15 = vpop.permute.xlu0 %475  ;;  %v1728_v45 = vcombine.low %v651_v63, %v652_v40  ;;  %v1081_v40 = vld [vmem:[%s2515_s5 + $0x110] sm:$0xff] }
  0xc4   : > { %968 = vmatprep.subr.bf16.mxu0 %v1737_v46  ;;  %v434_v62 = vmul.f32 %v2102_v57, %v412_v52  ;;  %v489_v27 = vmul.f32 %v2105_v61, %v476_v15  ;;  %759 = vmatprep.subr.bf16.mxu1 %v1729_v41  ;;  %v653_v46 = vld [vmem:[%s2515_s5 + $0x1c0] sm:$0xff]  ;;  %v1298_v41 = vld [vmem:[%s2515_s5 + $0x118] sm:$0xff] }
  0xc5   : > { %760 = vmatpush1.bf16.msra.mxu1 %v1728_v45  ;;  %v1731_v52 = vcombine.high %v653_v46, %v654_v47  ;;  %v1730_v18 = vcombine.low %v653_v46, %v654_v47  ;;  %v1083_v47 = vld [vmem:[%s2515_s5 + $0x150] sm:$0xff] }
  0xc6   : > { %v442_v12 = vadd.f32 %v434_v62, %v390_v5  ;;  %v1291_v62 = vld [vmem:[%s2515_s5 + $0x38] sm:$0xff] }
  0xc7   : > { %v420_v58 = vpop.permute.xlu1 %419  ;;  %969 = vmatpush1.bf16.msra.mxu0 %v1736_v53  ;;  %v871_v53 = vld [vmem:[%s2515_s5 + $0x1e8] sm:$0xff]  ;;  %761 = vmatprep.subr.bf16.mxu1 %v1731_v52  ;;  %v1300_v52 = vld [vmem:[%s2515_s5 + $0x158] sm:$0xff] }
  0xc8   : > { %970 = vmatprep.subr.bf16.mxu0 %v1739_v54  ;;  %v494_v22 = vadd.f32 %v486_v13, %v442_v12  ;;  %v436_v25 = vmul.f32 %v2102_v57, %v420_v58  ;;  %v1746_v54 = vcombine.low %v870_v48, %v871_v53  ;;  %v1747_v55 = vcombine.high %v870_v48, %v871_v53  ;;  %v1290_v58 = vld [vmem:[%s2515_s5 + $0x18] sm:$0xff]  ;;  %v1084_v48 = vld [vmem:[%s2515_s5 + $0x170] sm:$0xff] }
  0xc9   : > { %762 = vmatpush1.bf16.msra.mxu1 %v1730_v18  ;;  %v2219_v1 = vcombine.high %v1290_v58, %v1291_v62  ;;  %v1301_v53 = vld [vmem:[%s2515_s5 + $0x178] sm:$0xff]  ;;  %v1759_v18 = vcombine.high %v1083_v47, %v1084_v48 }
  0xca   : > { %v502_v31 = vmax.f32 %v494_v22, 0.0  ;;  %v444_v56 = vadd.f32 %v436_v25, %v392_v29  ;;  %1181 = vmatprep.subr.bf16.mxu1 %v1749_v60  ;;  %v1294_v29 = vld [vmem:[%s2515_s5 + $0x98] sm:$0xff] }
  0xcb   : > { %v424_v7 = vpop.permute.xlu1 %423  ;;  %971 = vmatpush1.bf16.msra.mxu0 %v1738_v59  ;;  %v1748_v59 = vcombine.low %v1073_v20, %v1074_v24  ;;  %v2327_v20 = vcombine.high %v1300_v52, %v1301_v53  ;;  %v1085_v24 = vld [vmem:[%s2515_s5 + $0x190] sm:$0xff]  ;;  %v1303_v60 = vld [vmem:[%s2515_s5 + $0x1b8] sm:$0xff] }
  0xcc   : > { %972 = vmatprep.subr.bf16.mxu0 %v1741_v0  ;;  %v437_v14 = vmul.f32 %v2102_v57, %v424_v7  ;;  %v2217_v0 = vcombine.low %v1290_v58, %v1291_v62  ;;  %v1086_v58 = vld [vmem:[%s2515_s5 + $0x1b0] sm:$0xff]  ;;  %v1758_v62 = vcombine.low %v1083_v47, %v1084_v48 }
  0xce   : > { %v445_v26 = vadd.f32 %v437_v14, %v393_v16  ;;  %v1075_v14 = vld [vmem:[%s2515_s5 + $0x50] sm:$0xff] }
  0xcf   : > { %973 = vmatpush1.bf16.msra.mxu0 %v1740_v8  ;;  %v1751_v25 = vcombine.high %v1075_v14, %v1076_v17 }
  0xd0   : > { %v468_v23 = vpop.permute.xlu1 %467  ;;  %974 = vmatprep.subr.bf16.mxu0 %v1743_v9  ;;  %v497_v33 = vadd.f32 %v489_v27, %v445_v26  ;;  %v1077_v27 = vld [vmem:[%s2515_s5 + $0x90] sm:$0xff] }
  0xd1   : > { %v487_v28 = vmul.f32 %v2105_v61, %v468_v23 }
  0xd2   : > { %v505_v38 = vmax.f32 %v497_v33, 0.0 }
  0xd3   : > { %v495_v30 = vadd.f32 %v487_v28, %v443_v21  ;;  %975 = vmatpush1.bf16.msra.mxu0 %v1742_v19  ;;  %v1292_v19 = vld [vmem:[%s2515_s5 + $0x58] sm:$0xff]  ;;  %v1078_v28 = vld [vmem:[%s2515_s5 + $0xb0] sm:$0xff] }
  0xd4   : > { %v472_v32 = vpop.permute.xlu1 %471  ;;  %v1293_v21 = vld [vmem:[%s2515_s5 + $0x78] sm:$0xff] }
  0xd5   : > { %v503_v34 = vmax.f32 %v495_v30, 0.0  ;;  %v488_v35 = vmul.f32 %v2105_v61, %v472_v32  ;;  %v868_v61 = vld [vmem:[%s2515_s5 + $0x188] sm:$0xff]  ;;  %v2247_v26 = vcombine.high %v1292_v19, %v1293_v21  ;;  %v1295_v30 = vld [vmem:[%s2515_s5 + $0xb8] sm:$0xff]  ;;  %v2266_v32 = vcombine.low %v1292_v19, %v1293_v21 }
  0xd6   : > { %v1744_v43 = vcombine.low %v868_v61, %v869_v42  ;;  %v1745_v44 = vcombine.high %v868_v61, %v869_v42  ;;  %v2269_v33 = vcombine.high %v1294_v29, %v1295_v30  ;;  %v1082_v61 = vld [vmem:[%s2515_s5 + $0x130] sm:$0xff]  ;;  %v1299_v42 = vld [vmem:[%s2515_s5 + $0x138] sm:$0xff] }
  0xd7   : > { %v508_v36 = vpack.c.bf16 %v503_v34, %v502_v31  ;;  %v496_v37 = vadd.f32 %v488_v35, %v444_v56  ;;  %v1750_v31 = vcombine.low %v1075_v14, %v1076_v17  ;;  %v1753_v56 = vcombine.high %v1077_v27, %v1078_v28  ;;  %v1079_v34 = vld [vmem:[%s2515_s5 + $0xd0] sm:$0xff] }
  0xd8   : > { %976 = vmatprep.subr.bf16.mxu0 %v1745_v44  ;;  %v1080_v35 = vld [vmem:[%s2515_s5 + $0xf0] sm:$0xff]  ;;  %v1757_v45 = vcombine.high %v1081_v40, %v1082_v61  ;;  %v2309_v46 = vcombine.high %v1298_v41, %v1299_v42  ;;  %v1760_v14 = vcombine.low %v1085_v24, %v1086_v58 }
  0xd9   : > { %v504_v57 = vmax.f32 %v496_v37, 0.0  ;;  %1803 = vmatprep.mubr.msk.bf16.mxu0 %vm549_vm0, %v508_v36  ;;  %977 = vmatpush1.bf16.msra.mxu0 %v1744_v43  ;;  %v1296_v36 = vld [vmem:[%s2515_s5 + $0xd8] sm:$0xff]  ;;  %v1754_v43 = vcombine.low %v1079_v34, %v1080_v35 }
  0xda   : > { %978 = vmatprep.subr.bf16.mxu0 %v1747_v55  ;;  %v1297_v37 = vld [vmem:[%s2515_s5 + $0xf8] sm:$0xff]  ;;  %v2324_v55 = vcombine.low %v1298_v41, %v1299_v42 }
  0xdb   : > { %v509_v39 = vpack.c.bf16 %v505_v38, %v504_v57  ;;  %v1752_v38 = vcombine.low %v1077_v27, %v1078_v28  ;;  %v2284_v57 = vcombine.low %v1294_v29, %v1295_v30  ;;  %v2287_v63 = vcombine.high %v1296_v36, %v1297_v37 }
  0xdc   : > { %v2306_v44 = vcombine.low %v1296_v36, %v1297_v37 }
  0xdd   : > { %1804 = vmatmul.mubr.msk.bf16.gmra.mrb[4].mxu0 %vm549_vm0, %v509_v39  ;;  %v1755_v39 = vcombine.high %v1079_v34, %v1080_v35 }
  0xde   : > { %996 = vmatprep.mubr.bf16.mxu0 %v1925_v4  ;;  %979 = vmatpush1.bf16.msra.mxu0 %v1746_v54  ;;  %v1756_v54 = vcombine.low %v1081_v40, %v1082_v61 }
  0xdf   : > { %1398 = vmatprep.subr.bf16.mxu0 %v2219_v1 }
 0x191   : > { %v1801_v3 = vpop.f32.mrb[0].mxu0 }
 0x192   : > { %v605_v5 = vadd.f32 %v1801_v3, %v2225_v2  ;;  %v596_v6 = vpop.f32.mrb[1].mxu0  ;;  %v2342_v3 = vcombine.low %v1300_v52, %v1301_v53 }
 0x193   : > { %v597_v7 = vadd.f32 %v2225_v2, %v596_v6  ;;  %v1802_v8 = vpop.f32.mrb[2].mxu0 }
 0x194   : > { %v608_v9 = vadd.f32 %v1802_v8, %v2225_v2  ;;  %v599_v10 = vpop.f32.mrb[3].mxu0  ;;  %v629_v12 = vmax.f32 %v605_v5, 0.0  ;;  %v1761_v5 = vcombine.high %v1085_v24, %v1086_v58  ;;  %v1088_v8 = vld [vmem:[%s2515_s5 + $0x1f0] sm:$0xff] }
 0x195   : > { %v600_v11 = vadd.f32 %v2225_v2, %v599_v10  ;;  %v627_v15 = vmax.f32 %v597_v7, 0.0  ;;  %v1087_v7 = vld [vmem:[%s2515_s5 + $0x1d0] sm:$0xff]  ;;  %v1305_v10 = vld [vmem:[%s2515_s5 + $0x1f8] sm:$0xff] }
 0x196   : > { %v630_v13 = vmax.f32 %v608_v9, 0.0  ;;  %v1304_v9 = vld [vmem:[%s2515_s5 + $0x1d8] sm:$0xff]  ;;  %v1763_v19 = vcombine.high %v1087_v7, %v1088_v8 }
 0x197   : > { %v628_v16 = vmax.f32 %v600_v11, 0.0  ;;  %v1779_v21 = vcombine.high %v1304_v9, %v1305_v10 }
 0x198   : > { %v2243_v22 = vpack.c.bf16 %v630_v13, %v629_v12 }
 0x199   : > { %v2245_v23 = vpack.c.bf16 %v628_v16, %v627_v15 }
 0x19b   : > { %780 = vmatmul.mubr.bf16.vlgmr.msra.gmra.mrb[0].mxu1 %v2245_v23  ;;  %997 = vmatmul.mubr.bf16.vlgmr.msra.gmra.mrb[8].mxu0 %v2245_v23 }
 0x19c   : > { %789 = vmatprep.mubr.bf16.mxu1 %v1925_v4  ;;  %1006 = vmatprep.mubr.bf16.mxu0 %v1925_v4 }
 0x19d   : > { %1182 = vmatpush1.bf16.msra.mxu1 %v1748_v59  ;;  %1399 = vmatpush1.bf16.msra.mxu0 %v2217_v0  ;;  %v1302_v59 = vld [vmem:[%s2515_s5 + $0x198] sm:$0xff] }
 0x19e   : > { %1183 = vmatprep.subr.bf16.mxu1 %v1751_v25  ;;  %1400 = vmatprep.subr.bf16.mxu0 %v2247_v26  ;;  %v2345_v6 = vcombine.high %v1302_v59, %v1303_v60  ;;  %v1776_v15 = vcombine.low %v1302_v59, %v1303_v60 }
 0x1a1   : > { %1184 = vmatpush1.bf16.msra.mxu1 %v1750_v31  ;;  %1401 = vmatpush1.bf16.msra.mxu0 %v2266_v32  ;;  %v1762_v31 = vcombine.low %v1087_v7, %v1088_v8 }
 0x1a2   : > { %1185 = vmatprep.subr.bf16.mxu1 %v1753_v56  ;;  %1402 = vmatprep.subr.bf16.mxu0 %v2269_v33  ;;  %v1778_v56 = vcombine.low %v1304_v9, %v1305_v10 }
 0x1a3   : > { %790 = vmatmul.mubr.bf16.gmra.mrb[4].mxu1 %v2243_v22  ;;  %1007 = vmatmul.mubr.bf16.gmra.mrb[12].mxu0 %v2243_v22 }
 0x1a4   : > { %799 = vmatprep.mubr.bf16.mxu1 %v1925_v4  ;;  %1016 = vmatprep.mubr.bf16.mxu0 %v1925_v4 }
 0x1a5   : > { %1186 = vmatpush1.bf16.msra.mxu1 %v1752_v38  ;;  %1403 = vmatpush1.bf16.msra.mxu0 %v2284_v57 }
 0x1a6   : > { %1187 = vmatprep.subr.bf16.mxu1 %v1755_v39  ;;  %1404 = vmatprep.subr.bf16.mxu0 %v2287_v63 }
 0x1a9   : > { %1188 = vmatpush1.bf16.msra.mxu1 %v1754_v43  ;;  %1405 = vmatpush1.bf16.msra.mxu0 %v2306_v44 }
 0x1aa   : > { %1189 = vmatprep.subr.bf16.mxu1 %v1757_v45  ;;  %1406 = vmatprep.subr.bf16.mxu0 %v2309_v46 }
 0x1ad   : > { %1190 = vmatpush1.bf16.msra.mxu1 %v1756_v54  ;;  %1407 = vmatpush1.bf16.msra.mxu0 %v2324_v55 }
 0x1ae   : > { %1191 = vmatprep.subr.bf16.mxu1 %v1759_v18  ;;  %1408 = vmatprep.subr.bf16.mxu0 %v2327_v20 }
 0x1b0   : > { %v1805_v11 = vpop.f32.mrb[4].mxu0 }
 0x1b1   : > { %v621_v12 = vadd.f32 %v1805_v11, %v2225_v2  ;;  %v612_v13 = vpop.f32.mrb[5].mxu0  ;;  %1192 = vmatpush1.bf16.msra.mxu1 %v1758_v62  ;;  %1409 = vmatpush1.bf16.msra.mxu0 %v2342_v3 }
 0x1b2   : > { %v613_v16 = vadd.f32 %v2225_v2, %v612_v13  ;;  %v1806_v17 = vpop.f32.mrb[6].mxu0  ;;  %1193 = vmatprep.subr.bf16.mxu1 %v1761_v5  ;;  %1410 = vmatprep.subr.bf16.mxu0 %v2345_v6 }
 0x1b3   : > { %v624_v25 = vadd.f32 %v1806_v17, %v2225_v2  ;;  %v615_v27 = vpop.f32.mrb[7].mxu0  ;;  %v633_v29 = vmax.f32 %v621_v12, 0.0 }
 0x1b4   : > { %v616_v28 = vadd.f32 %v2225_v2, %v615_v27  ;;  %v631_v34 = vmax.f32 %v613_v16, 0.0 }
 0x1b5   : > { %v634_v30 = vmax.f32 %v624_v25, 0.0  ;;  %1194 = vmatpush1.bf16.msra.mxu1 %v1760_v14  ;;  %1411 = vmatpush1.bf16.msra.mxu0 %v1776_v15 }
 0x1b6   : > { %v632_v35 = vmax.f32 %v616_v28, 0.0  ;;  %1195 = vmatprep.subr.bf16.mxu1 %v1763_v19  ;;  %1412 = vmatprep.subr.bf16.mxu0 %v1779_v21 }
 0x1b7   : > { %v638_v36 = vpack.c.bf16 %v634_v30, %v633_v29 }
 0x1b8   : > { %v637_v37 = vpack.c.bf16 %v632_v35, %v631_v34 }
 0x1b9   : > { %1196 = vmatpush1.bf16.msra.mxu1 %v1762_v31  ;;  %1413 = vmatpush1.bf16.msra.mxu0 %v1778_v56 }
 0x1ba   : > { %800 = vmatmul.mubr.bf16.gmra.mrb[8].mxu1 %v637_v37  ;;  %1017 = vmatmul.mubr.bf16.gmra.mrb[16].mxu0 %v637_v37 }
 0x1bb   : > { %809 = vmatprep.mubr.bf16.mxu1 %v1925_v4  ;;  %1026 = vmatprep.mubr.bf16.mxu0 %v1925_v4 }
 0x1bc   : > { %1807 = vmatprep.subr.bf16.mxu1 %v2219_v1  ;;  %v872_v1 = vld [vmem:[%s2516_s6 + $0x2] sm:$0x3] }
 0x1c2   : > { %810 = vmatmul.mubr.bf16.gmra.mrb[12].mxu1 %v638_v36  ;;  %1027 = vmatmul.mubr.bf16.gmra.mrb[20].mxu0 %v638_v36 }
 0x1c3   : > { %1213 = vmatprep.mubr.bf16.mxu1 %v1925_v4  ;;  %1430 = vmatprep.mubr.bf16.mxu0 %v1925_v4 }
 0x1ca   : > { %1214 = vmatmul.mubr.bf16.vlgmr.msra.gmra.mrb[16].mxu1 %v2245_v23  ;;  %1431 = vmatmul.mubr.bf16.vlgmr.msra.gmra.mrb[24].mxu0 %v2245_v23  ;;  %v2402_v23 = vrot.slane %v872_v1, %v2089_v50 }
 0x1cb   : > { %1815 = vmatpush1.bf16.msra.mxu1 %v2217_v0  ;;  %1223 = vmatprep.mubr.bf16.mxu1 %v1925_v4  ;;  %v655_v0 = vld [vmem:[%s2516_s6] sm:$0x3] }
 0x1cc   : > { %1808 = vmatprep.subr.bf16.mxu1 %v2247_v26  ;;  %1440 = vmatprep.mubr.bf16.mxu0 %v1925_v4  ;;  %v2399_v2 = vrot.slane %v655_v0, %v2089_v50 }
 0x1cf   : > { %1816 = vmatpush1.bf16.msra.mxu1 %v2266_v32  ;;  %v2408_v32 = vrot.slane %v872_v1, %v2092_v51 }
 0x1d0   : > { %1809 = vmatprep.subr.bf16.mxu1 %v2269_v33 }
 0x1d2   : > { %1224 = vmatmul.mubr.bf16.gmra.mrb[20].mxu1 %v2243_v22  ;;  %1441 = vmatmul.mubr.bf16.gmra.mrb[28].mxu0 %v2243_v22 }
 0x1d3   : > { %1817 = vmatpush1.bf16.msra.mxu1 %v2284_v57  ;;  %1233 = vmatprep.mubr.bf16.mxu1 %v1925_v4 }
 0x1d4   : > { %1810 = vmatprep.subr.bf16.mxu1 %v2287_v63  ;;  %1450 = vmatprep.mubr.bf16.mxu0 %v1925_v4 }
 0x1d7   : > { %1818 = vmatpush1.bf16.msra.mxu1 %v2306_v44 }
 0x1d8   : > { %1811 = vmatprep.subr.bf16.mxu1 %v2309_v46 }
 0x1da   : > { %1234 = vmatmul.mubr.bf16.gmra.mrb[24].mxu1 %v637_v37  ;;  %1451 = vmatmul.mubr.bf16.gmra.mrb[32].mxu0 %v637_v37 }
 0x1db   : > { %1819 = vmatpush1.bf16.msra.mxu1 %v2324_v55  ;;  %1243 = vmatprep.mubr.bf16.mxu1 %v1925_v4 }
 0x1dc   : > { %1812 = vmatprep.subr.bf16.mxu1 %v2327_v20 }
 0x1df   : > { %1820 = vmatpush1.bf16.msra.mxu1 %v2342_v3 }
 0x1e0   : > { %1813 = vmatprep.subr.bf16.mxu1 %v2345_v6 }
 0x1e2   : > { %1244 = vmatmul.mubr.bf16.gmra.mrb[28].mxu1 %v638_v36 }
 0x1e3   : > { %1821 = vmatpush1.bf16.msra.mxu1 %v1776_v15  ;;  %1460 = vmatprep.mubr.bf16.mxu1 %v1925_v4  ;;  %v2405_v4 = vrot.slane %v655_v0, %v2092_v51 }
 0x1e4   : > { %1814 = vmatprep.subr.bf16.mxu1 %v1779_v21 }
 0x1e7   : > { %1822 = vmatpush1.bf16.msra.mxu1 %v1778_v56 }
 0x1ea   : > { %1461 = vmatmul.mubr.bf16.vlgmr.msra.gmra.mrb[32].mxu1 %v638_v36 }
 0x26e   : > { %v781_v22 = vpop.f32.mrb[0].mxu1  ;;  %v998_v26 = vpop.f32.mrb[8].mxu0 }
 0x26f   : > { %v783_v33 = vpop.f32.mrb[1].mxu1  ;;  %v1000_v38 = vpop.f32.mrb[9].mxu0  ;;  %v782_v61 = vadd.f32 %v781_v22, %v2399_v2  ;;  %v999_v41 = vadd.f32 %v998_v26, %v2402_v23 }
 0x270   : > { %v785_v57 = vpop.f32.mrb[2].mxu1  ;;  %v1002_v39 = vpop.f32.mrb[10].mxu0  ;;  %v784_v42 = vadd.f32 %v783_v33, %v2405_v4  ;;  %v1001_v43 = vadd.f32 %v1000_v38, %v2408_v32 }
 0x271   : > { %v787_v63 = vpop.f32.mrb[3].mxu1  ;;  %v1004_v40 = vpop.f32.mrb[11].mxu0  ;;  %v786_v44 = vadd.f32 %v785_v57, %v2399_v2  ;;  %v1003_v45 = vadd.f32 %v1002_v39, %v2402_v23  ;;  %v820_v48 = vmax.f32 %v782_v61, 0.0  ;;  %v1037_v52 = vmax.f32 %v999_v41, 0.0 }
 0x272   : > { %v788_v46 = vadd.f32 %v787_v63, %v2405_v4  ;;  %v1005_v47 = vadd.f32 %v1004_v40, %v2408_v32  ;;  %v821_v53 = vmax.f32 %v784_v42, 0.0  ;;  %v1038_v54 = vmax.f32 %v1001_v43, 0.0 }
 0x273   : > { %v822_v20 = vmax.f32 %v786_v44, 0.0  ;;  %v1039_v24 = vmax.f32 %v1003_v45, 0.0 }
 0x274   : > { %v823_v3 = vmax.f32 %v788_v46, 0.0  ;;  %v1040_v5 = vmax.f32 %v1005_v47, 0.0 }
 0x276   : > { %v791_v55 = vpop.f32.mrb[4].mxu1  ;;  %v1008_v18 = vpop.f32.mrb[12].mxu0 }
 0x277   : > { %v792_v58 = vadd.f32 %v791_v55, %v2399_v2  ;;  %v1009_v59 = vadd.f32 %v1008_v18, %v2402_v23  ;;  %v793_v60 = vpop.f32.mrb[5].mxu1  ;;  %v1010_v62 = vpop.f32.mrb[13].mxu0 }
 0x278   : > { %v794_v6 = vadd.f32 %v793_v60, %v2405_v4  ;;  %v1011_v7 = vadd.f32 %v1010_v62, %v2408_v32  ;;  %v795_v8 = vpop.f32.mrb[6].mxu1  ;;  %v1012_v9 = vpop.f32.mrb[14].mxu0 }
 0x279   : > { %v824_v10 = vmax.f32 %v792_v58, 0.0  ;;  %v1041_v11 = vmax.f32 %v1009_v59, 0.0  ;;  %v796_v12 = vadd.f32 %v795_v8, %v2399_v2  ;;  %v1013_v13 = vadd.f32 %v1012_v9, %v2402_v23  ;;  %v797_v14 = vpop.f32.mrb[7].mxu1  ;;  %v1014_v15 = vpop.f32.mrb[15].mxu0 }
 0x27a   : > { %v825_v16 = vmax.f32 %v794_v6, 0.0  ;;  %v1042_v17 = vmax.f32 %v1011_v7, 0.0  ;;  %v798_v19 = vadd.f32 %v797_v14, %v2405_v4  ;;  %v1015_v21 = vadd.f32 %v1014_v15, %v2408_v32 }
 0x27b   : > { %v836_v25 = vmax.f32 %v820_v48, %v824_v10  ;;  %v1053_v27 = vmax.f32 %v1037_v52, %v1041_v11  ;;  %v826_v28 = vmax.f32 %v796_v12, 0.0  ;;  %v1043_v29 = vmax.f32 %v1013_v13, 0.0 }
 0x27c   : > { %v843_v30 = vmax.f32 %v821_v53, %v825_v16  ;;  %v1060_v31 = vmax.f32 %v1038_v54, %v1042_v17  ;;  %v827_v56 = vmax.f32 %v798_v19, 0.0  ;;  %v1044_v34 = vmax.f32 %v1015_v21, 0.0 }
 0x27d   : > { %v837_v35 = vmax.f32 %v822_v20, %v826_v28  ;;  %v1054_v36 = vmax.f32 %v1039_v24, %v1043_v29 }
 0x27e   : > { %v844_v37 = vmax.f32 %v823_v3, %v827_v56  ;;  %v1061_v0 = vmax.f32 %v1040_v5, %v1044_v34  ;;  %v1089_v34 = vld [vmem:[%s2516_s6 + $0x4] sm:$0x3] }
 0x28d   : > { %v801_v1 = vpop.f32.mrb[8].mxu1  ;;  %v1018_v22 = vpop.f32.mrb[16].mxu0 }
 0x28e   : > { %v802_v26 = vadd.f32 %v801_v1, %v2399_v2  ;;  %v1019_v33 = vadd.f32 %v1018_v22, %v2402_v23  ;;  %v803_v38 = vpop.f32.mrb[9].mxu1  ;;  %v1020_v57 = vpop.f32.mrb[17].mxu0 }
 0x28f   : > { %v804_v39 = vadd.f32 %v803_v38, %v2405_v4  ;;  %v1021_v63 = vadd.f32 %v1020_v57, %v2408_v32  ;;  %v805_v40 = vpop.f32.mrb[10].mxu1  ;;  %v1022_v61 = vpop.f32.mrb[18].mxu0  ;;  %v850_v57 = vld [vmem:[#allocation2] sm:$0xff] }
 0x290   : > { %v828_v41 = vmax.f32 %v802_v26, 0.0  ;;  %v1045_v42 = vmax.f32 %v1019_v33, 0.0  ;;  %v806_v43 = vadd.f32 %v805_v40, %v2399_v2  ;;  %v1023_v44 = vadd.f32 %v1022_v61, %v2402_v23  ;;  %v807_v45 = vpop.f32.mrb[11].mxu1  ;;  %v1024_v46 = vpop.f32.mrb[19].mxu0 }
 0x291   : > { %v829_v47 = vmax.f32 %v804_v39, 0.0  ;;  %v1046_v48 = vmax.f32 %v1021_v63, 0.0  ;;  %v808_v52 = vadd.f32 %v807_v45, %v2405_v4  ;;  %v1025_v53 = vadd.f32 %v1024_v46, %v2408_v32  ;;  %v1067_v39 = vld [vmem:[#allocation2 + $0x10] sm:$0xff]  ;;  %v851_v46 = vld [vmem:[#allocation2 + $0x8] sm:$0xff] }
 0x292   : > { %v838_v54 = vmax.f32 %v836_v25, %v828_v41  ;;  %v1055_v55 = vmax.f32 %v1053_v27, %v1045_v42  ;;  %v830_v18 = vmax.f32 %v806_v43, 0.0  ;;  %v1047_v20 = vmax.f32 %v1023_v44, 0.0 }
 0x293   : > { %v845_v24 = vmax.f32 %v843_v30, %v829_v47  ;;  %v1062_v58 = vmax.f32 %v1060_v31, %v1046_v48  ;;  %v831_v59 = vmax.f32 %v808_v52, 0.0  ;;  %v1048_v60 = vmax.f32 %v1025_v53, 0.0  ;;  %v1068_v47 = vld [vmem:[#allocation2 + $0x18] sm:$0xff] }
 0x294   : > { %v839_v62 = vmax.f32 %v837_v35, %v830_v18  ;;  %v1056_v3 = vmax.f32 %v1054_v36, %v1047_v20  ;;  %v1306_v35 = vld [vmem:[%s2516_s6 + $0x6] sm:$0x3]  ;;  %v2455_v42 = vrot.slane %v1089_v34, %v2092_v51 }
 0x295   : > { %v846_v5 = vmax.f32 %v844_v37, %v831_v59  ;;  %v1063_v6 = vmax.f32 %v1061_v0, %v1048_v60  ;;  %v811_v7 = vpop.f32.mrb[12].mxu1  ;;  %v1028_v8 = vpop.f32.mrb[20].mxu0  ;;  %v2452_v38 = vrot.slane %v1306_v35, %v2089_v50  ;;  %v2458_v43 = vrot.slane %v1306_v35, %v2092_v51 }
 0x296   : > { %v812_v9 = vadd.f32 %v811_v7, %v2399_v2  ;;  %v1029_v10 = vadd.f32 %v1028_v8, %v2402_v23  ;;  %v813_v11 = vpop.f32.mrb[13].mxu1  ;;  %v1030_v12 = vpop.f32.mrb[21].mxu0 }
 0x297   : > { %v814_v13 = vadd.f32 %v813_v11, %v2405_v4  ;;  %v1031_v14 = vadd.f32 %v1030_v12, %v2408_v32  ;;  %v815_v15 = vpop.f32.mrb[14].mxu1  ;;  %v1032_v16 = vpop.f32.mrb[22].mxu0 }
 0x298   : > { %v832_v17 = vmax.f32 %v812_v9, 0.0  ;;  %v1049_v19 = vmax.f32 %v1029_v10, 0.0  ;;  %v816_v21 = vadd.f32 %v815_v15, %v2399_v2  ;;  %v1033_v25 = vadd.f32 %v1032_v16, %v2402_v23  ;;  %v817_v27 = vpop.f32.mrb[15].mxu1  ;;  %v1034_v28 = vpop.f32.mrb[23].mxu0 }
 0x299   : > { %v833_v29 = vmax.f32 %v814_v13, 0.0  ;;  %v1050_v30 = vmax.f32 %v1031_v14, 0.0  ;;  %v818_v31 = vadd.f32 %v817_v27, %v2405_v4  ;;  %v1035_v56 = vadd.f32 %v1034_v28, %v2408_v32 }
 0x29a   : > { %v840_v36 = vmax.f32 %v838_v54, %v832_v17  ;;  %v1057_v2 = vmax.f32 %v1055_v55, %v1049_v19  ;;  %v834_v37 = vmax.f32 %v816_v21, 0.0  ;;  %v1051_v23 = vmax.f32 %v1033_v25, 0.0 }
 0x29b   : > { %v847_v0 = vmax.f32 %v845_v24, %v833_v29  ;;  %v1064_v1 = vmax.f32 %v1062_v58, %v1050_v30  ;;  %v835_v22 = vmax.f32 %v818_v31, 0.0  ;;  %v1052_v26 = vmax.f32 %v1035_v56, 0.0 }
 0x29c   : > { %v841_v33 = vmax.f32 %v839_v62, %v834_v37  ;;  %v1058_v4 = vmax.f32 %v1056_v3, %v1051_v23  ;;  %v2449_v32 = vrot.slane %v1089_v34, %v2089_v50 }
 0x29d   : > { %v848_v63 = vmax.f32 %v846_v5, %v835_v22  ;;  %v1065_v40 = vmax.f32 %v1063_v6, %v1052_v26  ;;  %v1215_v61 = vpop.f32.mrb[16].mxu1  ;;  %v1432_v41 = vpop.f32.mrb[24].mxu0 }
 0x29e   : > { %v842_v44 = vmax.f32 %v840_v36, %v841_v33  ;;  %v1059_v45 = vmax.f32 %v1057_v2, %v1058_v4  ;;  %v1217_v48 = vpop.f32.mrb[17].mxu1  ;;  %v1434_v52 = vpop.f32.mrb[25].mxu0  ;;  %v1216_v24 = vadd.f32 %v1215_v61, %v2449_v32  ;;  %v1433_v58 = vadd.f32 %v1432_v41, %v2452_v38 }
 0x29f   : > { %v849_v50 = vmax.f32 %v847_v0, %v848_v63  ;;  %v1066_v53 = vmax.f32 %v1064_v1, %v1065_v40  ;;  %v1219_v54 = vpop.f32.mrb[18].mxu1  ;;  %v1436_v55 = vpop.f32.mrb[26].mxu0  ;;  %v1218_v3 = vadd.f32 %v1217_v48, %v2455_v42  ;;  %v1435_v5 = vadd.f32 %v1434_v52, %v2458_v43 }
 0x2a0   : > { %v852_v18 = vmax.f32 %v850_v57, %v842_v44  ;;  %v1069_v20 = vmax.f32 %v1067_v39, %v1059_v45  ;;  %v1221_v59 = vpop.f32.mrb[19].mxu1  ;;  %v1438_v60 = vpop.f32.mrb[27].mxu0  ;;  %v1220_v6 = vadd.f32 %v1219_v54, %v2449_v32  ;;  %v1437_v7 = vadd.f32 %v1436_v55, %v2452_v38 }
 0x2a1   : > { %v853_v51 = vmax.f32 %v851_v46, %v849_v50  ;;  %v1070_v62 = vmax.f32 %v1068_v47, %v1066_v53  ;;  %v1222_v8 = vadd.f32 %v1221_v59, %v2455_v42  ;;  %v1439_v9 = vadd.f32 %v1438_v60, %v2458_v43 }
 0x2a2   : > { %854 = vst [vmem:[#allocation2] sm:$0xff] %v852_v18  ;;  %1071 = vst [vmem:[#allocation2 + $0x10] sm:$0xff] %v1069_v20  ;;  %v1254_v10 = vmax.f32 %v1216_v24, 0.0  ;;  %v1471_v11 = vmax.f32 %v1433_v58, 0.0  ;;  %v1255_v12 = vmax.f32 %v1218_v3, 0.0  ;;  %v1472_v13 = vmax.f32 %v1435_v5, 0.0 }
 0x2a3   : > { %855 = vst [vmem:[#allocation2 + $0x8] sm:$0xff] %v853_v51  ;;  %1072 = vst [vmem:[#allocation2 + $0x18] sm:$0xff] %v1070_v62  ;;  %v1256_v16 = vmax.f32 %v1220_v6, 0.0  ;;  %v1473_v17 = vmax.f32 %v1437_v7, 0.0  ;;  %v1257_v28 = vmax.f32 %v1222_v8, 0.0  ;;  %v1474_v29 = vmax.f32 %v1439_v9, 0.0 }
 0x2a5   : > { %v1225_v14 = vpop.f32.mrb[20].mxu1  ;;  %v1442_v15 = vpop.f32.mrb[28].mxu0 }
 0x2a6   : > { %v1226_v19 = vadd.f32 %v1225_v14, %v2449_v32  ;;  %v1443_v21 = vadd.f32 %v1442_v15, %v2452_v38  ;;  %v1227_v25 = vpop.f32.mrb[21].mxu1  ;;  %v1444_v27 = vpop.f32.mrb[29].mxu0 }
 0x2a7   : > { %v1228_v30 = vadd.f32 %v1227_v25, %v2455_v42  ;;  %v1445_v31 = vadd.f32 %v1444_v27, %v2458_v43  ;;  %v1229_v56 = vpop.f32.mrb[22].mxu1  ;;  %v1446_v34 = vpop.f32.mrb[30].mxu0 }
 0x2a8   : > { %v1258_v35 = vmax.f32 %v1226_v19, 0.0  ;;  %v1475_v36 = vmax.f32 %v1443_v21, 0.0  ;;  %v1230_v2 = vadd.f32 %v1229_v56, %v2449_v32  ;;  %v1447_v37 = vadd.f32 %v1446_v34, %v2452_v38  ;;  %v1231_v23 = vpop.f32.mrb[23].mxu1  ;;  %v1448_v0 = vpop.f32.mrb[31].mxu0 }
 0x2a9   : > { %v1259_v1 = vmax.f32 %v1228_v30, 0.0  ;;  %v1476_v22 = vmax.f32 %v1445_v31, 0.0  ;;  %v1232_v26 = vadd.f32 %v1231_v23, %v2455_v42  ;;  %v1449_v33 = vadd.f32 %v1448_v0, %v2458_v43 }
 0x2aa   : > { %v1270_v4 = vmax.f32 %v1254_v10, %v1258_v35  ;;  %v1487_v57 = vmax.f32 %v1471_v11, %v1475_v36  ;;  %v1260_v39 = vmax.f32 %v1230_v2, 0.0  ;;  %v1477_v63 = vmax.f32 %v1447_v37, 0.0 }
 0x2ab   : > { %v1277_v40 = vmax.f32 %v1255_v12, %v1259_v1  ;;  %v1494_v61 = vmax.f32 %v1472_v13, %v1476_v22  ;;  %v1261_v41 = vmax.f32 %v1232_v26, 0.0  ;;  %v1478_v44 = vmax.f32 %v1449_v33, 0.0 }
 0x2ac   : > { %v1271_v45 = vmax.f32 %v1256_v16, %v1260_v39  ;;  %v1488_v46 = vmax.f32 %v1473_v17, %v1477_v63 }
 0x2ad   : > { %v1278_v47 = vmax.f32 %v1257_v28, %v1261_v41  ;;  %v1495_v48 = vmax.f32 %v1474_v29, %v1478_v44  ;;  %v1235_v52 = vpop.f32.mrb[24].mxu1  ;;  %v1452_v50 = vpop.f32.mrb[32].mxu0 }
 0x2ae   : > { %v1236_v53 = vadd.f32 %v1235_v52, %v2449_v32  ;;  %v1453_v54 = vadd.f32 %v1452_v50, %v2452_v38  ;;  %v1237_v55 = vpop.f32.mrb[25].mxu1  ;;  %v1454_v18 = vpop.f32.mrb[33].mxu0 }
 0x2af   : > { %v1238_v20 = vadd.f32 %v1237_v55, %v2455_v42  ;;  %v1455_v24 = vadd.f32 %v1454_v18, %v2458_v43  ;;  %v1239_v58 = vpop.f32.mrb[26].mxu1  ;;  %v1456_v59 = vpop.f32.mrb[34].mxu0 }
 0x2b0   : > { %v1262_v60 = vmax.f32 %v1236_v53, 0.0  ;;  %v1479_v51 = vmax.f32 %v1453_v54, 0.0  ;;  %v1240_v62 = vadd.f32 %v1239_v58, %v2449_v32  ;;  %v1457_v3 = vadd.f32 %v1456_v59, %v2452_v38  ;;  %v1241_v5 = vpop.f32.mrb[27].mxu1  ;;  %v1458_v6 = vpop.f32.mrb[35].mxu0  ;;  %v1501_v58 = vld [vmem:[#allocation2 + $0x30] sm:$0xff] }
 0x2b1   : > { %v1263_v7 = vmax.f32 %v1238_v20, 0.0  ;;  %v1480_v8 = vmax.f32 %v1455_v24, 0.0  ;;  %v1242_v9 = vadd.f32 %v1241_v5, %v2455_v42  ;;  %v1459_v10 = vadd.f32 %v1458_v6, %v2458_v43  ;;  %v1513_v6 = vld [vmem:[#allocation2 + $0x10] sm:$0xff] (!%p1780_p8) }
 0x2b2   : > { %v1272_v11 = vmax.f32 %v1270_v4, %v1262_v60  ;;  %v1489_v12 = vmax.f32 %v1487_v57, %v1479_v51  ;;  %v1264_v13 = vmax.f32 %v1240_v62, 0.0  ;;  %v1481_v14 = vmax.f32 %v1457_v3, 0.0  ;;  %v1284_v4 = vld [vmem:[#allocation2 + $0x20] sm:$0xff]  ;;  %v1502_v51 = vld [vmem:[#allocation2 + $0x38] sm:$0xff] }
 0x2b3   : > { %v1279_v15 = vmax.f32 %v1277_v40, %v1263_v7  ;;  %v1496_v16 = vmax.f32 %v1494_v61, %v1480_v8  ;;  %v1265_v17 = vmax.f32 %v1242_v9, 0.0  ;;  %v1482_v19 = vmax.f32 %v1459_v10, 0.0  ;;  %v1285_v40 = vld [vmem:[#allocation2 + $0x28] sm:$0xff]  ;;  %v1514_v7 = vld [vmem:[#allocation2 + $0x18] sm:$0xff] (!%p1780_p8) }
 0x2b4   : > { %v1273_v21 = vmax.f32 %v1271_v45, %v1264_v13  ;;  %v1490_v25 = vmax.f32 %v1488_v46, %v1481_v14 }
 0x2b5   : > { %v1280_v27 = vmax.f32 %v1278_v47, %v1265_v17  ;;  %v1497_v28 = vmax.f32 %v1495_v48, %v1482_v19  ;;  %v1245_v29 = vpop.f32.mrb[28].mxu1  ;;  %v1927_v19 = vmov (!%p1780_p8), 1966171168  }
 0x2b6   : > { %v1246_v30 = vadd.f32 %v1245_v29, %v2449_v32  ;;  %v1247_v31 = vpop.f32.mrb[29].mxu1 }
 0x2b7   : > { %v1248_v56 = vadd.f32 %v1247_v31, %v2455_v42  ;;  %v1249_v34 = vpop.f32.mrb[30].mxu1 }
 0x2b8   : > { %v1266_v35 = vmax.f32 %v1246_v30, 0.0  ;;  %v1250_v36 = vadd.f32 %v1249_v34, %v2449_v32  ;;  %v1251_v2 = vpop.f32.mrb[31].mxu1 }
 0x2b9   : > { %v1267_v37 = vmax.f32 %v1248_v56, 0.0  ;;  %v1252_v23 = vadd.f32 %v1251_v2, %v2455_v42 }
 0x2ba   : > { %v1274_v0 = vmax.f32 %v1272_v11, %v1266_v35  ;;  %v1268_v1 = vmax.f32 %v1250_v36, 0.0 }
 0x2bb   : > { %v1281_v22 = vmax.f32 %v1279_v15, %v1267_v37  ;;  %v1269_v26 = vmax.f32 %v1252_v23, 0.0  ;;  %v1537_v15 = vrot.slane (!%p1780_p8), %v1514_v7, 4 }
 0x2bc   : > { %v1275_v33 = vmax.f32 %v1273_v21, %v1268_v1  ;;  %v1580_v21 = vunpack.c.l.s4 (!%p1780_p8), %v1927_v19 }
 0x2bd   : > { %v1282_v57 = vmax.f32 %v1280_v27, %v1269_v26  ;;  %v1462_v39 = vpop.f32.mrb[32].mxu1  ;;  %v1538_v30 = vmax.f32 (!%p1780_p8), %v1514_v7, %v1537_v15 }
 0x2be   : > { %v1276_v63 = vmax.f32 %v1274_v0, %v1275_v33  ;;  %v1463_v61 = vadd.f32 %v1462_v39, %v2452_v38  ;;  %v1464_v41 = vpop.f32.mrb[33].mxu1 }
 0x2bf   : > { %v1283_v44 = vmax.f32 %v1281_v22, %v1282_v57  ;;  %v1465_v32 = vadd.f32 %v1464_v41, %v2458_v43  ;;  %v1466_v45 = vpop.f32.mrb[34].mxu1  ;;  %v1539_v23 = vrot.slane (!%p1780_p8), %v1538_v30, 2 }
 0x2c0   : > { %v1286_v46 = vmax.f32 %v1284_v4, %v1276_v63  ;;  %v1483_v47 = vmax.f32 %v1463_v61, 0.0  ;;  %v1467_v42 = vadd.f32 %v1466_v45, %v2452_v38  ;;  %v1468_v48 = vpop.f32.mrb[35].mxu1  ;;  %v1511_v38 = vld [vmem:[#allocation2] sm:$0xff] (!%p1780_p8) }
 0x2c1   : > { %v1287_v52 = vmax.f32 %v1285_v40, %v1283_v44  ;;  %v1484_v50 = vmax.f32 %v1465_v32, 0.0  ;;  %v1469_v53 = vadd.f32 %v1468_v48, %v2458_v43  ;;  %v1512_v43 = vld [vmem:[#allocation2 + $0x8] sm:$0xff] (!%p1780_p8)  ;;  %v1519_v10 = vrot.slane (!%p1780_p8), %v1511_v38, 4 }
 0x2c2   : > { %1288 = vst [vmem:[#allocation2 + $0x20] sm:$0xff] %v1286_v46  ;;  %v1491_v54 = vmax.f32 %v1489_v12, %v1483_v47  ;;  %v1485_v55 = vmax.f32 %v1467_v42, 0.0  ;;  %v1525_v11 = vrot.slane (!%p1780_p8), %v1512_v43, 4  ;;  %v1531_v12 = vrot.slane (!%p1780_p8), %v1513_v6, 4 }
 0x2c3   : > { %1289 = vst [vmem:[#allocation2 + $0x28] sm:$0xff] %v1287_v52  ;;  %v1498_v18 = vmax.f32 %v1496_v16, %v1484_v50  ;;  %v1486_v20 = vmax.f32 %v1469_v53, 0.0  ;;  %v1540_v39 = vmax.f32 (!%p1780_p8), %v1538_v30, %v1539_v23 }
 0x2c4   : > { %v1492_v24 = vmax.f32 %v1490_v25, %v1485_v55  ;;  %v1520_v25 = vmax.f32 (!%p1780_p8), %v1511_v38, %v1519_v10  ;;  %v1526_v27 = vmax.f32 (!%p1780_p8), %v1512_v43, %v1525_v11 }
 0x2c5   : > { %v1499_v59 = vmax.f32 %v1497_v28, %v1486_v20  ;;  %1510 = sbr.rel (%p1780_p8) target bundleno = 746 (0x2ea), region = 56  ;;  %v1532_v28 = vmax.f32 (!%p1780_p8), %v1513_v6, %v1531_v12  ;;  %v1541_v46 = vrot.slane (!%p1780_p8), %v1540_v39, 1 }
 0x2c6   : > { %v1493_v60 = vmax.f32 %v1491_v54, %v1492_v24  ;;  %v1521_v35 = vrot.slane (!%p1780_p8), %v1520_v25, 2  ;;  %v1527_v36 = vrot.slane (!%p1780_p8), %v1526_v27, 2 }
 0x2c7   : > { %v1500_v62 = vmax.f32 %v1498_v18, %v1499_v59  ;;  %v1533_v2 = vrot.slane (!%p1780_p8), %v1532_v28, 2  ;;  %v1542_v55 = vmax.f32 (!%p1780_p8), %v1540_v39, %v1541_v46 }
 0x2c8   : > { %v1503_v3 = vmax.f32 %v1501_v58, %v1493_v60  ;;  %v1522_v26 = vmax.f32 (!%p1780_p8), %v1520_v25, %v1521_v35  ;;  %v1528_v33 = vmax.f32 (!%p1780_p8), %v1526_v27, %v1527_v36  ;;  %v1581_v60 = vunpack.c.0.s8 (!%p1780_p8), %v1580_v21 }
 0x2c9   : > { %v1504_v5 = vmax.f32 %v1502_v51, %v1500_v62  ;;  %v1515_v8 = vld [vmem:[#allocation2 + $0x20] sm:$0xff] (!%p1780_p8)  ;;  %v1534_v4 = vmax.f32 (!%p1780_p8), %v1532_v28, %v1533_v2 }
 0x2ca   : > { %1505 = vst [vmem:[#allocation2 + $0x30] sm:$0xff] %v1503_v3  ;;  %v1516_v9 = vld [vmem:[#allocation2 + $0x28] sm:$0xff] (!%p1780_p8)  ;;  %v1543_v16 = vrot.slane (!%p1780_p8), %v1515_v8, 4  ;;  %v1523_v41 = vrot.slane (!%p1780_p8), %v1522_v26, 1  ;;  %v1529_v44 = vrot.slane (!%p1780_p8), %v1528_v33, 1 }
 0x2cb   : > { %1506 = vst [vmem:[#allocation2 + $0x38] sm:$0xff] %v1504_v5  ;;  %v1549_v17 = vrot.slane (!%p1780_p8), %v1516_v9, 4  ;;  %v1535_v32 = vrot.slane (!%p1780_p8), %v1534_v4, 1  ;;  %v1584_v5 = vsub.s32 (!%p1780_p8), %v1581_v60, %v2086_v49 }
 0x2cc   : > { %v1544_v31 = vmax.f32 %v1515_v8, %v1543_v16  ;;  %v1524_v52 = vmax.f32 %v1522_v26, %v1523_v41  ;;  %v1530_v50 = vmax.f32 %v1528_v33, %v1529_v44 }
 0x2cd   : > { %v1550_v56 = vmax.f32 %v1516_v9, %v1549_v17  ;;  %v1536_v53 = vmax.f32 %v1534_v4, %v1535_v32 }
 0x2ce   : > { %v1545_v0 = vrot.slane %v1544_v31, 2  ;;  %v1575_v59 = vcombine.low %v1524_v52, %v1530_v50 }
 0x2cf   : > { %v1551_v1 = vrot.slane %v1550_v56, 2  ;;  %v1576_v62 = vcombine.low %v1536_v53, %v1542_v55 }
 0x2d0   : > { %v1546_v63 = vmax.f32 %v1544_v31, %v1545_v0  ;;  %v1585_v43 = vrot.slane %v1575_v59, %v1584_v5 }
 0x2d1   : > { %v1517_v13 = vld [vmem:[#allocation2 + $0x30] sm:$0xff]  ;;  %v1552_v40 = vmax.f32 %v1550_v56, %v1551_v1  ;;  %v1592_v6 = vrot.slane %v1576_v62, %v1584_v5 }
 0x2d2   : > { %v1518_v14 = vld [vmem:[#allocation2 + $0x38] sm:$0xff]  ;;  %v1555_v29 = vrot.slane %v1517_v13, 4  ;;  %v1547_v47 = vrot.slane %v1546_v63, 1 }
 0x2d3   : > { %v1561_v34 = vrot.slane %v1518_v14, 4  ;;  %v1553_v42 = vrot.slane %v1552_v40, 1  ;;  %v1607_v9 = vcombine.low %v1585_v43, %v1592_v6 }
 0x2d4   : > { %v1556_v37 = vmax.f32 %v1517_v13, %v1555_v29  ;;  %v1548_v18 = vmax.f32 %v1546_v63, %v1547_v47 }
 0x2d5   : > { %v1562_v22 = vmax.f32 %v1518_v14, %v1561_v34  ;;  %v1554_v20 = vmax.f32 %v1552_v40, %v1553_v42  ;;  %v1615_v11 = vrot.slane %v1607_v9, %v1584_v5 }
 0x2d6   : > { %v1557_v57 = vrot.slane %v1556_v37, 2 }
 0x2d7   : > { %v1563_v61 = vrot.slane %v1562_v22, 2  ;;  %v1577_v3 = vcombine.low %v1548_v18, %v1554_v20 }
 0x2d8   : > { %v1558_v45 = vmax.f32 %v1556_v37, %v1557_v57 }
 0x2d9   : > { %v1564_v48 = vmax.f32 %v1562_v22, %v1563_v61  ;;  %v1599_v7 = vrot.slane %v1577_v3, %v1584_v5 }
 0x2da   : > { %v1559_v54 = vrot.slane %v1558_v45, 1 }
 0x2db   : > { %v1565_v24 = vrot.slane %v1564_v48, 1 }
 0x2dc   : > { %v1560_v58 = vmax.f32 %v1558_v45, %v1559_v54 }
 0x2dd   : > { %v1566_v51 = vmax.f32 %v1564_v48, %v1565_v24 }
 0x2df   : > { %v1578_v38 = vcombine.low %v1560_v58, %v1566_v51 }
 0x2e1   : > { %v1606_v8 = vrot.slane %v1578_v38, %v1584_v5 }
 0x2e3   : > { %v1608_v10 = vcombine.low %v1599_v7, %v1606_v8 }
 0x2e5   : > { %v1622_v12 = vrot.slane %v1608_v10, %v1584_v5 }
 0x2e7   : > { %v1623_v13 = vcombine.low %v1615_v11, %v1622_v12 }
 0x2e9   : > { %1625 = vst [vmem:[%s2004_s14] sm:$0xff] %v1623_v13 }
 0x2ea PF: > { %s17_s28 = sadd.s32 1, %s1921_s28   ;;  %s2518_s24 = smov %s1913_s26 }
 0x2eb   : > { %p14_p9 = scmp.ge.s32.totalorder %s17_s28, 10   ;;  %s2519_s25 = smov %s1917_s27 }
 0x2ec   : > { %s2520_s26 = smov %s2523_s29  ;;  %s2521_s27 = smov %s2527_s30 }
 0x2ed   :  { %16 = sbr.rel (!%p14_p9) target bundleno = 3 (0x3), region = 86 }

// kernel: pointnet_cls_forward.6
= control target key start
LH: loop header
LB: loop body
LE: loop exit
PB: predicated region body
PF: predicated region fallthrough
CT: control target
= control target key end

     0   :  { %s1998_s27 = smov 0   ;;  %s2000_s28 = smov 0   ;;  %s2545_s0 = inlined_call_operand.vmem [shape: f32[2,256,3], index: 0, kind: input, shape index: {}]   ;;  %s2546_s1 = inlined_call_operand.vmem [shape: f32[2,3,3], index: 1, kind: input, shape index: {}]   ;;  %s2547_s2 = inlined_call_operand.vmem [shape: f32[3,64], index: 2, kind: input, shape index: {}]   ;;  %s2548_s3 = inlined_call_operand.vmem [shape: f32[1,64], index: 3, kind: input, shape index: {}]   ;;  %s2549_s4 = inlined_call_operand.vmem [shape: bf16[64,128], index: 4, kind: input, shape index: {}]   ;;  %s2550_s5 = inlined_call_operand.vmem [shape: f32[1,128], index: 5, kind: input, shape index: {}]   ;;  %s2551_s6 = inlined_call_operand.vmem [shape: bf16[128,1024], index: 6, kind: input, shape index: {}]   ;;  %s2552_s7 = inlined_call_operand.vmem [shape: f32[1,1024], index: 7, kind: input, shape index: {}]   ;;  %s2553_s8 = inlined_call_operand.vmem [shape: f32[2,1,1024], index: 8, kind: output, shape index: {}]  }
   0x1   :  { %s2002_s29 = smov 0   ;;  %s2004_s30 = smov 0  }
   0x2   :  { %s2006_s9 = smov 0  }
   0x3 LB: > { %s27_s10 = sadd.s32 1, %s1938_s29  ;;  %s30_s11 = sadd.s32 1, %s1942_s30  ;;  %s1946_s9 = sphi %s2006_s9, %s18_s9   ;;  %s1942_s30 = sphi %s2004_s30, %s2557_s30   ;;  %s1938_s29 = sphi %s2002_s29, %s2556_s29   ;;  %s1934_s28 = sphi %s2000_s28, %s2555_s28   ;;  %s1930_s27 = sphi %s1998_s27, %s2554_s27  }
   0x4   : > { %p28_p0 = scmp.ge.s32.totalorder %s27_s10, 4  ;;  %p1723_p1 = scmp.ge.s32.totalorder %s1946_s9, 1 }
   0x5   : > { %p290_p2 = scmp.lt.s32.totalorder %s1946_s9, 9 }
   0x6   : > { %s2559_s10 = smov (%p28_p0, %s27_s10), 0  ;;  %s2561_s11 = smov (!%p28_p0, %s30_s11), %s1942_s30 }
   0x7   : > { %p291_p3 = pnand %p1723_p1, %p290_p2  ;;  %p32_p4 = scmp.ge.s32.totalorder %s2561_s11, 2 }
   0x8   : > { %s1724_s12 = sshll.u32 (!%p291_p3), %s1930_s27, 3  ;;  %p332_p5 = scmp.lt.s32.totalorder (!%p291_p3), %s1934_s28, 1 }
   0x9   : > { %s2563_s11 = smov (%p32_p4, %s2561_s11), 0  ;;  %294 = sbr.rel (%p291_p3) target bundleno = 759 (0x2f7), region = 52 }
   0xa   : > { %p334_p6 = scmp.lt.s32.totalorder (!%p291_p3), %s1724_s12, 31  ;;  %p1729_p7 = scmp.ne.s32.totalorder (!%p291_p3), %s1930_s27, 0 }
  0x10   : > { %s2565_s28 = smov (!%p332_p5, %s1934_s28), 1  ;;  %s2567_s12 = smov (!%p334_p6, %s1724_s12), 31 }
  0x11   : > { %s1725_s13 = sshll.u32 %s2565_s28, 5  ;;  %s1727_s14 = sshll.u32 %s2565_s28, 2  ;;  %v1948_v0 = vmov (!%p1729_p7), -inf  }
  0x12   : > { %s337_s15 = sadd.s32 %s1725_s13, %s2567_s12  ;;  %s344_s18 = scalar_lea.vmem %s2546_s1, %s1727_s14  ;;  %354 = vst [vmem:[#allocation2] sm:$0xff] (!%p1729_p7), %v1948_v0  ;;  %355 = vst [vmem:[#allocation2 + $0x8] sm:$0xff] (!%p1729_p7), %v1948_v0 }
  0x13   : > { %s1726_s19 = sshll.u32 %s337_s15, 3  ;;  %s1728_s20 = sshll.u32 %s2565_s28, 3  ;;  %356 = vst [vmem:[#allocation2 + $0x10] sm:$0xff] (!%p1729_p7), %v1948_v0  ;;  %357 = vst [vmem:[#allocation2 + $0x18] sm:$0xff] (!%p1729_p7), %v1948_v0 }
  0x14   : > { %s2037_s23 = scalar_lea.vmem %s2545_s0, %s1726_s19  ;;  %s2042_s26 = scalar_lea.vmem %s2553_s8, %s1728_s20  ;;  %358 = vst [vmem:[#allocation2 + $0x20] sm:$0xff] (!%p1729_p7), %v1948_v0  ;;  %359 = vst [vmem:[#allocation2 + $0x28] sm:$0xff] (!%p1729_p7), %v1948_v0 }
  0x15   : > { %353 = sbr.rel (%p1729_p7) target bundleno = 28 (0x1c), region = 56  ;;  %360 = vst [vmem:[#allocation2 + $0x30] sm:$0xff] (!%p1729_p7), %v1948_v0  ;;  %361 = vst [vmem:[#allocation2 + $0x38] sm:$0xff] (!%p1729_p7), %v1948_v0 }
  0x1c PF: > { %v371_v1 = vld [vmem:[%s344_s18] sm:$0x7]  ;;  %v1949_v2 = vmov 2   ;;  %v1950_v3 = vmov 1   ;;  %v363_v4 = vld [vmem:[%s2037_s23 + $0x8] sm:$0xff]  ;;  %v1951_v5 = vmov 0   ;;  %v377_v47 = vlaneseq }
  0x1d   : > { %1893 = vset.pattern.permute.xlu1 %v1949_v2  ;;  %1892 = vset.pattern.permute.xlu0 %v1950_v3  ;;  %v362_v6 = vld [vmem:[%s2037_s23] sm:$0xff]  ;;  %v365_v7 = vld [vmem:[%s2037_s23 + $0x18] sm:$0xff]  ;;  %v364_v8 = vld [vmem:[%s2037_s23 + $0x10] sm:$0xff]  ;;  %vm624_vm0 = vcmask 523264   ;;  %p1804_p8 = scmp.ne.s32.totalorder %s1930_s27, 3 }
  0x1e   : > { %393 = vperm.xlu1 %1893, %v371_v1   ;;  %383 = vperm.xlu0 %1892, %v371_v1   ;;  %v367_v9 = vld [vmem:[%s2037_s23 + $0x28] sm:$0xff]  ;;  %v1904_v10 = vld [vmem:[%s2549_s4] sm:$0xff]   ;;  %v369_v13 = vld [vmem:[%s2037_s23 + $0x38] sm:$0xff]  ;;  %v2119_v50 = vshrl.u32 %v377_v47, 7 }
  0x1f   : > { %854 = vmatprep.mubr.bf16.mxu1 %v1951_v5  ;;  %v366_v11 = vld [vmem:[%s2037_s23 + $0x20] sm:$0xff]  ;;  %1815 = vmatprep.subr.bf16.mxu0 %v1904_v10  ;;  %v1905_v12 = vld [vmem:[%s2549_s4 + $0x8] sm:$0xff]   ;;  %v1906_v14 = vld [vmem:[%s2549_s4 + $0x10] sm:$0xff]  }
  0x20   : > { %1816 = vmatpush3.bf16.msra.mxu0 %v1904_v10  ;;  %v1907_v15 = vld [vmem:[%s2549_s4 + $0x18] sm:$0xff]   ;;  %v368_v16 = vld [vmem:[%s2037_s23 + $0x30] sm:$0xff]  ;;  %v714_v17 = vld [vmem:[%s2551_s6] sm:$0xff]  ;;  %v2122_v51 = vsub.s32 1, %v2119_v50  ;;  %v2125_v54 = vsub.s32 0, %v2119_v50  ;;  %v398_v56 = vsub.s32 2, %v2119_v50 }
  0x21   : > { %1817 = vmatprep.subr.bf16.mxu0 %v1905_v12  ;;  %v715_v18 = vld [vmem:[%s2551_s6 + $0x20] sm:$0xff]  ;;  %v2078_v19 = vld [vmem:[%s2551_s6 + $0x8] sm:$0xff] }
  0x22   : > { %1894 = vset.pattern.permute.xlu1 %v1951_v5  ;;  %474 = vperm.xlu0 %1892, %v363_v4   ;;  %v1741_v20 = vcombine.high %v714_v17, %v715_v18  ;;  %v2083_v21 = vld [vmem:[%s2551_s6 + $0x28] sm:$0xff]  ;;  %v1740_v22 = vcombine.low %v714_v17, %v715_v18  ;;  %v716_v23 = vld [vmem:[%s2551_s6 + $0x40] sm:$0xff] }
  0x23   : > { %405 = vperm.xlu1 %1894, %v362_v6   ;;  %v717_v24 = vld [vmem:[%s2551_s6 + $0x60] sm:$0xff]  ;;  %v1756_v25 = vcombine.low %v2078_v19, %v2083_v21  ;;  %v1757_v26 = vcombine.high %v2078_v19, %v2083_v21  ;;  %v923_v19 = vld [vmem:[%s2551_s6 + $0x108] sm:$0xff] }
  0x24   : > { %1818 = vmatpush3.bf16.msra.mxu0 %v1905_v12  ;;  %v1743_v27 = vcombine.high %v716_v23, %v717_v24  ;;  %v718_v28 = vld [vmem:[%s2551_s6 + $0x80] sm:$0xff]  ;;  %822 = vmatprep.subr.bf16.mxu1 %v1741_v20  ;;  %v1742_v30 = vcombine.low %v716_v23, %v717_v24  ;;  %v924_v21 = vld [vmem:[%s2551_s6 + $0x128] sm:$0xff] }
  0x25   : > { %1819 = vmatprep.subr.bf16.mxu0 %v1906_v14  ;;  %v719_v29 = vld [vmem:[%s2551_s6 + $0xa0] sm:$0xff]  ;;  %823 = vmatpush1.bf16.msra.mxu1 %v1740_v22 }
  0x26   : > { %1896 = vset.pattern.permute.xlu0 %v1949_v2  ;;  %824 = vmatprep.subr.bf16.mxu1 %v1743_v27  ;;  %v1745_v31 = vcombine.high %v718_v28, %v719_v29  ;;  %v720_v32 = vld [vmem:[%s2551_s6 + $0xc0] sm:$0xff]  ;;  %v1744_v34 = vcombine.low %v718_v28, %v719_v29 }
  0x27   : > { %522 = vperm.xlu0 %1896, %v362_v6   ;;  %410 = vperm.xlu1 %1894, %v363_v4   ;;  %v721_v33 = vld [vmem:[%s2551_s6 + $0xe0] sm:$0xff] }
  0x28   : > { %1820 = vmatpush3.bf16.msra.mxu0 %v1906_v14  ;;  %v1747_v35 = vcombine.high %v720_v32, %v721_v33  ;;  %v722_v36 = vld [vmem:[%s2551_s6 + $0x100] sm:$0xff]  ;;  %v1746_v38 = vcombine.low %v720_v32, %v721_v33 }
  0x29   : > { %1821 = vmatprep.subr.bf16.mxu0 %v1907_v15  ;;  %825 = vmatpush1.bf16.msra.mxu1 %v1742_v30  ;;  %v723_v37 = vld [vmem:[%s2551_s6 + $0x120] sm:$0xff] }
  0x2a   : > { %826 = vmatprep.subr.bf16.mxu1 %v1745_v31  ;;  %v1749_v39 = vcombine.high %v722_v36, %v723_v37  ;;  %v724_v40 = vld [vmem:[%s2551_s6 + $0x140] sm:$0xff]  ;;  %v1748_v42 = vcombine.low %v722_v36, %v723_v37 }
  0x2b   : > { %534 = vperm.xlu0 %1896, %v365_v7   ;;  %420 = vperm.xlu1 %1894, %v365_v7   ;;  %v725_v41 = vld [vmem:[%s2551_s6 + $0x160] sm:$0xff] }
  0x2c   : > { %1822 = vmatpush3.bf16.msra.mxu0 %v1907_v15  ;;  %v1751_v43 = vcombine.high %v724_v40, %v725_v41  ;;  %v1750_v44 = vcombine.low %v724_v40, %v725_v41  ;;  %v370_v55 = vld [vmem:[%s2547_s2] sm:$0x7] }
  0x2d   : > { %1023 = vmatprep.subr.bf16.mxu0 %v1757_v26  ;;  %827 = vmatpush1.bf16.msra.mxu1 %v1744_v34  ;;  %v389_v57 = vrot.slane %v370_v55, %v2122_v51  ;;  %v380_v60 = vrot.slane %v370_v55, %v2125_v54  ;;  %v399_v61 = vrot.slane %v370_v55, %v398_v56 }
  0x2e   : > { %828 = vmatprep.subr.bf16.mxu1 %v1747_v35 }
  0x2f   : > { %1898 = vset.pattern.permute.xlu0 %v1951_v5  ;;  %1895 = vset.pattern.permute.xlu1 %v1950_v3 }
  0x30   : > { %374 = vperm.xlu0 %1898, %v371_v1   ;;  %470 = vperm.xlu1 %1895, %v362_v6  }
  0x31   : > { %829 = vmatpush1.bf16.msra.mxu1 %v1746_v38 }
  0x32   : > { %830 = vmatprep.subr.bf16.mxu1 %v1749_v39 }
  0x34   : > { %415 = vperm.xlu0 %1898, %v364_v8   ;;  %478 = vperm.xlu1 %1895, %v364_v8  }
  0x35   : > { %831 = vmatpush1.bf16.msra.mxu1 %v1748_v42 }
  0x36   : > { %832 = vmatprep.subr.bf16.mxu1 %v1751_v43 }
  0x38   : > { %430 = vperm.xlu0 %1898, %v367_v9   ;;  %482 = vperm.xlu1 %1895, %v365_v7  }
  0x39   : > { %833 = vmatpush1.bf16.msra.mxu1 %v1750_v44 }
  0x3c   : > { %1900 = vset.pattern.permute.xlu0 %v1950_v3  ;;  %1897 = vset.pattern.permute.xlu1 %v1949_v2 }
  0x3d   : > { %486 = vperm.xlu0 %1900, %v366_v11   ;;  %526 = vperm.xlu1 %1897, %v363_v4  }
  0x41   : > { %498 = vperm.xlu0 %1900, %v369_v13   ;;  %530 = vperm.xlu1 %1897, %v364_v8  }
  0x45   : > { %1903 = vset.pattern.permute.xlu0 %v1949_v2  ;;  %1899 = vset.pattern.permute.xlu1 %v1951_v5 }
  0x46   : > { %542 = vperm.xlu0 %1903, %v367_v9   ;;  %425 = vperm.xlu1 %1899, %v366_v11  }
  0x4a   : > { %435 = vperm.xlu1 %1899, %v368_v16  }
  0x4e   : > { %440 = vperm.xlu1 %1899, %v369_v13  }
  0x52   : > { %1901 = vset.pattern.permute.xlu1 %v1950_v3 }
  0x53   : > { %490 = vperm.xlu1 %1901, %v367_v9   ;;  %v2142_v9 = vld [vmem:[%s2548_s3] ss:$0 sm:$0xff] }
  0x57   : > { %494 = vperm.xlu1 %1901, %v368_v16  }
  0x5b   : > { %1902 = vset.pattern.permute.xlu1 %v1949_v2 }
  0x5c   : > { %538 = vperm.xlu1 %1902, %v366_v11  }
  0x60   : > { %546 = vperm.xlu1 %1902, %v368_v16  }
  0x64   : > { %550 = vperm.xlu1 %1902, %v369_v13  }
  0x9d   : > { %v394_v45 = vpop.permute.xlu1 %393  ;;  %v384_v46 = vpop.permute.xlu0 %383 }
  0x9e   : > { %v390_v62 = vmul.f32 %v389_v57, %v384_v46  ;;  %v400_v2 = vmul.f32 %v399_v61, %v394_v45  ;;  %v917_v45 = vld [vmem:[%s2551_s6 + $0x48] sm:$0xff] }
  0x9f   : > { %v918_v46 = vld [vmem:[%s2551_s6 + $0x68] sm:$0xff] }
  0xa0   : > { %v1759_v55 = vcombine.high %v917_v45, %v918_v46  ;;  %v920_v57 = vld [vmem:[%s2551_s6 + $0xa8] sm:$0xff] }
  0xa1   : > { %v475_v48 = vpop.permute.xlu0 %474 }
  0xa2   : > { %v406_v49 = vpop.permute.xlu1 %405 }
  0xa6   : > { %v411_v52 = vpop.permute.xlu1 %410  ;;  %v523_v53 = vpop.permute.xlu0 %522 }
  0xaa   : > { %v421_v58 = vpop.permute.xlu1 %420  ;;  %v535_v59 = vpop.permute.xlu0 %534 }
  0xaf   : > { %v375_v63 = vpop.permute.xlu0 %374  ;;  %v471_v0 = vpop.permute.xlu1 %470 }
  0xb0   : > { %v381_v1 = vmul.f32 %v380_v60, %v375_v63  ;;  %v922_v63 = vld [vmem:[%s2551_s6 + $0xe8] sm:$0xff] }
  0xb2   : > { %v391_v3 = vadd.f32 %v390_v62, %v381_v1  ;;  %v921_v62 = vld [vmem:[%s2551_s6 + $0xc8] sm:$0xff] }
  0xb3   : > { %v479_v4 = vpop.permute.xlu1 %478  ;;  %v416_v13 = vpop.permute.xlu0 %415 }
  0xb4   : > { %v401_v6 = vadd.f32 %v400_v2, %v391_v3  ;;  %v1763_v2 = vcombine.high %v921_v62, %v922_v63 }
  0xb6   : > { %v2134_v7 = vrot.slane %v401_v6, %v2125_v54  ;;  %v2137_v8 = vrot.slane %v401_v6, %v2122_v51  ;;  %v2144_v11 = vrot.slane %v401_v6, %v398_v56  ;;  %v919_v56 = vld [vmem:[%s2551_s6 + $0x88] sm:$0xff]  ;;  %v1762_v6 = vcombine.low %v921_v62, %v922_v63  ;;  %v729_v62 = vld [vmem:[%s2551_s6 + $0x1e0] sm:$0xff] }
  0xb7   : > { %v483_v10 = vpop.permute.xlu1 %482  ;;  %v431_v47 = vpop.permute.xlu0 %430  ;;  %v1761_v61 = vcombine.high %v919_v56, %v920_v57  ;;  %v1760_v1 = vcombine.low %v919_v56, %v920_v57  ;;  %v928_v57 = vld [vmem:[%s2551_s6 + $0x1a8] sm:$0xff] }
  0xb8   : > { %v447_v12 = vmul.f32 %v2134_v7, %v406_v49  ;;  %v449_v14 = vmul.f32 %v2134_v7, %v416_v13  ;;  %v450_v15 = vmul.f32 %v2134_v7, %v421_v58  ;;  %v505_v17 = vmul.f32 %v2137_v8, %v471_v0  ;;  %v929_v63 = vld [vmem:[%s2551_s6 + $0x1c8] sm:$0xff] }
  0xb9   : > { %v448_v18 = vmul.f32 %v2134_v7, %v411_v52  ;;  %v508_v22 = vmul.f32 %v2137_v8, %v483_v10  ;;  %v506_v26 = vmul.f32 %v2137_v8, %v475_v48  ;;  %v557_v28 = vmul.f32 %v2144_v11, %v523_v53 }
  0xba   : > { %v461_v16 = vadd.f32 %v2142_v9, %v447_v12  ;;  %v464_v20 = vadd.f32 %v2142_v9, %v450_v15  ;;  %v463_v29 = vadd.f32 %v2142_v9, %v449_v14  ;;  %v507_v34 = vmul.f32 %v2137_v8, %v479_v4  ;;  %v925_v14 = vld [vmem:[%s2551_s6 + $0x148] sm:$0xff] }
  0xbb   : > { %v462_v24 = vadd.f32 %v2142_v9, %v448_v18  ;;  %v560_v35 = vmul.f32 %v2144_v11, %v535_v59  ;;  %v1758_v59 = vcombine.low %v917_v45, %v918_v46  ;;  %v452_v3 = vmul.f32 %v2134_v7, %v431_v47  ;;  %v926_v15 = vld [vmem:[%s2551_s6 + $0x168] sm:$0xff] }
  0xbc   : > { %v513_v23 = vadd.f32 %v505_v17, %v461_v16  ;;  %v527_v27 = vpop.permute.xlu1 %526  ;;  %v516_v30 = vadd.f32 %v508_v22, %v464_v20  ;;  %v515_v39 = vadd.f32 %v507_v34, %v463_v29  ;;  %v487_v60 = vpop.permute.xlu0 %486  ;;  %v1765_v10 = vcombine.high %v923_v19, %v924_v21 }
  0xbd   : > { %v558_v31 = vmul.f32 %v2144_v11, %v527_v27  ;;  %v514_v32 = vadd.f32 %v506_v26, %v462_v24  ;;  %v466_v16 = vadd.f32 %v2142_v9, %v452_v3  ;;  %v1764_v18 = vcombine.low %v923_v19, %v924_v21  ;;  %v1117_v3 = vld [vmem:[%s2551_s6 + $0x30] sm:$0xff] }
  0xbe   : > { %v565_v33 = vadd.f32 %v557_v28, %v513_v23  ;;  %v568_v40 = vadd.f32 %v560_v35, %v516_v30  ;;  %v1767_v22 = vcombine.high %v925_v14, %v926_v15  ;;  %v509_v26 = vmul.f32 %v2137_v8, %v487_v60 }
  0xbf   : > { %v566_v36 = vadd.f32 %v558_v31, %v514_v32  ;;  %v1766_v28 = vcombine.low %v925_v14, %v926_v15  ;;  %v2260_v15 = vld [vmem:[%s2550_s5] ss:$0 sm:$0xff] }
  0xc0   : > { %v531_v37 = vpop.permute.xlu1 %530  ;;  %v573_v38 = vmax.f32 %v565_v33, 0.0  ;;  %v576_v48 = vmax.f32 %v568_v40, 0.0 }
  0xc1   : > { %v559_v41 = vmul.f32 %v2144_v11, %v531_v37  ;;  %v574_v42 = vmax.f32 %v566_v36, 0.0 }
  0xc3   : > { %v567_v43 = vadd.f32 %v559_v41, %v515_v39  ;;  %v581_v44 = vpack.c.bf16 %v574_v42, %v573_v38 }
  0xc5   : > { %v575_v49 = vmax.f32 %v567_v43, 0.0  ;;  %v426_v52 = vpop.permute.xlu1 %425  ;;  %1823 = vmatprep.mubr.msk.bf16.mxu0 %vm624_vm0, %v581_v44 }
  0xc6   : > { %v451_v12 = vmul.f32 %v2134_v7, %v426_v52 }
  0xc7   : > { %v582_v53 = vpack.c.bf16 %v576_v48, %v575_v49 }
  0xc8   : > { %v465_v23 = vadd.f32 %v2142_v9, %v451_v12  ;;  %v1318_v12 = vld [vmem:[%s2551_s6 + $0x38] sm:$0xff] }
  0xc9   : > { %1824 = vmatmul.mubr.msk.bf16.vlgmr.msra.gmra.mrb[0].mxu0 %vm624_vm0, %v582_v53  ;;  %v436_v58 = vpop.permute.xlu1 %435 }
  0xca   : > { %1024 = vmatpush1.bf16.msra.mxu0 %v1756_v25  ;;  %v499_v25 = vpop.permute.xlu0 %498  ;;  %v453_v29 = vmul.f32 %v2134_v7, %v436_v58  ;;  %v517_v33 = vadd.f32 %v509_v26, %v465_v23 }
  0xcb   : > { %1025 = vmatprep.subr.bf16.mxu0 %v1759_v55  ;;  %v512_v43 = vmul.f32 %v2137_v8, %v499_v25  ;;  %v1116_v25 = vld [vmem:[%s2551_s6 + $0x10] sm:$0xff] }
  0xcc   : > { %v467_v37 = vadd.f32 %v2142_v9, %v453_v29  ;;  %v1118_v29 = vld [vmem:[%s2551_s6 + $0x50] sm:$0xff] }
  0xcd   : > { %v441_v0 = vpop.permute.xlu1 %440 }
  0xce   : > { %1026 = vmatpush1.bf16.msra.mxu0 %v1758_v59  ;;  %v543_v20 = vpop.permute.xlu0 %542  ;;  %v454_v31 = vmul.f32 %v2134_v7, %v441_v0 }
  0xcf   : > { %1027 = vmatprep.subr.bf16.mxu0 %v1761_v61  ;;  %v562_v27 = vmul.f32 %v2144_v11, %v543_v20  ;;  %v728_v61 = vld [vmem:[%s2551_s6 + $0x1c0] sm:$0xff] }
  0xd0   : > { %v468_v39 = vadd.f32 %v2142_v9, %v454_v31  ;;  %v727_v9 = vld [vmem:[%s2551_s6 + $0x1a0] sm:$0xff]  ;;  %v1755_v0 = vcombine.high %v728_v61, %v729_v62  ;;  %v1754_v21 = vcombine.low %v728_v61, %v729_v62  ;;  %v1126_v62 = vld [vmem:[%s2551_s6 + $0x150] sm:$0xff] }
  0xd2   : > { %v491_v4 = vpop.permute.xlu1 %490  ;;  %1028 = vmatpush1.bf16.msra.mxu0 %v1760_v1  ;;  %v520_v47 = vadd.f32 %v512_v43, %v468_v39  ;;  %v930_v1 = vld [vmem:[%s2551_s6 + $0x1e8] sm:$0xff]  ;;  %v1120_v39 = vld [vmem:[%s2551_s6 + $0x90] sm:$0xff] }
  0xd3   : > { %1029 = vmatprep.subr.bf16.mxu0 %v1763_v2  ;;  %v510_v13 = vmul.f32 %v2137_v8, %v491_v4  ;;  %v1770_v2 = vcombine.low %v929_v63, %v930_v1  ;;  %v1771_v19 = vcombine.high %v929_v63, %v930_v1  ;;  %v1317_v4 = vld [vmem:[%s2551_s6 + $0x18] sm:$0xff]  ;;  %v1127_v63 = vld [vmem:[%s2551_s6 + $0x170] sm:$0xff] }
  0xd4   : > { %v2254_v14 = vcombine.high %v1317_v4, %v1318_v12  ;;  %v1328_v1 = vld [vmem:[%s2551_s6 + $0x178] sm:$0xff] }
  0xd5   : > { %v518_v24 = vadd.f32 %v510_v13, %v466_v16  ;;  %v2252_v13 = vcombine.low %v1317_v4, %v1318_v12  ;;  %v1129_v4 = vld [vmem:[%s2551_s6 + $0x1b0] sm:$0xff]  ;;  %v1782_v12 = vcombine.low %v1126_v62, %v1127_v63 }
  0xd6   : > { %v495_v17 = vpop.permute.xlu1 %494  ;;  %1030 = vmatpush1.bf16.msra.mxu0 %v1762_v6  ;;  %v1772_v6 = vcombine.low %v1116_v25, %v1117_v3 }
  0xd7   : > { %1031 = vmatprep.subr.bf16.mxu0 %v1765_v10  ;;  %v570_v32 = vadd.f32 %v562_v27, %v518_v24  ;;  %v511_v35 = vmul.f32 %v2137_v8, %v495_v17  ;;  %v726_v8 = vld [vmem:[%s2551_s6 + $0x180] sm:$0xff]  ;;  %v1773_v10 = vcombine.high %v1116_v25, %v1117_v3  ;;  %v1128_v3 = vld [vmem:[%s2551_s6 + $0x190] sm:$0xff] }
  0xd8   : > { %v1753_v56 = vcombine.high %v726_v8, %v727_v9  ;;  %v1752_v60 = vcombine.low %v726_v8, %v727_v9  ;;  %v1124_v9 = vld [vmem:[%s2551_s6 + $0x110] sm:$0xff] }
  0xd9   : > { %v578_v40 = vmax.f32 %v570_v32, 0.0  ;;  %v519_v7 = vadd.f32 %v511_v35, %v467_v37  ;;  %v1119_v32 = vld [vmem:[%s2551_s6 + $0x70] sm:$0xff] }
  0xda   : > { %1032 = vmatpush1.bf16.msra.mxu0 %v1764_v18  ;;  %834 = vmatprep.subr.bf16.mxu1 %v1753_v56  ;;  %v1775_v37 = vcombine.high %v1118_v29, %v1119_v32  ;;  %v1774_v43 = vcombine.low %v1118_v29, %v1119_v32  ;;  %v1325_v56 = vld [vmem:[%s2551_s6 + $0x118] sm:$0xff] }
  0xdb   : > { %v539_v30 = vpop.permute.xlu1 %538  ;;  %1033 = vmatprep.subr.bf16.mxu0 %v1767_v22  ;;  %835 = vmatpush1.bf16.msra.mxu1 %v1752_v60 }
  0xdc   : > { %v561_v34 = vmul.f32 %v2144_v11, %v539_v30  ;;  %836 = vmatprep.subr.bf16.mxu1 %v1755_v0  ;;  %v1327_v0 = vld [vmem:[%s2551_s6 + $0x158] sm:$0xff] }
  0xdd   : > { %v2362_v25 = vcombine.high %v1327_v0, %v1328_v1 }
  0xde   : > { %v569_v36 = vadd.f32 %v561_v34, %v517_v33  ;;  %1034 = vmatpush1.bf16.msra.mxu0 %v1766_v28  ;;  %v1319_v33 = vld [vmem:[%s2551_s6 + $0x58] sm:$0xff] }
  0xdf   : > { %v547_v38 = vpop.permute.xlu1 %546  ;;  %837 = vmatpush1.bf16.msra.mxu1 %v1754_v21  ;;  %v1320_v34 = vld [vmem:[%s2551_s6 + $0x78] sm:$0xff]  ;;  %v1783_v21 = vcombine.high %v1126_v62, %v1127_v63 }
  0xe0   : > { %v577_v41 = vmax.f32 %v569_v36, 0.0  ;;  %v563_v42 = vmul.f32 %v2144_v11, %v547_v38  ;;  %1224 = vmatprep.subr.bf16.mxu1 %v1773_v10  ;;  %v2282_v38 = vcombine.high %v1319_v33, %v1320_v34  ;;  %v1330_v10 = vld [vmem:[%s2551_s6 + $0x1b8] sm:$0xff] }
  0xe2   : > { %v583_v44 = vpack.c.bf16 %v578_v40, %v577_v41  ;;  %v571_v46 = vadd.f32 %v563_v42, %v519_v7  ;;  %v1121_v40 = vld [vmem:[%s2551_s6 + $0xb0] sm:$0xff]  ;;  %v1321_v41 = vld [vmem:[%s2551_s6 + $0x98] sm:$0xff]  ;;  %v2301_v7 = vcombine.low %v1319_v33, %v1320_v34 }
  0xe3   : > { %v551_v45 = vpop.permute.xlu1 %550  ;;  %v1322_v42 = vld [vmem:[%s2551_s6 + $0xb8] sm:$0xff] }
  0xe4   : > { %v564_v48 = vmul.f32 %v2144_v11, %v551_v45  ;;  %1827 = vmatprep.mubr.msk.bf16.mxu0 %vm624_vm0, %v583_v44  ;;  %v579_v52 = vmax.f32 %v571_v46, 0.0  ;;  %v927_v11 = vld [vmem:[%s2551_s6 + $0x188] sm:$0xff]  ;;  %v1777_v44 = vcombine.high %v1120_v39, %v1121_v40  ;;  %v2304_v45 = vcombine.high %v1321_v41, %v1322_v42  ;;  %v1122_v46 = vld [vmem:[%s2551_s6 + $0xd0] sm:$0xff] }
  0xe5   : > { %v1768_v58 = vcombine.low %v927_v11, %v928_v57  ;;  %v1769_v59 = vcombine.high %v927_v11, %v928_v57  ;;  %v1125_v11 = vld [vmem:[%s2551_s6 + $0x130] sm:$0xff]  ;;  %v1326_v57 = vld [vmem:[%s2551_s6 + $0x138] sm:$0xff] }
  0xe6   : > { %v572_v49 = vadd.f32 %v564_v48, %v520_v47  ;;  %v1123_v47 = vld [vmem:[%s2551_s6 + $0xf0] sm:$0xff]  ;;  %v1323_v48 = vld [vmem:[%s2551_s6 + $0xd8] sm:$0xff]  ;;  %v1781_v60 = vcombine.high %v1124_v9, %v1125_v11  ;;  %v2344_v61 = vcombine.high %v1325_v56, %v1326_v57 }
  0xe7   : > { %1035 = vmatprep.subr.bf16.mxu0 %v1769_v59 }
  0xe8   : > { %v580_v53 = vmax.f32 %v572_v49, 0.0  ;;  %1036 = vmatpush1.bf16.msra.mxu0 %v1768_v58  ;;  %v1324_v49 = vld [vmem:[%s2551_s6 + $0xf8] sm:$0xff]  ;;  %v1778_v58 = vcombine.low %v1122_v46, %v1123_v47 }
  0xe9   : > { %1037 = vmatprep.subr.bf16.mxu0 %v1771_v19  ;;  %v2322_v8 = vcombine.high %v1323_v48, %v1324_v49  ;;  %v2341_v59 = vcombine.low %v1323_v48, %v1324_v49  ;;  %v2359_v19 = vcombine.low %v1325_v56, %v1326_v57 }
  0xea   : > { %v584_v55 = vpack.c.bf16 %v580_v53, %v579_v52  ;;  %v1776_v52 = vcombine.low %v1120_v39, %v1121_v40  ;;  %v2319_v53 = vcombine.low %v1321_v41, %v1322_v42 }
  0xec   : > { %1828 = vmatmul.mubr.msk.bf16.gmra.mrb[4].mxu0 %vm624_vm0, %v584_v55  ;;  %v1779_v55 = vcombine.high %v1122_v46, %v1123_v47 }
  0xed   : > { %1055 = vmatprep.mubr.bf16.mxu0 %v1951_v5  ;;  %1038 = vmatpush1.bf16.msra.mxu0 %v1770_v2  ;;  %v1780_v2 = vcombine.low %v1124_v9, %v1125_v11 }
  0xee   : > { %1425 = vmatprep.subr.bf16.mxu0 %v2254_v14 }
 0x19c   : > { %v1825_v16 = vpop.f32.mrb[0].mxu0 }
 0x19d   : > { %v680_v17 = vadd.f32 %v1825_v16, %v2260_v15  ;;  %v671_v18 = vpop.f32.mrb[1].mxu0  ;;  %v2377_v16 = vcombine.low %v1327_v0, %v1328_v1 }
 0x19e   : > { %v672_v20 = vadd.f32 %v2260_v15, %v671_v18  ;;  %v1826_v22 = vpop.f32.mrb[2].mxu0 }
 0x19f   : > { %v683_v23 = vadd.f32 %v1826_v22, %v2260_v15  ;;  %v674_v24 = vpop.f32.mrb[3].mxu0  ;;  %v704_v27 = vmax.f32 %v680_v17, 0.0  ;;  %v1785_v17 = vcombine.high %v1128_v3, %v1129_v4  ;;  %v1131_v22 = vld [vmem:[%s2551_s6 + $0x1f0] sm:$0xff] }
 0x1a0   : > { %v675_v26 = vadd.f32 %v2260_v15, %v674_v24  ;;  %v702_v30 = vmax.f32 %v672_v20, 0.0  ;;  %v1130_v20 = vld [vmem:[%s2551_s6 + $0x1d0] sm:$0xff]  ;;  %v1332_v24 = vld [vmem:[%s2551_s6 + $0x1f8] sm:$0xff] }
 0x1a1   : > { %v705_v28 = vmax.f32 %v683_v23, 0.0  ;;  %v1331_v23 = vld [vmem:[%s2551_s6 + $0x1d8] sm:$0xff]  ;;  %v1786_v33 = vcombine.low %v1130_v20, %v1131_v22 }
 0x1a2   : > { %v703_v31 = vmax.f32 %v675_v26, 0.0  ;;  %v1784_v26 = vcombine.low %v1128_v3, %v1129_v4  ;;  %v1803_v29 = vcombine.high %v1331_v23, %v1332_v24  ;;  %v1802_v34 = vcombine.low %v1331_v23, %v1332_v24 }
 0x1a3   : > { %v2278_v35 = vpack.c.bf16 %v705_v28, %v704_v27  ;;  %v1787_v28 = vcombine.high %v1130_v20, %v1131_v22 }
 0x1a4   : > { %v2280_v36 = vpack.c.bf16 %v703_v31, %v702_v30 }
 0x1a6   : > { %855 = vmatmul.mubr.bf16.vlgmr.msra.gmra.mrb[0].mxu1 %v2280_v36  ;;  %1056 = vmatmul.mubr.bf16.vlgmr.msra.gmra.mrb[8].mxu0 %v2280_v36 }
 0x1a7   : > { %864 = vmatprep.mubr.bf16.mxu1 %v1951_v5  ;;  %1065 = vmatprep.mubr.bf16.mxu0 %v1951_v5 }
 0x1a8   : > { %1225 = vmatpush1.bf16.msra.mxu1 %v1772_v6  ;;  %1426 = vmatpush1.bf16.msra.mxu0 %v2252_v13  ;;  %v1329_v6 = vld [vmem:[%s2551_s6 + $0x198] sm:$0xff] }
 0x1a9   : > { %1226 = vmatprep.subr.bf16.mxu1 %v1775_v37  ;;  %1427 = vmatprep.subr.bf16.mxu0 %v2282_v38  ;;  %v2380_v18 = vcombine.high %v1329_v6, %v1330_v10  ;;  %v1800_v27 = vcombine.low %v1329_v6, %v1330_v10 }
 0x1ac   : > { %1227 = vmatpush1.bf16.msra.mxu1 %v1774_v43  ;;  %1428 = vmatpush1.bf16.msra.mxu0 %v2301_v7 }
 0x1ad   : > { %1228 = vmatprep.subr.bf16.mxu1 %v1777_v44  ;;  %1429 = vmatprep.subr.bf16.mxu0 %v2304_v45 }
 0x1ae   : > { %865 = vmatmul.mubr.bf16.gmra.mrb[4].mxu1 %v2278_v35  ;;  %1066 = vmatmul.mubr.bf16.gmra.mrb[12].mxu0 %v2278_v35 }
 0x1af   : > { %874 = vmatprep.mubr.bf16.mxu1 %v1951_v5  ;;  %1075 = vmatprep.mubr.bf16.mxu0 %v1951_v5 }
 0x1b0   : > { %1229 = vmatpush1.bf16.msra.mxu1 %v1776_v52  ;;  %1430 = vmatpush1.bf16.msra.mxu0 %v2319_v53 }
 0x1b1   : > { %1230 = vmatprep.subr.bf16.mxu1 %v1779_v55  ;;  %1431 = vmatprep.subr.bf16.mxu0 %v2322_v8 }
 0x1b4   : > { %1231 = vmatpush1.bf16.msra.mxu1 %v1778_v58  ;;  %1432 = vmatpush1.bf16.msra.mxu0 %v2341_v59 }
 0x1b5   : > { %1232 = vmatprep.subr.bf16.mxu1 %v1781_v60  ;;  %1433 = vmatprep.subr.bf16.mxu0 %v2344_v61 }
 0x1b8   : > { %1233 = vmatpush1.bf16.msra.mxu1 %v1780_v2  ;;  %1434 = vmatpush1.bf16.msra.mxu0 %v2359_v19 }
 0x1b9   : > { %1234 = vmatprep.subr.bf16.mxu1 %v1783_v21  ;;  %1435 = vmatprep.subr.bf16.mxu0 %v2362_v25 }
 0x1bc   : > { %1235 = vmatpush1.bf16.msra.mxu1 %v1782_v12  ;;  %1436 = vmatpush1.bf16.msra.mxu0 %v2377_v16 }
 0x1bd   : > { %1236 = vmatprep.subr.bf16.mxu1 %v1785_v17  ;;  %1437 = vmatprep.subr.bf16.mxu0 %v2380_v18 }
 0x1bf   : > { %v1829_v30 = vpop.f32.mrb[4].mxu0 }
 0x1c0   : > { %v696_v31 = vadd.f32 %v1829_v30, %v2260_v15  ;;  %v687_v32 = vpop.f32.mrb[5].mxu0  ;;  %1237 = vmatpush1.bf16.msra.mxu1 %v1784_v26  ;;  %1438 = vmatpush1.bf16.msra.mxu0 %v1800_v27 }
 0x1c1   : > { %v688_v37 = vadd.f32 %v2260_v15, %v687_v32  ;;  %v1830_v39 = vpop.f32.mrb[6].mxu0  ;;  %1238 = vmatprep.subr.bf16.mxu1 %v1787_v28  ;;  %1439 = vmatprep.subr.bf16.mxu0 %v1803_v29 }
 0x1c2   : > { %v699_v40 = vadd.f32 %v1830_v39, %v2260_v15  ;;  %v690_v41 = vpop.f32.mrb[7].mxu0  ;;  %v708_v43 = vmax.f32 %v696_v31, 0.0 }
 0x1c3   : > { %v691_v42 = vadd.f32 %v2260_v15, %v690_v41  ;;  %v706_v46 = vmax.f32 %v688_v37, 0.0  ;;  %v730_v15 = vld [vmem:[%s2552_s7] sm:$0x3] }
 0x1c4   : > { %v709_v44 = vmax.f32 %v699_v40, 0.0  ;;  %1239 = vmatpush1.bf16.msra.mxu1 %v1786_v33  ;;  %1440 = vmatpush1.bf16.msra.mxu0 %v1802_v34 }
 0x1c5   : > { %v707_v47 = vmax.f32 %v691_v42, 0.0  ;;  %1831 = vmatprep.subr.bf16.mxu1 %v2254_v14 }
 0x1c6   : > { %v713_v48 = vpack.c.bf16 %v709_v44, %v708_v43 }
 0x1c7   : > { %v712_v49 = vpack.c.bf16 %v707_v47, %v706_v46 }
 0x1c9   : > { %875 = vmatmul.mubr.bf16.gmra.mrb[8].mxu1 %v712_v49  ;;  %1076 = vmatmul.mubr.bf16.gmra.mrb[16].mxu0 %v712_v49 }
 0x1ca   : > { %884 = vmatprep.mubr.bf16.mxu1 %v1951_v5  ;;  %1085 = vmatprep.mubr.bf16.mxu0 %v1951_v5 }
 0x1d1   : > { %885 = vmatmul.mubr.bf16.gmra.mrb[12].mxu1 %v713_v48  ;;  %1086 = vmatmul.mubr.bf16.gmra.mrb[20].mxu0 %v713_v48 }
 0x1d2   : > { %1256 = vmatprep.mubr.bf16.mxu1 %v1951_v5  ;;  %1457 = vmatprep.mubr.bf16.mxu0 %v1951_v5 }
 0x1d9   : > { %1257 = vmatmul.mubr.bf16.vlgmr.msra.gmra.mrb[16].mxu1 %v2280_v36  ;;  %1458 = vmatmul.mubr.bf16.vlgmr.msra.gmra.mrb[24].mxu0 %v2280_v36 }
 0x1da   : > { %1839 = vmatpush1.bf16.msra.mxu1 %v2252_v13  ;;  %1266 = vmatprep.mubr.bf16.mxu1 %v1951_v5 }
 0x1db   : > { %1832 = vmatprep.subr.bf16.mxu1 %v2282_v38  ;;  %1467 = vmatprep.mubr.bf16.mxu0 %v1951_v5 }
 0x1de   : > { %1840 = vmatpush1.bf16.msra.mxu1 %v2301_v7 }
 0x1df   : > { %1833 = vmatprep.subr.bf16.mxu1 %v2304_v45 }
 0x1e1   : > { %1267 = vmatmul.mubr.bf16.gmra.mrb[20].mxu1 %v2278_v35  ;;  %1468 = vmatmul.mubr.bf16.gmra.mrb[28].mxu0 %v2278_v35  ;;  %v931_v35 = vld [vmem:[%s2552_s7 + $0x2] sm:$0x3] }
 0x1e2   : > { %1841 = vmatpush1.bf16.msra.mxu1 %v2319_v53  ;;  %1276 = vmatprep.mubr.bf16.mxu1 %v1951_v5  ;;  %v2437_v55 = vrot.slane %v931_v35, %v2125_v54  ;;  %v2443_v9 = vrot.slane %v931_v35, %v2122_v51 }
 0x1e3   : > { %1834 = vmatprep.subr.bf16.mxu1 %v2322_v8  ;;  %1477 = vmatprep.mubr.bf16.mxu0 %v1951_v5  ;;  %v2440_v8 = vrot.slane %v730_v15, %v2122_v51 }
 0x1e6   : > { %1842 = vmatpush1.bf16.msra.mxu1 %v2341_v59 }
 0x1e7   : > { %1835 = vmatprep.subr.bf16.mxu1 %v2344_v61 }
 0x1e9   : > { %1277 = vmatmul.mubr.bf16.gmra.mrb[24].mxu1 %v712_v49  ;;  %1478 = vmatmul.mubr.bf16.gmra.mrb[32].mxu0 %v712_v49 }
 0x1ea   : > { %1843 = vmatpush1.bf16.msra.mxu1 %v2359_v19  ;;  %1286 = vmatprep.mubr.bf16.mxu1 %v1951_v5 }
 0x1eb   : > { %1836 = vmatprep.subr.bf16.mxu1 %v2362_v25 }
 0x1ee   : > { %1844 = vmatpush1.bf16.msra.mxu1 %v2377_v16 }
 0x1ef   : > { %1837 = vmatprep.subr.bf16.mxu1 %v2380_v18 }
 0x1f1   : > { %1287 = vmatmul.mubr.bf16.gmra.mrb[28].mxu1 %v713_v48 }
 0x1f2   : > { %1845 = vmatpush1.bf16.msra.mxu1 %v1800_v27  ;;  %1487 = vmatprep.mubr.bf16.mxu1 %v1951_v5  ;;  %v2434_v5 = vrot.slane %v730_v15, %v2125_v54 }
 0x1f3   : > { %1838 = vmatprep.subr.bf16.mxu1 %v1803_v29 }
 0x1f6   : > { %1846 = vmatpush1.bf16.msra.mxu1 %v1802_v34 }
 0x1f9   : > { %1488 = vmatmul.mubr.bf16.vlgmr.msra.gmra.mrb[32].mxu1 %v713_v48 }
 0x279   : > { %v856_v13 = vpop.f32.mrb[0].mxu1  ;;  %v1057_v14 = vpop.f32.mrb[8].mxu0 }
 0x27a   : > { %v858_v36 = vpop.f32.mrb[1].mxu1  ;;  %v1059_v38 = vpop.f32.mrb[9].mxu0  ;;  %v857_v11 = vadd.f32 %v856_v13, %v2434_v5  ;;  %v1058_v56 = vadd.f32 %v1057_v14, %v2437_v55 }
 0x27b   : > { %v860_v7 = vpop.f32.mrb[2].mxu1  ;;  %v1061_v45 = vpop.f32.mrb[10].mxu0  ;;  %v859_v57 = vadd.f32 %v858_v36, %v2440_v8  ;;  %v1060_v58 = vadd.f32 %v1059_v38, %v2443_v9 }
 0x27c   : > { %v862_v52 = vpop.f32.mrb[3].mxu1  ;;  %v1063_v53 = vpop.f32.mrb[11].mxu0  ;;  %v861_v61 = vadd.f32 %v860_v7, %v2434_v5  ;;  %v1062_v62 = vadd.f32 %v1061_v45, %v2437_v55 }
 0x27d   : > { %v863_v19 = vadd.f32 %v862_v52, %v2440_v8  ;;  %v1064_v21 = vadd.f32 %v1063_v53, %v2443_v9 }
 0x281   : > { %v866_v59 = vpop.f32.mrb[4].mxu1  ;;  %v1067_v60 = vpop.f32.mrb[12].mxu0 }
 0x282   : > { %v867_v63 = vadd.f32 %v866_v59, %v2434_v5  ;;  %v1068_v0 = vadd.f32 %v1067_v60, %v2437_v55  ;;  %v868_v1 = vpop.f32.mrb[5].mxu1  ;;  %v1069_v2 = vpop.f32.mrb[13].mxu0 }
 0x283   : > { %v869_v25 = vadd.f32 %v868_v1, %v2440_v8  ;;  %v1070_v3 = vadd.f32 %v1069_v2, %v2443_v9  ;;  %v870_v4 = vpop.f32.mrb[6].mxu1  ;;  %v1071_v6 = vpop.f32.mrb[14].mxu0 }
 0x284   : > { %v895_v10 = vmax.f32 %v857_v11, %v867_v63  ;;  %v1096_v12 = vmax.f32 %v1058_v56, %v1068_v0  ;;  %v871_v16 = vadd.f32 %v870_v4, %v2434_v5  ;;  %v1072_v17 = vadd.f32 %v1071_v6, %v2437_v55  ;;  %v872_v18 = vpop.f32.mrb[7].mxu1  ;;  %v1073_v20 = vpop.f32.mrb[15].mxu0 }
 0x285   : > { %v902_v22 = vmax.f32 %v859_v57, %v869_v25  ;;  %v1103_v23 = vmax.f32 %v1060_v58, %v1070_v3  ;;  %v873_v24 = vadd.f32 %v872_v18, %v2440_v8  ;;  %v1074_v26 = vadd.f32 %v1073_v20, %v2443_v9  ;;  %v1110_v18 = vld [vmem:[#allocation2 + $0x10] sm:$0xff] }
 0x286   : > { %v896_v27 = vmax.f32 %v861_v61, %v871_v16  ;;  %v1097_v28 = vmax.f32 %v1062_v62, %v1072_v17  ;;  %v909_v17 = vld [vmem:[#allocation2] sm:$0xff] }
 0x287   : > { %v903_v29 = vmax.f32 %v863_v19, %v873_v24  ;;  %v1104_v30 = vmax.f32 %v1064_v21, %v1074_v26  ;;  %v910_v26 = vld [vmem:[#allocation2 + $0x8] sm:$0xff] }
 0x29c   : > { %v876_v31 = vpop.f32.mrb[8].mxu1  ;;  %v1077_v32 = vpop.f32.mrb[16].mxu0 }
 0x29d   : > { %v877_v33 = vadd.f32 %v876_v31, %v2434_v5  ;;  %v1078_v34 = vadd.f32 %v1077_v32, %v2437_v55  ;;  %v878_v37 = vpop.f32.mrb[9].mxu1  ;;  %v1079_v39 = vpop.f32.mrb[17].mxu0 }
 0x29e   : > { %v879_v40 = vadd.f32 %v878_v37, %v2440_v8  ;;  %v1080_v41 = vadd.f32 %v1079_v39, %v2443_v9  ;;  %v880_v42 = vpop.f32.mrb[10].mxu1  ;;  %v1081_v43 = vpop.f32.mrb[18].mxu0 }
 0x29f   : > { %v897_v44 = vmax.f32 %v895_v10, %v877_v33  ;;  %v1098_v46 = vmax.f32 %v1096_v12, %v1078_v34  ;;  %v881_v47 = vadd.f32 %v880_v42, %v2434_v5  ;;  %v1082_v48 = vadd.f32 %v1081_v43, %v2437_v55  ;;  %v882_v49 = vpop.f32.mrb[11].mxu1  ;;  %v1083_v13 = vpop.f32.mrb[19].mxu0 }
 0x2a0   : > { %v904_v14 = vmax.f32 %v902_v22, %v879_v40  ;;  %v1105_v15 = vmax.f32 %v1103_v23, %v1080_v41  ;;  %v883_v35 = vadd.f32 %v882_v49, %v2440_v8  ;;  %v1084_v36 = vadd.f32 %v1083_v13, %v2443_v9 }
 0x2a1   : > { %v898_v38 = vmax.f32 %v896_v27, %v881_v47  ;;  %v1099_v7 = vmax.f32 %v1097_v28, %v1082_v48 }
 0x2a2   : > { %v905_v45 = vmax.f32 %v903_v29, %v883_v35  ;;  %v1106_v52 = vmax.f32 %v1104_v30, %v1084_v36 }
 0x2a4   : > { %v886_v53 = vpop.f32.mrb[12].mxu1  ;;  %v1087_v11 = vpop.f32.mrb[20].mxu0 }
 0x2a5   : > { %v887_v56 = vadd.f32 %v886_v53, %v2434_v5  ;;  %v1088_v57 = vadd.f32 %v1087_v11, %v2437_v55  ;;  %v888_v58 = vpop.f32.mrb[13].mxu1  ;;  %v1089_v59 = vpop.f32.mrb[21].mxu0 }
 0x2a6   : > { %v889_v60 = vadd.f32 %v888_v58, %v2440_v8  ;;  %v1090_v61 = vadd.f32 %v1089_v59, %v2443_v9  ;;  %v890_v62 = vpop.f32.mrb[14].mxu1  ;;  %v1091_v63 = vpop.f32.mrb[22].mxu0 }
 0x2a7   : > { %v899_v0 = vmax.f32 %v897_v44, %v887_v56  ;;  %v1100_v1 = vmax.f32 %v1098_v46, %v1088_v57  ;;  %v891_v2 = vadd.f32 %v890_v62, %v2434_v5  ;;  %v1092_v19 = vadd.f32 %v1091_v63, %v2437_v55  ;;  %v892_v21 = vpop.f32.mrb[15].mxu1  ;;  %v1093_v25 = vpop.f32.mrb[23].mxu0  ;;  %v1111_v5 = vld [vmem:[#allocation2 + $0x18] sm:$0xff] }
 0x2a8   : > { %v906_v3 = vmax.f32 %v904_v14, %v889_v60  ;;  %v1107_v4 = vmax.f32 %v1105_v15, %v1090_v61  ;;  %v893_v6 = vadd.f32 %v892_v21, %v2440_v8  ;;  %v1094_v10 = vadd.f32 %v1093_v25, %v2443_v9  ;;  %v1132_v8 = vld [vmem:[%s2552_s7 + $0x4] sm:$0x3]  ;;  %v1333_v9 = vld [vmem:[%s2552_s7 + $0x6] sm:$0x3] }
 0x2a9   : > { %v900_v12 = vmax.f32 %v898_v38, %v891_v2  ;;  %v1101_v16 = vmax.f32 %v1099_v7, %v1092_v19  ;;  %v2484_v43 = vrot.slane %v1132_v8, %v2125_v54  ;;  %v2487_v44 = vrot.slane %v1333_v9, %v2125_v54 }
 0x2aa   : > { %v907_v20 = vmax.f32 %v905_v45, %v893_v6  ;;  %v1108_v22 = vmax.f32 %v1106_v52, %v1094_v10  ;;  %v2490_v46 = vrot.slane %v1132_v8, %v2122_v51  ;;  %v2493_v47 = vrot.slane %v1333_v9, %v2122_v51 }
 0x2ab   : > { %v901_v23 = vmax.f32 %v899_v0, %v900_v12  ;;  %v1102_v24 = vmax.f32 %v1100_v1, %v1101_v16 }
 0x2ac   : > { %v908_v27 = vmax.f32 %v906_v3, %v907_v20  ;;  %v1109_v55 = vmax.f32 %v1107_v4, %v1108_v22  ;;  %v1258_v28 = vpop.f32.mrb[16].mxu1  ;;  %v1459_v29 = vpop.f32.mrb[24].mxu0 }
 0x2ad   : > { %v911_v30 = vmax.f32 %v909_v17, %v901_v23  ;;  %v1112_v31 = vmax.f32 %v1110_v18, %v1102_v24  ;;  %v1260_v32 = vpop.f32.mrb[17].mxu1  ;;  %v1461_v33 = vpop.f32.mrb[25].mxu0  ;;  %v1259_v48 = vadd.f32 %v1258_v28, %v2484_v43  ;;  %v1460_v49 = vadd.f32 %v1459_v29, %v2487_v44 }
 0x2ae   : > { %v912_v34 = vmax.f32 %v910_v26, %v908_v27  ;;  %v1113_v37 = vmax.f32 %v1111_v5, %v1109_v55  ;;  %v1262_v39 = vpop.f32.mrb[18].mxu1  ;;  %v1463_v40 = vpop.f32.mrb[26].mxu0  ;;  %v1261_v13 = vadd.f32 %v1260_v32, %v2490_v46  ;;  %v1462_v14 = vadd.f32 %v1461_v33, %v2493_v47 }
 0x2af   : > { %913 = vst [vmem:[#allocation2] sm:$0xff] %v911_v30  ;;  %1114 = vst [vmem:[#allocation2 + $0x10] sm:$0xff] %v1112_v31  ;;  %v1264_v41 = vpop.f32.mrb[19].mxu1  ;;  %v1465_v42 = vpop.f32.mrb[27].mxu0  ;;  %v1263_v36 = vadd.f32 %v1262_v39, %v2484_v43  ;;  %v1464_v54 = vadd.f32 %v1463_v40, %v2487_v44 }
 0x2b0   : > { %914 = vst [vmem:[#allocation2 + $0x8] sm:$0xff] %v912_v34  ;;  %1115 = vst [vmem:[#allocation2 + $0x18] sm:$0xff] %v1113_v37  ;;  %v1265_v52 = vadd.f32 %v1264_v41, %v2490_v46  ;;  %v1466_v53 = vadd.f32 %v1465_v42, %v2493_v47 }
 0x2b4   : > { %v1268_v15 = vpop.f32.mrb[20].mxu1  ;;  %v1469_v35 = vpop.f32.mrb[28].mxu0 }
 0x2b5   : > { %v1269_v38 = vadd.f32 %v1268_v15, %v2484_v43  ;;  %v1470_v7 = vadd.f32 %v1469_v35, %v2487_v44  ;;  %v1270_v51 = vpop.f32.mrb[21].mxu1  ;;  %v1471_v45 = vpop.f32.mrb[29].mxu0 }
 0x2b6   : > { %v1271_v11 = vadd.f32 %v1270_v51, %v2490_v46  ;;  %v1472_v56 = vadd.f32 %v1471_v45, %v2493_v47  ;;  %v1272_v57 = vpop.f32.mrb[22].mxu1  ;;  %v1473_v58 = vpop.f32.mrb[30].mxu0  ;;  %v1312_v45 = vld [vmem:[#allocation2 + $0x28] sm:$0xff] }
 0x2b7   : > { %v1297_v59 = vmax.f32 %v1259_v48, %v1269_v38  ;;  %v1498_v60 = vmax.f32 %v1460_v49, %v1470_v7  ;;  %v1273_v61 = vadd.f32 %v1272_v57, %v2484_v43  ;;  %v1474_v62 = vadd.f32 %v1473_v58, %v2487_v44  ;;  %v1274_v63 = vpop.f32.mrb[23].mxu1  ;;  %v1475_v0 = vpop.f32.mrb[31].mxu0  ;;  %v1311_v38 = vld [vmem:[#allocation2 + $0x20] sm:$0xff] }
 0x2b8   : > { %v1304_v1 = vmax.f32 %v1261_v13, %v1271_v11  ;;  %v1505_v2 = vmax.f32 %v1462_v14, %v1472_v56  ;;  %v1275_v19 = vadd.f32 %v1274_v63, %v2490_v46  ;;  %v1476_v21 = vadd.f32 %v1475_v0, %v2493_v47 }
 0x2b9   : > { %v1298_v25 = vmax.f32 %v1263_v36, %v1273_v61  ;;  %v1499_v3 = vmax.f32 %v1464_v54, %v1474_v62 }
 0x2ba   : > { %v1305_v4 = vmax.f32 %v1265_v52, %v1275_v19  ;;  %v1506_v6 = vmax.f32 %v1466_v53, %v1476_v21  ;;  %v1513_v21 = vld [vmem:[#allocation2 + $0x38] sm:$0xff] }
 0x2bc   : > { %v1278_v10 = vpop.f32.mrb[24].mxu1  ;;  %v1479_v12 = vpop.f32.mrb[32].mxu0 }
 0x2bd   : > { %v1279_v16 = vadd.f32 %v1278_v10, %v2484_v43  ;;  %v1480_v17 = vadd.f32 %v1479_v12, %v2487_v44  ;;  %v1280_v18 = vpop.f32.mrb[25].mxu1  ;;  %v1481_v20 = vpop.f32.mrb[33].mxu0  ;;  %v1524_v10 = vld [vmem:[#allocation2 + $0x10] sm:$0xff] (!%p1804_p8)  ;;  %v1525_v12 = vld [vmem:[#allocation2 + $0x18] sm:$0xff] (!%p1804_p8) }
 0x2be   : > { %v1281_v22 = vadd.f32 %v1280_v18, %v2490_v46  ;;  %v1482_v23 = vadd.f32 %v1481_v20, %v2493_v47  ;;  %v1282_v24 = vpop.f32.mrb[26].mxu1  ;;  %v1483_v26 = vpop.f32.mrb[34].mxu0  ;;  %v1542_v20 = vrot.slane (!%p1804_p8), %v1524_v10, 4 }
 0x2bf   : > { %v1299_v5 = vmax.f32 %v1297_v59, %v1279_v16  ;;  %v1500_v27 = vmax.f32 %v1498_v60, %v1480_v17  ;;  %v1283_v55 = vadd.f32 %v1282_v24, %v2484_v43  ;;  %v1484_v28 = vadd.f32 %v1483_v26, %v2487_v44  ;;  %v1284_v29 = vpop.f32.mrb[27].mxu1  ;;  %v1485_v30 = vpop.f32.mrb[35].mxu0 }
 0x2c0   : > { %v1306_v31 = vmax.f32 %v1304_v1, %v1281_v22  ;;  %v1507_v8 = vmax.f32 %v1505_v2, %v1482_v23  ;;  %v1285_v9 = vadd.f32 %v1284_v29, %v2490_v46  ;;  %v1486_v32 = vadd.f32 %v1485_v30, %v2493_v47  ;;  %v1512_v1 = vld [vmem:[#allocation2 + $0x30] sm:$0xff] }
 0x2c1   : > { %v1300_v33 = vmax.f32 %v1298_v25, %v1283_v55  ;;  %v1501_v34 = vmax.f32 %v1499_v3, %v1484_v28  ;;  %v1548_v24 = vrot.slane (!%p1804_p8), %v1525_v12, 4  ;;  %v1543_v30 = vmax.f32 (!%p1804_p8), %v1524_v10, %v1542_v20 }
 0x2c2   : > { %v1307_v37 = vmax.f32 %v1305_v4, %v1285_v9  ;;  %v1508_v39 = vmax.f32 %v1506_v6, %v1486_v32  ;;  %v1522_v6 = vld [vmem:[#allocation2] sm:$0xff] (!%p1804_p8) }
 0x2c4   : > { %v1288_v40 = vpop.f32.mrb[28].mxu1 }
 0x2c5   : > { %v1289_v41 = vadd.f32 %v1288_v40, %v2484_v43  ;;  %v1290_v42 = vpop.f32.mrb[29].mxu1 }
 0x2c6   : > { %v1291_v48 = vadd.f32 %v1290_v42, %v2490_v46  ;;  %v1292_v49 = vpop.f32.mrb[30].mxu1 }
 0x2c7   : > { %v1301_v13 = vmax.f32 %v1299_v5, %v1289_v41  ;;  %v1293_v14 = vadd.f32 %v1292_v49, %v2484_v43  ;;  %v1294_v15 = vpop.f32.mrb[31].mxu1 }
 0x2c8   : > { %v1308_v35 = vmax.f32 %v1306_v31, %v1291_v48  ;;  %v1295_v36 = vadd.f32 %v1294_v15, %v2490_v46 }
 0x2c9   : > { %v1302_v54 = vmax.f32 %v1300_v33, %v1293_v14 }
 0x2ca   : > { %v1309_v7 = vmax.f32 %v1307_v37, %v1295_v36 }
 0x2cb   : > { %v1303_v51 = vmax.f32 %v1301_v13, %v1302_v54 }
 0x2cc   : > { %v1310_v52 = vmax.f32 %v1308_v35, %v1309_v7  ;;  %v1489_v53 = vpop.f32.mrb[32].mxu1 }
 0x2cd   : > { %v1313_v11 = vmax.f32 %v1311_v38, %v1303_v51  ;;  %v1490_v56 = vadd.f32 %v1489_v53, %v2487_v44  ;;  %v1491_v57 = vpop.f32.mrb[33].mxu1 }
 0x2ce   : > { %v1314_v58 = vmax.f32 %v1312_v45, %v1310_v52  ;;  %v1492_v59 = vadd.f32 %v1491_v57, %v2493_v47  ;;  %v1493_v60 = vpop.f32.mrb[34].mxu1 }
 0x2cf   : > { %1315 = vst [vmem:[#allocation2 + $0x20] sm:$0xff] %v1313_v11  ;;  %v1502_v43 = vmax.f32 %v1500_v27, %v1490_v56  ;;  %v1494_v61 = vadd.f32 %v1493_v60, %v2487_v44  ;;  %v1495_v46 = vpop.f32.mrb[35].mxu1  ;;  %v1523_v44 = vld [vmem:[#allocation2 + $0x8] sm:$0xff] (!%p1804_p8)  ;;  %v1952_v27 = vmov (!%p1804_p8), 1966171168  }
 0x2d0   : > { %1316 = vst [vmem:[#allocation2 + $0x28] sm:$0xff] %v1314_v58  ;;  %v1509_v62 = vmax.f32 %v1507_v8, %v1492_v59  ;;  %v1496_v63 = vadd.f32 %v1495_v46, %v2493_v47  ;;  %v1530_v47 = vrot.slane (!%p1804_p8), %v1522_v6, 4  ;;  %v1536_v18 = vrot.slane (!%p1804_p8), %v1523_v44, 4 }
 0x2d1   : > { %v1503_v0 = vmax.f32 %v1501_v34, %v1494_v61  ;;  %v1591_v55 = vunpack.c.l.s4 (!%p1804_p8), %v1952_v27  ;;  %v1549_v8 = vmax.f32 (!%p1804_p8), %v1525_v12, %v1548_v24 }
 0x2d2   : > { %v1510_v2 = vmax.f32 %v1508_v39, %v1496_v63  ;;  %1521 = sbr.rel (%p1804_p8) target bundleno = 759 (0x2f7), region = 60  ;;  %v1531_v28 = vmax.f32 (!%p1804_p8), %v1522_v6, %v1530_v47  ;;  %v1537_v29 = vmax.f32 (!%p1804_p8), %v1523_v44, %v1536_v18  ;;  %v1544_v39 = vrot.slane (!%p1804_p8), %v1543_v30, 2 }
 0x2d3   : > { %v1504_v19 = vmax.f32 %v1502_v43, %v1503_v0  ;;  %v1550_v41 = vrot.slane (!%p1804_p8), %v1549_v8, 2 }
 0x2d4   : > { %v1511_v25 = vmax.f32 %v1509_v62, %v1510_v2  ;;  %v1532_v34 = vrot.slane (!%p1804_p8), %v1531_v28, 2  ;;  %v1538_v37 = vrot.slane (!%p1804_p8), %v1537_v29, 2  ;;  %v1545_v15 = vmax.f32 (!%p1804_p8), %v1543_v30, %v1544_v39 }
 0x2d5   : > { %v1514_v3 = vmax.f32 %v1512_v1, %v1504_v19  ;;  %v1551_v36 = vmax.f32 (!%p1804_p8), %v1549_v8, %v1550_v41  ;;  %v1592_v19 = vunpack.c.0.s8 (!%p1804_p8), %v1591_v55 }
 0x2d6   : > { %v1515_v4 = vmax.f32 %v1513_v21, %v1511_v25  ;;  %v1526_v16 = vld [vmem:[#allocation2 + $0x20] sm:$0xff] (!%p1804_p8)  ;;  %v1533_v13 = vmax.f32 (!%p1804_p8), %v1531_v28, %v1532_v34  ;;  %v1539_v14 = vmax.f32 (!%p1804_p8), %v1537_v29, %v1538_v37  ;;  %v1546_v52 = vrot.slane (!%p1804_p8), %v1545_v15, 1 }
 0x2d7   : > { %1516 = vst [vmem:[#allocation2 + $0x30] sm:$0xff] %v1514_v3  ;;  %v1527_v17 = vld [vmem:[#allocation2 + $0x28] sm:$0xff] (!%p1804_p8)  ;;  %v1554_v26 = vrot.slane (!%p1804_p8), %v1526_v16, 4  ;;  %v1552_v11 = vrot.slane (!%p1804_p8), %v1551_v36, 1 }
 0x2d8   : > { %1517 = vst [vmem:[#allocation2 + $0x38] sm:$0xff] %v1515_v4  ;;  %v1560_v5 = vrot.slane (!%p1804_p8), %v1527_v17, 4  ;;  %v1534_v51 = vrot.slane (!%p1804_p8), %v1533_v13, 1  ;;  %v1540_v45 = vrot.slane (!%p1804_p8), %v1539_v14, 1  ;;  %v1547_v43 = vmax.f32 (!%p1804_p8), %v1545_v15, %v1546_v52 }
 0x2d9   : > { %v1555_v9 = vmax.f32 %v1526_v16, %v1554_v26  ;;  %v1553_v46 = vmax.f32 %v1551_v36, %v1552_v11  ;;  %v1595_v4 = vsub.s32 %v1592_v19, %v2119_v50 }
 0x2da   : > { %v1561_v32 = vmax.f32 %v1527_v17, %v1560_v5  ;;  %v1535_v59 = vmax.f32 %v1533_v13, %v1534_v51  ;;  %v1541_v60 = vmax.f32 %v1539_v14, %v1540_v45 }
 0x2db   : > { %v1556_v42 = vrot.slane %v1555_v9, 2  ;;  %v1587_v25 = vcombine.low %v1547_v43, %v1553_v46 }
 0x2dc   : > { %v1562_v48 = vrot.slane %v1561_v32, 2  ;;  %v1586_v2 = vcombine.low %v1535_v59, %v1541_v60 }
 0x2dd   : > { %v1557_v54 = vmax.f32 %v1555_v9, %v1556_v42  ;;  %v1603_v10 = vrot.slane %v1587_v25, %v1595_v4 }
 0x2de   : > { %v1528_v22 = vld [vmem:[#allocation2 + $0x30] sm:$0xff]  ;;  %v1563_v38 = vmax.f32 %v1561_v32, %v1562_v48  ;;  %v1596_v44 = vrot.slane %v1586_v2, %v1595_v4 }
 0x2df   : > { %v1529_v23 = vld [vmem:[#allocation2 + $0x38] sm:$0xff]  ;;  %v1566_v31 = vrot.slane %v1528_v22, 4  ;;  %v1558_v56 = vrot.slane %v1557_v54, 1 }
 0x2e0   : > { %v1572_v33 = vrot.slane %v1529_v23, 4  ;;  %v1564_v57 = vrot.slane %v1563_v38, 1  ;;  %v1618_v17 = vcombine.low %v1596_v44, %v1603_v10 }
 0x2e1   : > { %v1567_v40 = vmax.f32 %v1528_v22, %v1566_v31  ;;  %v1559_v62 = vmax.f32 %v1557_v54, %v1558_v56 }
 0x2e2   : > { %v1573_v49 = vmax.f32 %v1529_v23, %v1572_v33  ;;  %v1565_v63 = vmax.f32 %v1563_v38, %v1564_v57  ;;  %v1626_v18 = vrot.slane %v1618_v17, %v1595_v4 }
 0x2e3   : > { %v1568_v35 = vrot.slane %v1567_v40, 2 }
 0x2e4   : > { %v1574_v7 = vrot.slane %v1573_v49, 2  ;;  %v1588_v3 = vcombine.low %v1559_v62, %v1565_v63 }
 0x2e5   : > { %v1569_v53 = vmax.f32 %v1567_v40, %v1568_v35 }
 0x2e6   : > { %v1575_v58 = vmax.f32 %v1573_v49, %v1574_v7  ;;  %v1610_v12 = vrot.slane %v1588_v3, %v1595_v4 }
 0x2e7   : > { %v1570_v61 = vrot.slane %v1569_v53, 1 }
 0x2e8   : > { %v1576_v0 = vrot.slane %v1575_v58, 1 }
 0x2e9   : > { %v1571_v1 = vmax.f32 %v1569_v53, %v1570_v61 }
 0x2ea   : > { %v1577_v21 = vmax.f32 %v1575_v58, %v1576_v0 }
 0x2ec   : > { %v1589_v6 = vcombine.low %v1571_v1, %v1577_v21 }
 0x2ee   : > { %v1617_v16 = vrot.slane %v1589_v6, %v1595_v4 }
 0x2f0   : > { %v1619_v47 = vcombine.low %v1610_v12, %v1617_v16 }
 0x2f2   : > { %v1633_v20 = vrot.slane %v1619_v47, %v1595_v4 }
 0x2f4   : > { %v1634_v22 = vcombine.low %v1626_v18, %v1633_v20 }
 0x2f6   : > { %1636 = vst [vmem:[%s2042_s26] sm:$0xff] %v1634_v22 }
 0x2f7 PF: > { %s18_s9 = sadd.s32 1, %s1946_s9   ;;  %s2554_s27 = smov %s1938_s29 }
 0x2f8   : > { %p15_p9 = scmp.ge.s32.totalorder %s18_s9, 10   ;;  %s2555_s28 = smov %s1942_s30 }
 0x2f9   : > { %s2556_s29 = smov %s2559_s10  ;;  %s2557_s30 = smov %s2563_s11 }
 0x2fa   :  { %17 = sbr.rel (!%p15_p9) target bundleno = 3 (0x3), region = 93 }

// kernel: pointnet_cls_forward.5
= control target key start
LH: loop header
LB: loop body
LE: loop exit
PB: predicated region body
PF: predicated region fallthrough
CT: control target
= control target key end

     0   :  { %12 = vsyncpa [#allocation3], 0  ;;  %s3570_s24 = smov [#allocation2]   ;;  %s3956_s0 = inlined_call_operand.vmem [shape: f32[2,1024], index: 0, kind: input, shape index: {}]   ;;  %s3957_s1 = inlined_call_operand.hbm [shape: bf16[1024,512], index: 1, kind: input, shape index: {}]   ;;  %s3958_s2 = inlined_call_operand.vmem [shape: f32[1,512], index: 2, kind: input, shape index: {}]   ;;  %s3959_s3 = inlined_call_operand.vmem [shape: bf16[512,256], index: 3, kind: input, shape index: {}]   ;;  %s3960_s4 = inlined_call_operand.vmem [shape: f32[1,256], index: 4, kind: input, shape index: {}]   ;;  %s3961_s5 = inlined_call_operand.vmem [shape: bf16[256,9], index: 5, kind: input, shape index: {}]   ;;  %s3962_s6 = inlined_call_operand.vmem [shape: f32[1,9], index: 6, kind: input, shape index: {}]   ;;  %s3963_s7 = inlined_call_operand.vmem [shape: f32[2,9], index: 7, kind: output, shape index: {}]  }
   0x1   :  { %s20_s25 = sshll.u32 %s3570_s24, 4  ;;  %s3546_s28 = scalar_lea.hbm %s3957_s1, 32768  ;;  %s21_s25 = int_to_ptr.vmem [resolvable:$true] %s20_s25 }
   0x2   :  { %p3547_p0 = scmp.ne.s32.totalorder %s3957_s1, %s3546_s28  ;;  %p3550_p1 = scmp.lt.u32.totalorder %s3546_s28, %s3957_s1 }
   0x4   :  { %p3552_p2 = pnand %p3550_p1, %p3547_p0 }
   0x6   :  { %3555 = shalt.err (!%p3552_p2)
}
   0x7   :  { %s3556_s10 = scalar_lea.vmem %s21_s25, 32768  ;;  %p3561_p4 = scmp.lt.s32.totalorder %s21_s25, %s21_s25 }
   0x8   :  { %p3557_p3 = scmp.ne.s32.totalorder %s21_s25, %s3556_s10  ;;  %p3562_p5 = scmp.lt.s32.totalorder %s3556_s10, %s3556_s10 }
   0xa   :  { %p3563_p6 = por %p3562_p5, %p3561_p4 }
   0xc   :  { %p3564_p7 = pnand %p3563_p6, %p3557_p3 }
   0xe   :  { %3567 = shalt.err (!%p3564_p7)
}
   0xf   :  { %s3571_s11 = smov 256   ;;  %s3572_s12 = smov 16  }
  0x10   :  { %26 = dma.hbm_to_vmem [thread:$0]  %s3957_s1, 32768, %s21_s25, [#allocation3], %s3571_s11, %s3571_s11, %s3572_s12  }
  0x11   :  { %3568 = dma.done.wait [#allocation3], 32768  }
  0x12   :  { %3569 = vsyncadd [#allocation3], 4294934528  ;;  %v3048_v0 = vld [vmem:[#allocation2 + $0x4] ss:$16 sps:$4 sm:$0xff]   ;;  %v3052_v2 = vld [vmem:[#allocation2] ss:$16 sps:$4 sm:$0xff]   ;;  %v49_v38 = vlaneseq }
  0x13   :  { %v3050_v1 = vld [vmem:[#allocation2 + $0x204] ss:$16 sps:$4 sm:$0xff]   ;;  %1653 = vmatprep.subr.bf16.mxu1 %v3048_v0  ;;  %v3053_v3 = vld [vmem:[#allocation2 + $0x200] ss:$16 sps:$4 sm:$0xff]   ;;  %v3573_v36 = vmov 1983009808  }
  0x14   :  { %1694 = vmatprep.subr.bf16.mxu0 %v3050_v1  ;;  %v3054_v4 = vld [vmem:[#allocation2 + $0x24] ss:$16 sps:$4 sm:$0xff]   ;;  %1654 = vmatpush1.bf16.msra.mxu1 %v3052_v2  ;;  %v3058_v6 = vld [vmem:[#allocation2 + $0x20] ss:$16 sps:$4 sm:$0xff]   ;;  %v47_v37 = vunpack.c.l.s4 %v3573_v36  ;;  %v3626_v43 = vshrl.u32 %v49_v38, 7  ;;  %vm2646_vm0 = vcmask 66560  }
  0x15   :  { %1695 = vmatpush1.bf16.msra.mxu0 %v3053_v3  ;;  %v3056_v5 = vld [vmem:[#allocation2 + $0x224] ss:$16 sps:$4 sm:$0xff]   ;;  %1655 = vmatprep.subr.bf16.mxu1 %v3054_v4  ;;  %v3059_v7 = vld [vmem:[#allocation2 + $0x220] ss:$16 sps:$4 sm:$0xff]  }
  0x16   :  { %1696 = vmatprep.subr.bf16.mxu0 %v3056_v5  ;;  %v3060_v8 = vld [vmem:[#allocation2 + $0x44] ss:$16 sps:$4 sm:$0xff]   ;;  %v3064_v10 = vld [vmem:[#allocation2 + $0x40] ss:$16 sps:$4 sm:$0xff]   ;;  %v48_v42 = vunpack.c.0.s8 %v47_v37  ;;  %v3180_v37 = vld [vmem:[#allocation2 + $0xac] ss:$16 sps:$4 sm:$0xff]  }
  0x17   :  { %v3062_v9 = vld [vmem:[#allocation2 + $0x244] ss:$16 sps:$4 sm:$0xff]   ;;  %v3065_v11 = vld [vmem:[#allocation2 + $0x240] ss:$16 sps:$4 sm:$0xff]  }
  0x18   :  { %1656 = vmatpush1.bf16.msra.mxu1 %v3058_v6  ;;  %v3066_v12 = vld [vmem:[#allocation2 + $0x64] ss:$16 sps:$4 sm:$0xff]   ;;  %v3070_v14 = vld [vmem:[#allocation2 + $0x60] ss:$16 sps:$4 sm:$0xff]   ;;  %v3629_v49 = vsub.s32 %v48_v42, %v3626_v43  ;;  %v3648_v42 = vld [vmem:[%s3956_s0 + $0x8] sm:$0xff] }
  0x19   :  { %1697 = vmatpush1.bf16.msra.mxu0 %v3059_v7  ;;  %1657 = vmatprep.subr.bf16.mxu1 %v3060_v8  ;;  %v3068_v13 = vld [vmem:[#allocation2 + $0x264] ss:$16 sps:$4 sm:$0xff]   ;;  %v3071_v15 = vld [vmem:[#allocation2 + $0x260] ss:$16 sps:$4 sm:$0xff]  }
  0x1a   :  { %1698 = vmatprep.subr.bf16.mxu0 %v3062_v9  ;;  %v3072_v16 = vld [vmem:[#allocation2 + $0x84] ss:$16 sps:$4 sm:$0xff]   ;;  %v3076_v18 = vld [vmem:[#allocation2 + $0x80] ss:$16 sps:$4 sm:$0xff]  }
  0x1b   :  { %v3074_v17 = vld [vmem:[#allocation2 + $0x284] ss:$16 sps:$4 sm:$0xff]   ;;  %v3077_v19 = vld [vmem:[#allocation2 + $0x280] ss:$16 sps:$4 sm:$0xff]  }
  0x1c   :  { %1658 = vmatpush1.bf16.msra.mxu1 %v3064_v10  ;;  %v3078_v20 = vld [vmem:[#allocation2 + $0xa4] ss:$16 sps:$4 sm:$0xff]   ;;  %v3082_v22 = vld [vmem:[#allocation2 + $0xa0] ss:$16 sps:$4 sm:$0xff]  }
  0x1d   :  { %1699 = vmatpush1.bf16.msra.mxu0 %v3065_v11  ;;  %1659 = vmatprep.subr.bf16.mxu1 %v3066_v12  ;;  %v3080_v21 = vld [vmem:[#allocation2 + $0x2a4] ss:$16 sps:$4 sm:$0xff]   ;;  %v3083_v23 = vld [vmem:[#allocation2 + $0x2a0] ss:$16 sps:$4 sm:$0xff]  }
  0x1e   :  { %1700 = vmatprep.subr.bf16.mxu0 %v3068_v13  ;;  %v3084_v24 = vld [vmem:[#allocation2 + $0xc4] ss:$16 sps:$4 sm:$0xff]   ;;  %v3088_v26 = vld [vmem:[#allocation2 + $0xc0] ss:$16 sps:$4 sm:$0xff]  }
  0x1f   :  { %v3086_v25 = vld [vmem:[#allocation2 + $0x2c4] ss:$16 sps:$4 sm:$0xff]   ;;  %v3089_v27 = vld [vmem:[#allocation2 + $0x2c0] ss:$16 sps:$4 sm:$0xff]  }
  0x20   :  { %1660 = vmatpush1.bf16.msra.mxu1 %v3070_v14  ;;  %v3090_v28 = vld [vmem:[#allocation2 + $0xe4] ss:$16 sps:$4 sm:$0xff]   ;;  %v3094_v30 = vld [vmem:[#allocation2 + $0xe0] ss:$16 sps:$4 sm:$0xff]  }
  0x21   :  { %1701 = vmatpush1.bf16.msra.mxu0 %v3071_v15  ;;  %1661 = vmatprep.subr.bf16.mxu1 %v3072_v16  ;;  %v3092_v29 = vld [vmem:[#allocation2 + $0x2e4] ss:$16 sps:$4 sm:$0xff]   ;;  %v3095_v31 = vld [vmem:[#allocation2 + $0x2e0] ss:$16 sps:$4 sm:$0xff]   ;;  %v3150_v15 = vld [vmem:[#allocation2 + $0xc] ss:$16 sps:$4 sm:$0xff]  }
  0x22   :  { %1702 = vmatprep.subr.bf16.mxu0 %v3074_v17  ;;  %v3096_v32 = vld [vmem:[#allocation2 + $0x104] ss:$16 sps:$4 sm:$0xff]   ;;  %v3100_v34 = vld [vmem:[#allocation2 + $0x100] ss:$16 sps:$4 sm:$0xff]  }
  0x23   :  { %v3098_v33 = vld [vmem:[#allocation2 + $0x304] ss:$16 sps:$4 sm:$0xff]   ;;  %v3101_v35 = vld [vmem:[#allocation2 + $0x300] ss:$16 sps:$4 sm:$0xff]  }
  0x24   :  { %1662 = vmatpush1.bf16.msra.mxu1 %v3076_v18  ;;  %v3102_v39 = vld [vmem:[#allocation2 + $0x124] ss:$16 sps:$4 sm:$0xff]   ;;  %v3106_v41 = vld [vmem:[#allocation2 + $0x120] ss:$16 sps:$4 sm:$0xff]  }
  0x25   :  { %1703 = vmatpush1.bf16.msra.mxu0 %v3077_v19  ;;  %1663 = vmatprep.subr.bf16.mxu1 %v3078_v20  ;;  %v3104_v40 = vld [vmem:[#allocation2 + $0x324] ss:$16 sps:$4 sm:$0xff]   ;;  %v3107_v44 = vld [vmem:[#allocation2 + $0x320] ss:$16 sps:$4 sm:$0xff]   ;;  %v3148_v19 = vld [vmem:[#allocation2 + $0x8] ss:$16 sps:$4 sm:$0xff]  }
  0x26   :  { %1704 = vmatprep.subr.bf16.mxu0 %v3080_v21  ;;  %v3108_v45 = vld [vmem:[#allocation2 + $0x144] ss:$16 sps:$4 sm:$0xff]   ;;  %v3112_v47 = vld [vmem:[#allocation2 + $0x140] ss:$16 sps:$4 sm:$0xff]   ;;  %v3156_v21 = vld [vmem:[#allocation2 + $0x2c] ss:$16 sps:$4 sm:$0xff]  }
  0x27   :  { %v3110_v46 = vld [vmem:[#allocation2 + $0x344] ss:$16 sps:$4 sm:$0xff]   ;;  %v3113_v48 = vld [vmem:[#allocation2 + $0x340] ss:$16 sps:$4 sm:$0xff]  }
  0x28   :  { %1664 = vmatpush1.bf16.msra.mxu1 %v3082_v22  ;;  %v3114_v50 = vld [vmem:[#allocation2 + $0x164] ss:$16 sps:$4 sm:$0xff]   ;;  %v3118_v53 = vld [vmem:[#allocation2 + $0x160] ss:$16 sps:$4 sm:$0xff]  }
  0x29   :  { %1705 = vmatpush1.bf16.msra.mxu0 %v3083_v23  ;;  %1665 = vmatprep.subr.bf16.mxu1 %v3084_v24  ;;  %v3116_v51 = vld [vmem:[#allocation2 + $0x364] ss:$16 sps:$4 sm:$0xff]   ;;  %v3119_v56 = vld [vmem:[#allocation2 + $0x360] ss:$16 sps:$4 sm:$0xff]   ;;  %v3154_v23 = vld [vmem:[#allocation2 + $0x28] ss:$16 sps:$4 sm:$0xff]  }
  0x2a   :  { %1706 = vmatprep.subr.bf16.mxu0 %v3086_v25  ;;  %v41_v52 = vld [vmem:[%s3956_s0] sm:$0xff]  ;;  %v3162_v25 = vld [vmem:[#allocation2 + $0x4c] ss:$16 sps:$4 sm:$0xff]  }
  0x2b   :  { %v52_v54 = vrot.slane %v41_v52, %v3629_v49  ;;  %v45_v55 = vcombine.high %v41_v52, %v41_v52  ;;  %v3120_v57 = vld [vmem:[#allocation2 + $0x184] ss:$16 sps:$4 sm:$0xff]   ;;  %v3124_v61 = vld [vmem:[#allocation2 + $0x180] ss:$16 sps:$4 sm:$0xff]  }
  0x2c   :  { %1666 = vmatpush1.bf16.msra.mxu1 %v3088_v26  ;;  %v3122_v58 = vld [vmem:[#allocation2 + $0x384] ss:$16 sps:$4 sm:$0xff]   ;;  %v3125_v0 = vld [vmem:[#allocation2 + $0x380] ss:$16 sps:$4 sm:$0xff]  }
  0x2d   :  { %1707 = vmatpush1.bf16.msra.mxu0 %v3089_v27  ;;  %1667 = vmatprep.subr.bf16.mxu1 %v3090_v28  ;;  %v60_v59 = vcombine.high %v52_v54, %v52_v54  ;;  %v59_v60 = vrot.slane %v45_v55, %v3629_v49  ;;  %v3126_v1 = vld [vmem:[#allocation2 + $0x1a4] ss:$16 sps:$4 sm:$0xff]   ;;  %v3130_v4 = vld [vmem:[#allocation2 + $0x1a0] ss:$16 sps:$4 sm:$0xff]   ;;  %v3639_v16 = vpack.c.bf16 %v52_v54, %v52_v54  ;;  %v3160_v27 = vld [vmem:[#allocation2 + $0x48] ss:$16 sps:$4 sm:$0xff]  }
  0x2e   :  { %1708 = vmatprep.subr.bf16.mxu0 %v3092_v29  ;;  %v3128_v2 = vld [vmem:[#allocation2 + $0x3a4] ss:$16 sps:$4 sm:$0xff]   ;;  %v3131_v5 = vld [vmem:[#allocation2 + $0x3a0] ss:$16 sps:$4 sm:$0xff]   ;;  %v3168_v29 = vld [vmem:[#allocation2 + $0x6c] ss:$16 sps:$4 sm:$0xff]  }
  0x2f   :  { %v88_v62 = vpack.c.bf16 %v60_v59, %v60_v59  ;;  %v61_v63 = vcombine.high %v59_v60, %v59_v60  ;;  %v3132_v6 = vld [vmem:[#allocation2 + $0x1c4] ss:$16 sps:$4 sm:$0xff]   ;;  %v3136_v8 = vld [vmem:[#allocation2 + $0x1c0] ss:$16 sps:$4 sm:$0xff]   ;;  %v3641_v18 = vpack.c.bf16 %v59_v60, %v59_v60  ;;  %v3198_v55 = vld [vmem:[#allocation2 + $0x10c] ss:$16 sps:$4 sm:$0xff]  }
  0x30   :  { %1668 = vmatpush1.bf16.msra.mxu1 %v3094_v30  ;;  %v3134_v7 = vld [vmem:[#allocation2 + $0x3c4] ss:$16 sps:$4 sm:$0xff]   ;;  %v3137_v9 = vld [vmem:[#allocation2 + $0x3c0] ss:$16 sps:$4 sm:$0xff]   ;;  %v3204_v59 = vld [vmem:[#allocation2 + $0x12c] ss:$16 sps:$4 sm:$0xff]  }
  0x31   :  { %1709 = vmatpush1.bf16.msra.mxu0 %v3095_v31  ;;  %1669 = vmatprep.subr.bf16.mxu1 %v3096_v32  ;;  %v3636_v3 = vpack.c.bf16 %v61_v63, %v61_v63  ;;  %v3138_v10 = vld [vmem:[#allocation2 + $0x1e4] ss:$16 sps:$4 sm:$0xff]   ;;  %v3142_v12 = vld [vmem:[#allocation2 + $0x1e0] ss:$16 sps:$4 sm:$0xff]   ;;  %v3166_v31 = vld [vmem:[#allocation2 + $0x68] ss:$16 sps:$4 sm:$0xff]  }
  0x32   :  { %1710 = vmatprep.subr.bf16.mxu0 %v3098_v33  ;;  %1685 = vmatprep.mubr.bf16.mxu1 %v88_v62  ;;  %v3140_v11 = vld [vmem:[#allocation2 + $0x3e4] ss:$16 sps:$4 sm:$0xff]   ;;  %v3143_v13 = vld [vmem:[#allocation2 + $0x3e0] ss:$16 sps:$4 sm:$0xff]   ;;  %v3174_v33 = vld [vmem:[#allocation2 + $0x8c] ss:$16 sps:$4 sm:$0xff]  }
  0x33   :  { %1726 = vmatprep.mubr.bf16.mxu0 %v3636_v3  ;;  %v3147_v14 = vld [vmem:[#allocation2 + $0x404] ss:$16 sps:$4 sm:$0xff]   ;;  %v3145_v17 = vld [vmem:[#allocation2 + $0x400] ss:$16 sps:$4 sm:$0xff]   ;;  %v3210_v63 = vld [vmem:[#allocation2 + $0x14c] ss:$16 sps:$4 sm:$0xff]  }
  0x34   :  { %1670 = vmatpush1.bf16.msra.mxu1 %v3100_v34  ;;  %v3153_v20 = vld [vmem:[#allocation2 + $0x424] ss:$16 sps:$4 sm:$0xff]   ;;  %v3151_v22 = vld [vmem:[#allocation2 + $0x420] ss:$16 sps:$4 sm:$0xff]  }
  0x35   :  { %1711 = vmatpush1.bf16.msra.mxu0 %v3101_v35  ;;  %1671 = vmatprep.subr.bf16.mxu1 %v3102_v39  ;;  %v3159_v24 = vld [vmem:[#allocation2 + $0x444] ss:$16 sps:$4 sm:$0xff]   ;;  %v3157_v26 = vld [vmem:[#allocation2 + $0x440] ss:$16 sps:$4 sm:$0xff]   ;;  %v3172_v35 = vld [vmem:[#allocation2 + $0x88] ss:$16 sps:$4 sm:$0xff]  }
  0x36   :  { %1712 = vmatprep.subr.bf16.mxu0 %v3104_v40  ;;  %v3165_v28 = vld [vmem:[#allocation2 + $0x464] ss:$16 sps:$4 sm:$0xff]   ;;  %v3163_v30 = vld [vmem:[#allocation2 + $0x460] ss:$16 sps:$4 sm:$0xff]   ;;  %v3178_v39 = vld [vmem:[#allocation2 + $0xa8] ss:$16 sps:$4 sm:$0xff]  }
  0x37   :  { %v3171_v32 = vld [vmem:[#allocation2 + $0x484] ss:$16 sps:$4 sm:$0xff]   ;;  %v3169_v34 = vld [vmem:[#allocation2 + $0x480] ss:$16 sps:$4 sm:$0xff]  }
  0x38   :  { %1672 = vmatpush1.bf16.msra.mxu1 %v3106_v41  ;;  %v3177_v36 = vld [vmem:[#allocation2 + $0x4a4] ss:$16 sps:$4 sm:$0xff]   ;;  %v3175_v38 = vld [vmem:[#allocation2 + $0x4a0] ss:$16 sps:$4 sm:$0xff]   ;;  %v3186_v41 = vld [vmem:[#allocation2 + $0xcc] ss:$16 sps:$4 sm:$0xff]  }
  0x39   :  { %1713 = vmatpush1.bf16.msra.mxu0 %v3107_v44  ;;  %1673 = vmatprep.subr.bf16.mxu1 %v3108_v45  ;;  %v3183_v40 = vld [vmem:[#allocation2 + $0x4c4] ss:$16 sps:$4 sm:$0xff]   ;;  %v3652_v44 = vrot.slane %v3648_v42, %v3629_v49  ;;  %v3181_v45 = vld [vmem:[#allocation2 + $0x4c0] ss:$16 sps:$4 sm:$0xff]  }
  0x3a   :  { %1714 = vmatprep.subr.bf16.mxu0 %v3110_v46  ;;  %v3184_v46 = vld [vmem:[#allocation2 + $0xc8] ss:$16 sps:$4 sm:$0xff]   ;;  %v3187_v52 = vld [vmem:[#allocation2 + $0x4e0] ss:$16 sps:$4 sm:$0xff]   ;;  %v3195_v54 = vld [vmem:[#allocation2 + $0x504] ss:$16 sps:$4 sm:$0xff]  }
  0x3b   :  { %v3199_v60 = vld [vmem:[#allocation2 + $0x520] ss:$16 sps:$4 sm:$0xff]  }
  0x3c   :  { %1674 = vmatpush1.bf16.msra.mxu1 %v3112_v47  ;;  %v77_v47 = vcombine.high %v3652_v44, %v3652_v44 }
  0x3d   :  { %1715 = vmatpush1.bf16.msra.mxu0 %v3113_v48  ;;  %1675 = vmatprep.subr.bf16.mxu1 %v3114_v50  ;;  %v3189_v48 = vld [vmem:[#allocation2 + $0x4e4] ss:$16 sps:$4 sm:$0xff]   ;;  %v3192_v50 = vld [vmem:[#allocation2 + $0xec] ss:$16 sps:$4 sm:$0xff]  }
  0x3e   :  { %1716 = vmatprep.subr.bf16.mxu0 %v3116_v51  ;;  %v3656_v51 = vpack.c.bf16 %v77_v47, %v77_v47  ;;  %v3265_v47 = vld [vmem:[#allocation2 + $0x680] ss:$16 sps:$4 sm:$0xff]  }
  0x40   :  { %1676 = vmatpush1.bf16.msra.mxu1 %v3118_v53  ;;  %v3190_v53 = vld [vmem:[#allocation2 + $0xe8] ss:$16 sps:$4 sm:$0xff]  }
  0x41   :  { %1717 = vmatpush1.bf16.msra.mxu0 %v3119_v56  ;;  %1677 = vmatprep.subr.bf16.mxu1 %v3120_v57  ;;  %v3193_v56 = vld [vmem:[#allocation2 + $0x500] ss:$16 sps:$4 sm:$0xff]   ;;  %v3196_v57 = vld [vmem:[#allocation2 + $0x108] ss:$16 sps:$4 sm:$0xff]  }
  0x42   :  { %1718 = vmatprep.subr.bf16.mxu0 %v3122_v58  ;;  %v3201_v58 = vld [vmem:[#allocation2 + $0x524] ss:$16 sps:$4 sm:$0xff]  }
  0x44   :  { %1678 = vmatpush1.bf16.msra.mxu1 %v3124_v61  ;;  %v3202_v61 = vld [vmem:[#allocation2 + $0x128] ss:$16 sps:$4 sm:$0xff]  }
  0x45   :  { %1719 = vmatpush1.bf16.msra.mxu0 %v3125_v0  ;;  %1679 = vmatprep.subr.bf16.mxu1 %v3126_v1  ;;  %v3205_v0 = vld [vmem:[#allocation2 + $0x540] ss:$16 sps:$4 sm:$0xff]   ;;  %v3208_v1 = vld [vmem:[#allocation2 + $0x148] ss:$16 sps:$4 sm:$0xff]  }
  0x46   :  { %1720 = vmatprep.subr.bf16.mxu0 %v3128_v2  ;;  %v3213_v2 = vld [vmem:[#allocation2 + $0x564] ss:$16 sps:$4 sm:$0xff]  }
  0x48   :  { %1680 = vmatpush1.bf16.msra.mxu1 %v3130_v4  ;;  %v3216_v4 = vld [vmem:[#allocation2 + $0x16c] ss:$16 sps:$4 sm:$0xff]  }
  0x49   :  { %1721 = vmatpush1.bf16.msra.mxu0 %v3131_v5  ;;  %1681 = vmatprep.subr.bf16.mxu1 %v3132_v6  ;;  %v3211_v5 = vld [vmem:[#allocation2 + $0x560] ss:$16 sps:$4 sm:$0xff]   ;;  %v3214_v6 = vld [vmem:[#allocation2 + $0x168] ss:$16 sps:$4 sm:$0xff]  }
  0x4a   :  { %1722 = vmatprep.subr.bf16.mxu0 %v3134_v7  ;;  %v3219_v7 = vld [vmem:[#allocation2 + $0x584] ss:$16 sps:$4 sm:$0xff]  }
  0x4c   :  { %1682 = vmatpush1.bf16.msra.mxu1 %v3136_v8  ;;  %v3222_v8 = vld [vmem:[#allocation2 + $0x18c] ss:$16 sps:$4 sm:$0xff]  }
  0x4d   :  { %1723 = vmatpush1.bf16.msra.mxu0 %v3137_v9  ;;  %1683 = vmatprep.subr.bf16.mxu1 %v3138_v10  ;;  %v3217_v9 = vld [vmem:[#allocation2 + $0x580] ss:$16 sps:$4 sm:$0xff]   ;;  %v3220_v10 = vld [vmem:[#allocation2 + $0x188] ss:$16 sps:$4 sm:$0xff]  }
  0x4e   :  { %1724 = vmatprep.subr.bf16.mxu0 %v3140_v11  ;;  %v3225_v11 = vld [vmem:[#allocation2 + $0x5a4] ss:$16 sps:$4 sm:$0xff]  }
  0x50   :  { %1684 = vmatpush1.bf16.msra.mxu1 %v3142_v12  ;;  %v3228_v12 = vld [vmem:[#allocation2 + $0x1ac] ss:$16 sps:$4 sm:$0xff]  }
  0x51   :  { %1725 = vmatpush1.bf16.msra.mxu0 %v3143_v13  ;;  %1817 = vmatprep.subr.bf16.mxu1 %v3150_v15  ;;  %v3223_v13 = vld [vmem:[#allocation2 + $0x5a0] ss:$16 sps:$4 sm:$0xff]   ;;  %v3231_v15 = vld [vmem:[#allocation2 + $0x5c4] ss:$16 sps:$4 sm:$0xff]  }
  0x52   :  { %1735 = vmatprep.subr.bf16.mxu0 %v3147_v14  ;;  %v3226_v14 = vld [vmem:[#allocation2 + $0x1a8] ss:$16 sps:$4 sm:$0xff]  }
  0x53   :  { %1686 = vmatmul.mubr.bf16.vlgmr.msra.gmra.mrb[0].mxu1 %v3639_v16 }
  0x54   :  { %1727 = vmatmul.mubr.bf16.vlgmr.msra.gmra.mrb[0].mxu0 %v3641_v18  ;;  %1818 = vmatpush1.bf16.msra.mxu1 %v3148_v19  ;;  %v62_v19 = vcombine.high %v3648_v42, %v3648_v42  ;;  %v3259_v42 = vld [vmem:[#allocation2 + $0x660] ss:$16 sps:$4 sm:$0xff]  }
  0x55   :  { %1736 = vmatpush1.bf16.msra.mxu0 %v3145_v17  ;;  %1819 = vmatprep.subr.bf16.mxu1 %v3156_v21  ;;  %v3234_v17 = vld [vmem:[#allocation2 + $0x1cc] ss:$16 sps:$4 sm:$0xff]   ;;  %v3232_v21 = vld [vmem:[#allocation2 + $0x1c8] ss:$16 sps:$4 sm:$0xff]  }
  0x56   :  { %1737 = vmatprep.subr.bf16.mxu0 %v3153_v20  ;;  %1849 = vmatprep.mubr.bf16.mxu1 %v88_v62  ;;  %v3207_v62 = vld [vmem:[#allocation2 + $0x544] ss:$16 sps:$4 sm:$0xff]   ;;  %v3229_v20 = vld [vmem:[#allocation2 + $0x5c0] ss:$16 sps:$4 sm:$0xff]  }
  0x57   :  { %1767 = vmatprep.mubr.bf16.mxu0 %v3656_v51 }
  0x58   :  { %1820 = vmatpush1.bf16.msra.mxu1 %v3154_v23  ;;  %v3240_v23 = vld [vmem:[#allocation2 + $0x1ec] ss:$16 sps:$4 sm:$0xff]  }
  0x59   :  { %1738 = vmatpush1.bf16.msra.mxu0 %v3151_v22  ;;  %1821 = vmatprep.subr.bf16.mxu1 %v3162_v25  ;;  %v3237_v22 = vld [vmem:[#allocation2 + $0x5e4] ss:$16 sps:$4 sm:$0xff]   ;;  %v3235_v25 = vld [vmem:[#allocation2 + $0x5e0] ss:$16 sps:$4 sm:$0xff]  }
  0x5a   :  { %1739 = vmatprep.subr.bf16.mxu0 %v3159_v24  ;;  %v3662_v24 = vrot.slane %v62_v19, %v3629_v49  ;;  %v3244_v49 = vld [vmem:[#allocation2 + $0x208] ss:$16 sps:$4 sm:$0xff]   ;;  %v3313_v19 = vld [vmem:[#allocation2 + $0x780] ss:$16 sps:$4 sm:$0xff]  }
  0x5c   :  { %1822 = vmatpush1.bf16.msra.mxu1 %v3160_v27  ;;  %v3243_v27 = vld [vmem:[#allocation2 + $0x604] ss:$16 sps:$4 sm:$0xff]  }
  0x5d   :  { %1740 = vmatpush1.bf16.msra.mxu0 %v3157_v26  ;;  %1823 = vmatprep.subr.bf16.mxu1 %v3168_v29  ;;  %v3238_v26 = vld [vmem:[#allocation2 + $0x1e8] ss:$16 sps:$4 sm:$0xff]   ;;  %v78_v29 = vcombine.high %v3662_v24, %v3662_v24 }
  0x5e   :  { %1741 = vmatprep.subr.bf16.mxu0 %v3165_v28  ;;  %v3246_v28 = vld [vmem:[#allocation2 + $0x20c] ss:$16 sps:$4 sm:$0xff]  }
  0x60   :  { %1824 = vmatpush1.bf16.msra.mxu1 %v3166_v31  ;;  %v3241_v31 = vld [vmem:[#allocation2 + $0x600] ss:$16 sps:$4 sm:$0xff]  }
  0x61   :  { %1742 = vmatpush1.bf16.msra.mxu0 %v3163_v30  ;;  %1825 = vmatprep.subr.bf16.mxu1 %v3174_v33  ;;  %v3668_v30 = vpack.c.bf16 %v3652_v44, %v3652_v44  ;;  %v3252_v33 = vld [vmem:[#allocation2 + $0x22c] ss:$16 sps:$4 sm:$0xff]   ;;  %v3262_v44 = vld [vmem:[#allocation2 + $0x268] ss:$16 sps:$4 sm:$0xff]  }
  0x62   :  { %1743 = vmatprep.subr.bf16.mxu0 %v3171_v32  ;;  %v3249_v32 = vld [vmem:[#allocation2 + $0x624] ss:$16 sps:$4 sm:$0xff]  }
  0x64   :  { %1826 = vmatpush1.bf16.msra.mxu1 %v3172_v35  ;;  %v3247_v35 = vld [vmem:[#allocation2 + $0x620] ss:$16 sps:$4 sm:$0xff]  }
  0x65   :  { %1744 = vmatpush1.bf16.msra.mxu0 %v3169_v34  ;;  %1827 = vmatprep.subr.bf16.mxu1 %v3180_v37  ;;  %v3670_v34 = vpack.c.bf16 %v78_v29, %v78_v29  ;;  %v3255_v37 = vld [vmem:[#allocation2 + $0x644] ss:$16 sps:$4 sm:$0xff]   ;;  %v3328_v29 = vld [vmem:[#allocation2 + $0x3c8] ss:$16 sps:$4 sm:$0xff]  }
  0x66   :  { %1745 = vmatprep.subr.bf16.mxu0 %v3177_v36  ;;  %v3250_v36 = vld [vmem:[#allocation2 + $0x228] ss:$16 sps:$4 sm:$0xff]  }
  0x68   :  { %1828 = vmatpush1.bf16.msra.mxu1 %v3178_v39  ;;  %v3253_v39 = vld [vmem:[#allocation2 + $0x640] ss:$16 sps:$4 sm:$0xff]  }
  0x69   :  { %1746 = vmatpush1.bf16.msra.mxu0 %v3175_v38  ;;  %1829 = vmatprep.subr.bf16.mxu1 %v3186_v41  ;;  %v3258_v38 = vld [vmem:[#allocation2 + $0x24c] ss:$16 sps:$4 sm:$0xff]   ;;  %v3261_v41 = vld [vmem:[#allocation2 + $0x664] ss:$16 sps:$4 sm:$0xff]  }
  0x6a   :  { %1747 = vmatprep.subr.bf16.mxu0 %v3183_v40  ;;  %v3256_v40 = vld [vmem:[#allocation2 + $0x248] ss:$16 sps:$4 sm:$0xff]  }
  0x6c   :  { %1830 = vmatpush1.bf16.msra.mxu1 %v3184_v46  ;;  %v3270_v46 = vld [vmem:[#allocation2 + $0x28c] ss:$16 sps:$4 sm:$0xff]  }
  0x6d   :  { %1748 = vmatpush1.bf16.msra.mxu0 %v3181_v45  ;;  %1831 = vmatprep.subr.bf16.mxu1 %v3192_v50  ;;  %v3267_v45 = vld [vmem:[#allocation2 + $0x684] ss:$16 sps:$4 sm:$0xff]   ;;  %v3276_v50 = vld [vmem:[#allocation2 + $0x2ac] ss:$16 sps:$4 sm:$0xff]  }
  0x6e   :  { %1749 = vmatprep.subr.bf16.mxu0 %v3189_v48  ;;  %v3273_v48 = vld [vmem:[#allocation2 + $0x6a4] ss:$16 sps:$4 sm:$0xff]  }
  0x70   :  { %1832 = vmatpush1.bf16.msra.mxu1 %v3190_v53  ;;  %v3274_v53 = vld [vmem:[#allocation2 + $0x2a8] ss:$16 sps:$4 sm:$0xff]  }
  0x71   :  { %1750 = vmatpush1.bf16.msra.mxu0 %v3187_v52  ;;  %1833 = vmatprep.subr.bf16.mxu1 %v3198_v55  ;;  %v3271_v52 = vld [vmem:[#allocation2 + $0x6a0] ss:$16 sps:$4 sm:$0xff]   ;;  %v3282_v55 = vld [vmem:[#allocation2 + $0x2cc] ss:$16 sps:$4 sm:$0xff]  }
  0x72   :  { %1751 = vmatprep.subr.bf16.mxu0 %v3195_v54  ;;  %v3279_v54 = vld [vmem:[#allocation2 + $0x6c4] ss:$16 sps:$4 sm:$0xff]  }
  0x74   :  { %1834 = vmatpush1.bf16.msra.mxu1 %v3196_v57  ;;  %v3280_v57 = vld [vmem:[#allocation2 + $0x2c8] ss:$16 sps:$4 sm:$0xff]  }
  0x75   :  { %1752 = vmatpush1.bf16.msra.mxu0 %v3193_v56  ;;  %1835 = vmatprep.subr.bf16.mxu1 %v3204_v59  ;;  %v3277_v56 = vld [vmem:[#allocation2 + $0x6c0] ss:$16 sps:$4 sm:$0xff]   ;;  %v3288_v59 = vld [vmem:[#allocation2 + $0x2ec] ss:$16 sps:$4 sm:$0xff]  }
  0x76   :  { %1753 = vmatprep.subr.bf16.mxu0 %v3201_v58  ;;  %v3285_v58 = vld [vmem:[#allocation2 + $0x6e4] ss:$16 sps:$4 sm:$0xff]  }
  0x78   :  { %1836 = vmatpush1.bf16.msra.mxu1 %v3202_v61  ;;  %v3286_v61 = vld [vmem:[#allocation2 + $0x2e8] ss:$16 sps:$4 sm:$0xff]  }
  0x79   :  { %1754 = vmatpush1.bf16.msra.mxu0 %v3199_v60  ;;  %1837 = vmatprep.subr.bf16.mxu1 %v3210_v63  ;;  %v3283_v60 = vld [vmem:[#allocation2 + $0x6e0] ss:$16 sps:$4 sm:$0xff]   ;;  %v3294_v63 = vld [vmem:[#allocation2 + $0x30c] ss:$16 sps:$4 sm:$0xff]  }
  0x7a   :  { %1755 = vmatprep.subr.bf16.mxu0 %v3207_v62  ;;  %v3291_v62 = vld [vmem:[#allocation2 + $0x704] ss:$16 sps:$4 sm:$0xff]  }
  0x7c   :  { %1838 = vmatpush1.bf16.msra.mxu1 %v3208_v1  ;;  %v3292_v1 = vld [vmem:[#allocation2 + $0x308] ss:$16 sps:$4 sm:$0xff]  }
  0x7d   :  { %1756 = vmatpush1.bf16.msra.mxu0 %v3205_v0  ;;  %1839 = vmatprep.subr.bf16.mxu1 %v3216_v4  ;;  %v3289_v0 = vld [vmem:[#allocation2 + $0x700] ss:$16 sps:$4 sm:$0xff]   ;;  %v3300_v4 = vld [vmem:[#allocation2 + $0x32c] ss:$16 sps:$4 sm:$0xff]  }
  0x7e   :  { %1757 = vmatprep.subr.bf16.mxu0 %v3213_v2  ;;  %v3297_v2 = vld [vmem:[#allocation2 + $0x724] ss:$16 sps:$4 sm:$0xff]  }
  0x80   :  { %1840 = vmatpush1.bf16.msra.mxu1 %v3214_v6  ;;  %v3298_v6 = vld [vmem:[#allocation2 + $0x328] ss:$16 sps:$4 sm:$0xff]  }
  0x81   :  { %1758 = vmatpush1.bf16.msra.mxu0 %v3211_v5  ;;  %1841 = vmatprep.subr.bf16.mxu1 %v3222_v8  ;;  %v3295_v5 = vld [vmem:[#allocation2 + $0x720] ss:$16 sps:$4 sm:$0xff]   ;;  %v3306_v8 = vld [vmem:[#allocation2 + $0x34c] ss:$16 sps:$4 sm:$0xff]  }
  0x82   :  { %1759 = vmatprep.subr.bf16.mxu0 %v3219_v7  ;;  %v3303_v7 = vld [vmem:[#allocation2 + $0x744] ss:$16 sps:$4 sm:$0xff]  }
  0x84   :  { %1842 = vmatpush1.bf16.msra.mxu1 %v3220_v10  ;;  %v3304_v10 = vld [vmem:[#allocation2 + $0x348] ss:$16 sps:$4 sm:$0xff]  }
  0x85   :  { %1760 = vmatpush1.bf16.msra.mxu0 %v3217_v9  ;;  %1843 = vmatprep.subr.bf16.mxu1 %v3228_v12  ;;  %v3301_v9 = vld [vmem:[#allocation2 + $0x740] ss:$16 sps:$4 sm:$0xff]   ;;  %v3312_v12 = vld [vmem:[#allocation2 + $0x36c] ss:$16 sps:$4 sm:$0xff]  }
  0x86   :  { %1761 = vmatprep.subr.bf16.mxu0 %v3225_v11  ;;  %v3309_v11 = vld [vmem:[#allocation2 + $0x764] ss:$16 sps:$4 sm:$0xff]  }
  0x88   :  { %1844 = vmatpush1.bf16.msra.mxu1 %v3226_v14  ;;  %v3310_v14 = vld [vmem:[#allocation2 + $0x368] ss:$16 sps:$4 sm:$0xff]  }
  0x89   :  { %1762 = vmatpush1.bf16.msra.mxu0 %v3223_v13  ;;  %1845 = vmatprep.subr.bf16.mxu1 %v3234_v17  ;;  %v3307_v13 = vld [vmem:[#allocation2 + $0x760] ss:$16 sps:$4 sm:$0xff]   ;;  %v3318_v17 = vld [vmem:[#allocation2 + $0x38c] ss:$16 sps:$4 sm:$0xff]  }
  0x8a   :  { %1763 = vmatprep.subr.bf16.mxu0 %v3231_v15  ;;  %v3315_v15 = vld [vmem:[#allocation2 + $0x784] ss:$16 sps:$4 sm:$0xff]  }
  0x8c   :  { %1846 = vmatpush1.bf16.msra.mxu1 %v3232_v21  ;;  %v3321_v21 = vld [vmem:[#allocation2 + $0x7a4] ss:$16 sps:$4 sm:$0xff]  }
  0x8d   :  { %1764 = vmatpush1.bf16.msra.mxu0 %v3229_v20  ;;  %1847 = vmatprep.subr.bf16.mxu1 %v3240_v23  ;;  %v3316_v20 = vld [vmem:[#allocation2 + $0x388] ss:$16 sps:$4 sm:$0xff]   ;;  %v3319_v23 = vld [vmem:[#allocation2 + $0x7a0] ss:$16 sps:$4 sm:$0xff]  }
  0x8e   :  { %1765 = vmatprep.subr.bf16.mxu0 %v3237_v22  ;;  %v3324_v22 = vld [vmem:[#allocation2 + $0x3ac] ss:$16 sps:$4 sm:$0xff]  }
  0x90   :  { %1848 = vmatpush1.bf16.msra.mxu1 %v3238_v26  ;;  %v3327_v26 = vld [vmem:[#allocation2 + $0x7c4] ss:$16 sps:$4 sm:$0xff]  }
  0x91   :  { %1766 = vmatpush1.bf16.msra.mxu0 %v3235_v25  ;;  %1858 = vmatprep.subr.bf16.mxu1 %v3246_v28  ;;  %v3322_v25 = vld [vmem:[#allocation2 + $0x3a8] ss:$16 sps:$4 sm:$0xff]   ;;  %v3325_v28 = vld [vmem:[#allocation2 + $0x7c0] ss:$16 sps:$4 sm:$0xff]  }
  0x92   :  { %1776 = vmatprep.subr.bf16.mxu0 %v3243_v27  ;;  %v3330_v27 = vld [vmem:[#allocation2 + $0x3cc] ss:$16 sps:$4 sm:$0xff]  }
  0x93   :  { %1850 = vmatmul.mubr.bf16.vlgmr.msra.gmra.mrb[4].mxu1 %v3639_v16  ;;  %v3264_v16 = vld [vmem:[#allocation2 + $0x26c] ss:$16 sps:$4 sm:$0xff]  }
  0x94   :  { %1768 = vmatmul.mubr.bf16.vlgmr.msra.gmra.mrb[0].mxu0 %v3668_v30  ;;  %1859 = vmatpush1.bf16.msra.mxu1 %v3244_v49  ;;  %v3336_v49 = vld [vmem:[#allocation2 + $0x3ec] ss:$16 sps:$4 sm:$0xff]  }
  0x95   :  { %1777 = vmatpush1.bf16.msra.mxu0 %v3241_v31  ;;  %1860 = vmatprep.subr.bf16.mxu1 %v3252_v33  ;;  %v3333_v31 = vld [vmem:[#allocation2 + $0x7e4] ss:$16 sps:$4 sm:$0xff]   ;;  %v3334_v33 = vld [vmem:[#allocation2 + $0x3e8] ss:$16 sps:$4 sm:$0xff]  }
  0x96   :  { %1778 = vmatprep.subr.bf16.mxu0 %v3249_v32  ;;  %1808 = vmatprep.mubr.bf16.mxu0 %v3670_v34  ;;  %v3331_v32 = vld [vmem:[#allocation2 + $0x7e0] ss:$16 sps:$4 sm:$0xff]  }
  0x97   :  { %1890 = vmatprep.mubr.bf16.mxu1 %v3636_v3  ;;  %v3268_v3 = vld [vmem:[#allocation2 + $0x288] ss:$16 sps:$4 sm:$0xff]  }
  0x98   :  { %1861 = vmatpush1.bf16.msra.mxu1 %v3250_v36  ;;  %v3338_v36 = vld [vmem:[#allocation2 + $0x408] ss:$16 sps:$4 sm:$0xff]  }
  0x99   :  { %1779 = vmatpush1.bf16.msra.mxu0 %v3247_v35  ;;  %1862 = vmatprep.subr.bf16.mxu1 %v3258_v38  ;;  %v3340_v35 = vld [vmem:[#allocation2 + $0x40c] ss:$16 sps:$4 sm:$0xff]  }
  0x9a   :  { %1780 = vmatprep.subr.bf16.mxu0 %v3255_v37  ;;  %v3678_v37 = vpack.c.bf16 %v3662_v24, %v3662_v24  ;;  %v3343_v38 = vld [vmem:[#allocation2 + $0x42c] ss:$16 sps:$4 sm:$0xff]  }
  0x9b   :  { %v3439_v24 = vld [vmem:[%s3959_s3 + $0x14] ss:$8 sps:$4 sm:$0xff]  }
  0x9c   :  { %1863 = vmatpush1.bf16.msra.mxu1 %v3256_v40  ;;  %v3436_v40 = vld [vmem:[%s3959_s3 + $0x4] ss:$8 sps:$4 sm:$0xff]  }
  0x9d   :  { %1781 = vmatpush1.bf16.msra.mxu0 %v3253_v39  ;;  %1864 = vmatprep.subr.bf16.mxu1 %v3264_v16  ;;  %v3434_v39 = vld [vmem:[%s3959_s3] ss:$8 sps:$4 sm:$0xff]   ;;  %v3346_v16 = vld [vmem:[#allocation2 + $0x44c] ss:$16 sps:$4 sm:$0xff]  }
  0x9e   :  { %1782 = vmatprep.subr.bf16.mxu0 %v3261_v41  ;;  %v3341_v41 = vld [vmem:[#allocation2 + $0x428] ss:$16 sps:$4 sm:$0xff]  }
  0xa0   :  { %1865 = vmatpush1.bf16.msra.mxu1 %v3262_v44  ;;  %v3344_v44 = vld [vmem:[#allocation2 + $0x448] ss:$16 sps:$4 sm:$0xff]  }
  0xa1   :  { %1783 = vmatpush1.bf16.msra.mxu0 %v3259_v42  ;;  %1866 = vmatprep.subr.bf16.mxu1 %v3270_v46  ;;  %v3442_v42 = vld [vmem:[%s3959_s3 + $0x24] ss:$8 sps:$4 sm:$0xff]   ;;  %v3347_v46 = vld [vmem:[#allocation2 + $0x468] ss:$16 sps:$4 sm:$0xff]  }
  0xa2   :  { %1784 = vmatprep.subr.bf16.mxu0 %v3267_v45  ;;  %v3440_v45 = vld [vmem:[%s3959_s3 + $0x20] ss:$8 sps:$4 sm:$0xff]  }
  0xa4   :  { %1867 = vmatpush1.bf16.msra.mxu1 %v3268_v3  ;;  %v3445_v3 = vld [vmem:[%s3959_s3 + $0x34] ss:$8 sps:$4 sm:$0xff]  }
  0xa5   :  { %1785 = vmatpush1.bf16.msra.mxu0 %v3265_v47  ;;  %1868 = vmatprep.subr.bf16.mxu1 %v3276_v50  ;;  %v3352_v47 = vld [vmem:[#allocation2 + $0x48c] ss:$16 sps:$4 sm:$0xff]  }
  0xa6   :  { %1786 = vmatprep.subr.bf16.mxu0 %v3273_v48  ;;  %v3443_v48 = vld [vmem:[%s3959_s3 + $0x30] ss:$8 sps:$4 sm:$0xff]   ;;  %v3448_v50 = vld [vmem:[%s3959_s3 + $0x44] ss:$8 sps:$4 sm:$0xff]  }
  0xa8   :  { %1869 = vmatpush1.bf16.msra.mxu1 %v3274_v53  ;;  %v3355_v53 = vld [vmem:[#allocation2 + $0x4ac] ss:$16 sps:$4 sm:$0xff]  }
  0xa9   :  { %1787 = vmatpush1.bf16.msra.mxu0 %v3271_v52  ;;  %1870 = vmatprep.subr.bf16.mxu1 %v3282_v55  ;;  %v3350_v52 = vld [vmem:[#allocation2 + $0x488] ss:$16 sps:$4 sm:$0xff]   ;;  %v3451_v55 = vld [vmem:[%s3959_s3 + $0x54] ss:$8 sps:$4 sm:$0xff]  }
  0xaa   :  { %1788 = vmatprep.subr.bf16.mxu0 %v3279_v54  ;;  %v3446_v54 = vld [vmem:[%s3959_s3 + $0x40] ss:$8 sps:$4 sm:$0xff]  }
  0xac   :  { %1871 = vmatpush1.bf16.msra.mxu1 %v3280_v57  ;;  %v3358_v57 = vld [vmem:[#allocation2 + $0x4cc] ss:$16 sps:$4 sm:$0xff]  }
  0xad   :  { %1789 = vmatpush1.bf16.msra.mxu0 %v3277_v56  ;;  %1872 = vmatprep.subr.bf16.mxu1 %v3288_v59  ;;  %v3353_v56 = vld [vmem:[#allocation2 + $0x4a8] ss:$16 sps:$4 sm:$0xff]   ;;  %v3454_v59 = vld [vmem:[%s3959_s3 + $0x64] ss:$8 sps:$4 sm:$0xff]  }
  0xae   :  { %1790 = vmatprep.subr.bf16.mxu0 %v3285_v58  ;;  %v3449_v58 = vld [vmem:[%s3959_s3 + $0x50] ss:$8 sps:$4 sm:$0xff]  }
  0xb0   :  { %1873 = vmatpush1.bf16.msra.mxu1 %v3286_v61  ;;  %v3361_v61 = vld [vmem:[#allocation2 + $0x4ec] ss:$16 sps:$4 sm:$0xff]  }
  0xb1   :  { %1791 = vmatpush1.bf16.msra.mxu0 %v3283_v60  ;;  %1874 = vmatprep.subr.bf16.mxu1 %v3294_v63  ;;  %v3356_v60 = vld [vmem:[#allocation2 + $0x4c8] ss:$16 sps:$4 sm:$0xff]   ;;  %v3457_v63 = vld [vmem:[%s3959_s3 + $0x74] ss:$8 sps:$4 sm:$0xff]  }
  0xb2   :  { %1792 = vmatprep.subr.bf16.mxu0 %v3291_v62  ;;  %v3452_v62 = vld [vmem:[%s3959_s3 + $0x60] ss:$8 sps:$4 sm:$0xff]  }
  0xb4   :  { %1875 = vmatpush1.bf16.msra.mxu1 %v3292_v1  ;;  %v3364_v1 = vld [vmem:[#allocation2 + $0x50c] ss:$16 sps:$4 sm:$0xff]  }
  0xb5   :  { %1793 = vmatpush1.bf16.msra.mxu0 %v3289_v0  ;;  %1876 = vmatprep.subr.bf16.mxu1 %v3300_v4  ;;  %v3359_v0 = vld [vmem:[#allocation2 + $0x4e8] ss:$16 sps:$4 sm:$0xff]   ;;  %v3460_v4 = vld [vmem:[%s3959_s3 + $0x84] ss:$8 sps:$4 sm:$0xff]  }
  0xb6   :  { %1794 = vmatprep.subr.bf16.mxu0 %v3297_v2  ;;  %v3455_v2 = vld [vmem:[%s3959_s3 + $0x70] ss:$8 sps:$4 sm:$0xff]  }
  0xb8   :  { %1877 = vmatpush1.bf16.msra.mxu1 %v3298_v6  ;;  %v3367_v6 = vld [vmem:[#allocation2 + $0x52c] ss:$16 sps:$4 sm:$0xff]  }
  0xb9   :  { %1795 = vmatpush1.bf16.msra.mxu0 %v3295_v5  ;;  %1878 = vmatprep.subr.bf16.mxu1 %v3306_v8  ;;  %v3362_v5 = vld [vmem:[#allocation2 + $0x508] ss:$16 sps:$4 sm:$0xff]   ;;  %v3463_v8 = vld [vmem:[%s3959_s3 + $0x94] ss:$8 sps:$4 sm:$0xff]  }
  0xba   :  { %1796 = vmatprep.subr.bf16.mxu0 %v3303_v7  ;;  %v3458_v7 = vld [vmem:[%s3959_s3 + $0x80] ss:$8 sps:$4 sm:$0xff]  }
  0xbc   :  { %1879 = vmatpush1.bf16.msra.mxu1 %v3304_v10  ;;  %v3370_v10 = vld [vmem:[#allocation2 + $0x54c] ss:$16 sps:$4 sm:$0xff]  }
  0xbd   :  { %1797 = vmatpush1.bf16.msra.mxu0 %v3301_v9  ;;  %1880 = vmatprep.subr.bf16.mxu1 %v3312_v12  ;;  %v3365_v9 = vld [vmem:[#allocation2 + $0x528] ss:$16 sps:$4 sm:$0xff]   ;;  %v3466_v12 = vld [vmem:[%s3959_s3 + $0xa4] ss:$8 sps:$4 sm:$0xff]  }
  0xbe   :  { %1798 = vmatprep.subr.bf16.mxu0 %v3309_v11  ;;  %v3461_v11 = vld [vmem:[%s3959_s3 + $0x90] ss:$8 sps:$4 sm:$0xff]  }
  0xc0   :  { %1881 = vmatpush1.bf16.msra.mxu1 %v3310_v14  ;;  %v3373_v14 = vld [vmem:[#allocation2 + $0x56c] ss:$16 sps:$4 sm:$0xff]  }
  0xc1   :  { %1799 = vmatpush1.bf16.msra.mxu0 %v3307_v13  ;;  %1882 = vmatprep.subr.bf16.mxu1 %v3318_v17  ;;  %v3368_v13 = vld [vmem:[#allocation2 + $0x548] ss:$16 sps:$4 sm:$0xff]   ;;  %v3469_v17 = vld [vmem:[%s3959_s3 + $0xb4] ss:$8 sps:$4 sm:$0xff]  }
  0xc2   :  { %1800 = vmatprep.subr.bf16.mxu0 %v3315_v15  ;;  %v3464_v15 = vld [vmem:[%s3959_s3 + $0xa0] ss:$8 sps:$4 sm:$0xff]  }
  0xc4   :  { %1883 = vmatpush1.bf16.msra.mxu1 %v3316_v20  ;;  %v3376_v20 = vld [vmem:[#allocation2 + $0x58c] ss:$16 sps:$4 sm:$0xff]  }
  0xc5   :  { %1801 = vmatpush1.bf16.msra.mxu0 %v3313_v19  ;;  %1884 = vmatprep.subr.bf16.mxu1 %v3324_v22  ;;  %v3371_v19 = vld [vmem:[#allocation2 + $0x568] ss:$16 sps:$4 sm:$0xff]   ;;  %v3472_v22 = vld [vmem:[%s3959_s3 + $0xc4] ss:$8 sps:$4 sm:$0xff]  }
  0xc6   :  { %1802 = vmatprep.subr.bf16.mxu0 %v3321_v21  ;;  %v3467_v21 = vld [vmem:[%s3959_s3 + $0xb0] ss:$8 sps:$4 sm:$0xff]  }
  0xc8   :  { %1885 = vmatpush1.bf16.msra.mxu1 %v3322_v25  ;;  %v3379_v25 = vld [vmem:[#allocation2 + $0x5ac] ss:$16 sps:$4 sm:$0xff]  }
  0xc9   :  { %1803 = vmatpush1.bf16.msra.mxu0 %v3319_v23  ;;  %1886 = vmatprep.subr.bf16.mxu1 %v3330_v27  ;;  %v3374_v23 = vld [vmem:[#allocation2 + $0x588] ss:$16 sps:$4 sm:$0xff]   ;;  %v3475_v27 = vld [vmem:[%s3959_s3 + $0xd4] ss:$8 sps:$4 sm:$0xff]  }
  0xca   :  { %1804 = vmatprep.subr.bf16.mxu0 %v3327_v26  ;;  %v3470_v26 = vld [vmem:[%s3959_s3 + $0xc0] ss:$8 sps:$4 sm:$0xff]  }
  0xcc   :  { %1887 = vmatpush1.bf16.msra.mxu1 %v3328_v29  ;;  %v3382_v29 = vld [vmem:[#allocation2 + $0x5cc] ss:$16 sps:$4 sm:$0xff]  }
  0xcd   :  { %1805 = vmatpush1.bf16.msra.mxu0 %v3325_v28  ;;  %1888 = vmatprep.subr.bf16.mxu1 %v3336_v49  ;;  %v3377_v28 = vld [vmem:[#allocation2 + $0x5a8] ss:$16 sps:$4 sm:$0xff]  }
  0xce   :  { %1806 = vmatprep.subr.bf16.mxu0 %v3333_v31  ;;  %v3473_v31 = vld [vmem:[%s3959_s3 + $0xd0] ss:$8 sps:$4 sm:$0xff]  }
  0xcf   :  { %v3380_v49 = vld [vmem:[#allocation2 + $0x5c8] ss:$16 sps:$4 sm:$0xff]  }
  0xd0   :  { %1889 = vmatpush1.bf16.msra.mxu1 %v3334_v33  ;;  %v3383_v33 = vld [vmem:[#allocation2 + $0x5e8] ss:$16 sps:$4 sm:$0xff]  }
  0xd1   :  { %1807 = vmatpush1.bf16.msra.mxu0 %v3331_v32  ;;  %1899 = vmatprep.subr.bf16.mxu1 %v3340_v35  ;;  %v3385_v32 = vld [vmem:[#allocation2 + $0x5ec] ss:$16 sps:$4 sm:$0xff]  }
  0xd2   :  { %2385 = vmatprep.subr.bf16.mxu0 %v3436_v40  ;;  %v3388_v35 = vld [vmem:[#allocation2 + $0x60c] ss:$16 sps:$4 sm:$0xff]  }
  0xd3   :  { %1891 = vmatmul.mubr.bf16.vlgmr.msra.gmra.mrb[4].mxu1 %v3641_v18  ;;  %v3437_v18 = vld [vmem:[%s3959_s3 + $0x10] ss:$8 sps:$4 sm:$0xff]   ;;  %v3394_v40 = vld [vmem:[#allocation2 + $0x64c] ss:$16 sps:$4 sm:$0xff]  }
  0xd4   :  { %1809 = vmatmul.mubr.bf16.vlgmr.msra.gmra.mrb[0].mxu0 %v3678_v37  ;;  %1900 = vmatpush1.bf16.msra.mxu1 %v3338_v36  ;;  %v3386_v36 = vld [vmem:[#allocation2 + $0x608] ss:$16 sps:$4 sm:$0xff]  }
  0xd5   :  { %1931 = vmatprep.mubr.bf16.mxu1 %v3656_v51  ;;  %1901 = vmatprep.subr.bf16.mxu1 %v3343_v38  ;;  %v3349_v51 = vld [vmem:[#allocation2 + $0x46c] ss:$16 sps:$4 sm:$0xff]  }
  0xd6   :  { %2386 = vmatpush1.bf16.msra.mxu0 %v3434_v39  ;;  %v3391_v38 = vld [vmem:[#allocation2 + $0x62c] ss:$16 sps:$4 sm:$0xff]   ;;  %v3389_v39 = vld [vmem:[#allocation2 + $0x628] ss:$16 sps:$4 sm:$0xff]  }
  0xd7   :  { %2387 = vmatprep.subr.bf16.mxu0 %v3439_v24  ;;  %v3397_v24 = vld [vmem:[#allocation2 + $0x66c] ss:$16 sps:$4 sm:$0xff]  }
  0xd8   :  { %1902 = vmatpush1.bf16.msra.mxu1 %v3341_v41  ;;  %v3392_v41 = vld [vmem:[#allocation2 + $0x648] ss:$16 sps:$4 sm:$0xff]  }
  0xd9   :  { %1903 = vmatprep.subr.bf16.mxu1 %v3346_v16  ;;  %v3395_v16 = vld [vmem:[#allocation2 + $0x668] ss:$16 sps:$4 sm:$0xff]  }
  0xda   :  { %2388 = vmatpush1.bf16.msra.mxu0 %v3437_v18  ;;  %v3400_v18 = vld [vmem:[#allocation2 + $0x68c] ss:$16 sps:$4 sm:$0xff]  }
  0xdb   :  { %2389 = vmatprep.subr.bf16.mxu0 %v3442_v42  ;;  %v3398_v42 = vld [vmem:[#allocation2 + $0x688] ss:$16 sps:$4 sm:$0xff]  }
  0xdc   :  { %1904 = vmatpush1.bf16.msra.mxu1 %v3344_v44  ;;  %v3403_v44 = vld [vmem:[#allocation2 + $0x6ac] ss:$16 sps:$4 sm:$0xff]  }
  0xdd   :  { %1905 = vmatprep.subr.bf16.mxu1 %v3349_v51  ;;  %v3406_v51 = vld [vmem:[#allocation2 + $0x6cc] ss:$16 sps:$4 sm:$0xff]  }
  0xde   :  { %2390 = vmatpush1.bf16.msra.mxu0 %v3440_v45 }
  0xdf   :  { %2391 = vmatprep.subr.bf16.mxu0 %v3445_v3 }
  0xe0   :  { %1906 = vmatpush1.bf16.msra.mxu1 %v3347_v46  ;;  %v3476_v46 = vld [vmem:[%s3959_s3 + $0xe0] ss:$8 sps:$4 sm:$0xff]  }
  0xe1   :  { %1907 = vmatprep.subr.bf16.mxu1 %v3352_v47 }
  0xe2   :  { %2392 = vmatpush1.bf16.msra.mxu0 %v3443_v48  ;;  %v3404_v48 = vld [vmem:[#allocation2 + $0x6c8] ss:$16 sps:$4 sm:$0xff]  }
  0xe3   :  { %2393 = vmatprep.subr.bf16.mxu0 %v3448_v50 }
  0xe4   :  { %1908 = vmatpush1.bf16.msra.mxu1 %v3350_v52  ;;  %v3409_v52 = vld [vmem:[#allocation2 + $0x6ec] ss:$16 sps:$4 sm:$0xff]  }
  0xe5   :  { %1909 = vmatprep.subr.bf16.mxu1 %v3355_v53  ;;  %v3481_v53 = vld [vmem:[%s3959_s3 + $0xf4] ss:$8 sps:$4 sm:$0xff]  }
  0xe6   :  { %2394 = vmatpush1.bf16.msra.mxu0 %v3446_v54  ;;  %v3479_v54 = vld [vmem:[%s3959_s3 + $0xf0] ss:$8 sps:$4 sm:$0xff]  }
  0xe7   :  { %2395 = vmatprep.subr.bf16.mxu0 %v3451_v55  ;;  %v3407_v55 = vld [vmem:[#allocation2 + $0x6e8] ss:$16 sps:$4 sm:$0xff]  }
  0xe8   :  { %1910 = vmatpush1.bf16.msra.mxu1 %v3353_v56  ;;  %v3412_v56 = vld [vmem:[#allocation2 + $0x70c] ss:$16 sps:$4 sm:$0xff]  }
  0xe9   :  { %1911 = vmatprep.subr.bf16.mxu1 %v3358_v57  ;;  %v3484_v57 = vld [vmem:[%s3959_s3 + $0x104] ss:$8 sps:$4 sm:$0xff]  }
  0xea   :  { %2396 = vmatpush1.bf16.msra.mxu0 %v3449_v58  ;;  %v3410_v58 = vld [vmem:[#allocation2 + $0x708] ss:$16 sps:$4 sm:$0xff]  }
  0xeb   :  { %2397 = vmatprep.subr.bf16.mxu0 %v3454_v59  ;;  %v3415_v59 = vld [vmem:[#allocation2 + $0x72c] ss:$16 sps:$4 sm:$0xff]  }
  0xec   :  { %1912 = vmatpush1.bf16.msra.mxu1 %v3356_v60  ;;  %v3413_v60 = vld [vmem:[#allocation2 + $0x728] ss:$16 sps:$4 sm:$0xff]  }
  0xed   :  { %1913 = vmatprep.subr.bf16.mxu1 %v3361_v61  ;;  %v3418_v61 = vld [vmem:[#allocation2 + $0x74c] ss:$16 sps:$4 sm:$0xff]  }
  0xee   :  { %2398 = vmatpush1.bf16.msra.mxu0 %v3452_v62  ;;  %v3416_v62 = vld [vmem:[#allocation2 + $0x748] ss:$16 sps:$4 sm:$0xff]  }
  0xef   :  { %2399 = vmatprep.subr.bf16.mxu0 %v3457_v63  ;;  %v3421_v63 = vld [vmem:[#allocation2 + $0x76c] ss:$16 sps:$4 sm:$0xff]  }
  0xf0   :  { %1914 = vmatpush1.bf16.msra.mxu1 %v3359_v0  ;;  %v3419_v0 = vld [vmem:[#allocation2 + $0x768] ss:$16 sps:$4 sm:$0xff]  }
  0xf1   :  { %1915 = vmatprep.subr.bf16.mxu1 %v3364_v1  ;;  %v3424_v1 = vld [vmem:[#allocation2 + $0x78c] ss:$16 sps:$4 sm:$0xff]  }
  0xf2   :  { %2400 = vmatpush1.bf16.msra.mxu0 %v3455_v2  ;;  %v3422_v2 = vld [vmem:[#allocation2 + $0x788] ss:$16 sps:$4 sm:$0xff]  }
  0xf3   :  { %2401 = vmatprep.subr.bf16.mxu0 %v3460_v4  ;;  %v3427_v4 = vld [vmem:[#allocation2 + $0x7ac] ss:$16 sps:$4 sm:$0xff]  }
  0xf4   :  { %1916 = vmatpush1.bf16.msra.mxu1 %v3362_v5  ;;  %v3425_v5 = vld [vmem:[#allocation2 + $0x7a8] ss:$16 sps:$4 sm:$0xff]  }
  0xf5   :  { %1917 = vmatprep.subr.bf16.mxu1 %v3367_v6  ;;  %v3430_v6 = vld [vmem:[#allocation2 + $0x7cc] ss:$16 sps:$4 sm:$0xff]  }
  0xf6   :  { %2402 = vmatpush1.bf16.msra.mxu0 %v3458_v7  ;;  %v3428_v7 = vld [vmem:[#allocation2 + $0x7c8] ss:$16 sps:$4 sm:$0xff]  }
  0xf7   :  { %2403 = vmatprep.subr.bf16.mxu0 %v3463_v8  ;;  %v3433_v8 = vld [vmem:[#allocation2 + $0x7ec] ss:$16 sps:$4 sm:$0xff]  }
  0xf8   :  { %1918 = vmatpush1.bf16.msra.mxu1 %v3365_v9  ;;  %v3431_v9 = vld [vmem:[#allocation2 + $0x7e8] ss:$16 sps:$4 sm:$0xff]  }
  0xf9   :  { %1919 = vmatprep.subr.bf16.mxu1 %v3370_v10  ;;  %v355_v10 = vsub.s32 0, %v3626_v43 }
  0xfa   :  { %2404 = vmatpush1.bf16.msra.mxu0 %v3461_v11  ;;  %v3789_v11 = vld [vmem:[%s3958_s2] sm:$0xf] }
  0xfb   :  { %2405 = vmatprep.subr.bf16.mxu0 %v3466_v12  ;;  %v359_v12 = vsub.s32 1, %v3626_v43 }
  0xfc   :  { %1920 = vmatpush1.bf16.msra.mxu1 %v3368_v13  ;;  %v356_v13 = vrot.slane %v3789_v11, %v355_v10 }
  0xfd   :  { %1921 = vmatprep.subr.bf16.mxu1 %v3373_v14  ;;  %v360_v14 = vrot.slane %v3789_v11, %v359_v12 }
  0xfe   :  { %2406 = vmatpush1.bf16.msra.mxu0 %v3464_v15 }
  0xff   :  { %2407 = vmatprep.subr.bf16.mxu0 %v3469_v17 }
 0x100   :  { %1922 = vmatpush1.bf16.msra.mxu1 %v3371_v19 }
 0x101   :  { %1923 = vmatprep.subr.bf16.mxu1 %v3376_v20 }
 0x102   :  { %2408 = vmatpush1.bf16.msra.mxu0 %v3467_v21 }
 0x103   :  { %2409 = vmatprep.subr.bf16.mxu0 %v3472_v22 }
 0x104   :  { %1924 = vmatpush1.bf16.msra.mxu1 %v3374_v23 }
 0x105   :  { %1925 = vmatprep.subr.bf16.mxu1 %v3379_v25 }
 0x106   :  { %2410 = vmatpush1.bf16.msra.mxu0 %v3470_v26 }
 0x107   :  { %2411 = vmatprep.subr.bf16.mxu0 %v3475_v27 }
 0x108   :  { %1926 = vmatpush1.bf16.msra.mxu1 %v3377_v28  ;;  %v3482_v28 = vld [vmem:[%s3959_s3 + $0x100] ss:$8 sps:$4 sm:$0xff]  }
 0x109   :  { %1927 = vmatprep.subr.bf16.mxu1 %v3382_v29 }
 0x10a   :  { %2412 = vmatpush1.bf16.msra.mxu0 %v3473_v31  ;;  %v3487_v31 = vld [vmem:[%s3959_s3 + $0x114] ss:$8 sps:$4 sm:$0xff]  }
 0x10c   :  { %1928 = vmatpush1.bf16.msra.mxu1 %v3380_v49  ;;  %v3530_v49 = vld [vmem:[%s3961_s5 + $0x40] sm:$0xff]  }
 0x10d   :  { %1929 = vmatprep.subr.bf16.mxu1 %v3385_v32  ;;  %v3531_v32 = vld [vmem:[%s3961_s5] sm:$0xff]  }
 0x110   :  { %1930 = vmatpush1.bf16.msra.mxu1 %v3383_v33  ;;  %v3532_v33 = vld [vmem:[%s3961_s5 + $0x48] sm:$0xff]  }
 0x111   :  { %1940 = vmatprep.subr.bf16.mxu1 %v3388_v35  ;;  %v3485_v35 = vld [vmem:[%s3959_s3 + $0x110] ss:$8 sps:$4 sm:$0xff]  }
 0x113   :  { %1932 = vmatmul.mubr.bf16.vlgmr.msra.gmra.mrb[4].mxu1 %v3668_v30  ;;  %v3401_v30 = vld [vmem:[#allocation2 + $0x6a8] ss:$16 sps:$4 sm:$0xff]  }
 0x114   :  { %1941 = vmatpush1.bf16.msra.mxu1 %v3386_v36  ;;  %1972 = vmatprep.mubr.bf16.mxu1 %v3670_v34  ;;  %v3478_v34 = vld [vmem:[%s3959_s3 + $0xe4] ss:$8 sps:$4 sm:$0xff]  }
 0x115   :  { %1942 = vmatprep.subr.bf16.mxu1 %v3391_v38  ;;  %2413 = vmatprep.subr.bf16.mxu0 %v3478_v34  ;;  %v3490_v36 = vld [vmem:[%s3959_s3 + $0x124] ss:$8 sps:$4 sm:$0xff]   ;;  %v3499_v34 = vld [vmem:[%s3959_s3 + $0x154] ss:$8 sps:$4 sm:$0xff]  }
 0x116   :  { %2414 = vmatpush1.bf16.msra.mxu0 %v3476_v46  ;;  %v3533_v38 = vld [vmem:[%s3961_s5 + $0x8] sm:$0xff]  }
 0x117   :  { %2415 = vmatprep.subr.bf16.mxu0 %v3481_v53  ;;  %v3540_v46 = vld [vmem:[%s3961_s5 + $0x68] sm:$0xff]   ;;  %v3503_v53 = vld [vmem:[%s3959_s3 + $0x170] ss:$8 sps:$4 sm:$0xff]  }
 0x118   :  { %1943 = vmatpush1.bf16.msra.mxu1 %v3389_v39  ;;  %v3534_v39 = vld [vmem:[%s3961_s5 + $0x50] sm:$0xff]  }
 0x119   :  { %1944 = vmatprep.subr.bf16.mxu1 %v3394_v40  ;;  %v3488_v40 = vld [vmem:[%s3959_s3 + $0x120] ss:$8 sps:$4 sm:$0xff]  }
 0x11a   :  { %2416 = vmatpush1.bf16.msra.mxu0 %v3479_v54  ;;  %v3508_v54 = vld [vmem:[%s3959_s3 + $0x184] ss:$8 sps:$4 sm:$0xff]  }
 0x11b   :  { %2426 = vmatprep.subr.bf16.mxu0 %v3484_v57  ;;  %v3509_v57 = vld [vmem:[%s3959_s3 + $0x190] ss:$8 sps:$4 sm:$0xff]  }
 0x11c   :  { %1945 = vmatpush1.bf16.msra.mxu1 %v3392_v41  ;;  %v3493_v41 = vld [vmem:[%s3959_s3 + $0x134] ss:$8 sps:$4 sm:$0xff]  }
 0x11d   :  { %1946 = vmatprep.subr.bf16.mxu1 %v3397_v24  ;;  %v3535_v24 = vld [vmem:[%s3961_s5 + $0x10] sm:$0xff]  }
 0x120   :  { %1947 = vmatpush1.bf16.msra.mxu1 %v3395_v16  ;;  %v3536_v16 = vld [vmem:[%s3961_s5 + $0x58] sm:$0xff]  }
 0x121   :  { %1948 = vmatprep.subr.bf16.mxu1 %v3400_v18  ;;  %v3491_v18 = vld [vmem:[%s3959_s3 + $0x130] ss:$8 sps:$4 sm:$0xff]  }
 0x124   :  { %1949 = vmatpush1.bf16.msra.mxu1 %v3398_v42  ;;  %v3496_v42 = vld [vmem:[%s3959_s3 + $0x144] ss:$8 sps:$4 sm:$0xff]  }
 0x125   :  { %1950 = vmatprep.subr.bf16.mxu1 %v3403_v44  ;;  %v3537_v44 = vld [vmem:[%s3961_s5 + $0x18] sm:$0xff]  }
 0x126   :  { %v1687_v45 = vpop.f32.mrb[0].mxu1 }
 0x127   :  { %v1689_v47 = vpop.f32.mrb[1].mxu1  ;;  %v1688_v15 = vadd.f32 %v1687_v45, %v356_v13  ;;  %v3539_v45 = vld [vmem:[%s3961_s5 + $0x20] sm:$0xff]  }
 0x128   :  { %v1691_v3 = vpop.f32.mrb[2].mxu1  ;;  %1951 = vmatpush1.bf16.msra.mxu1 %v3401_v30  ;;  %v1690_v17 = vadd.f32 %v1689_v47, %v360_v14  ;;  %v3538_v30 = vld [vmem:[%s3961_s5 + $0x60] sm:$0xff]   ;;  %v3497_v47 = vld [vmem:[%s3959_s3 + $0x150] ss:$8 sps:$4 sm:$0xff]  }
 0x129   :  { %v1692_v50 = vpop.f32.mrb[3].mxu1  ;;  %1952 = vmatprep.subr.bf16.mxu1 %v3406_v51  ;;  %v3494_v51 = vld [vmem:[%s3959_s3 + $0x140] ss:$8 sps:$4 sm:$0xff]   ;;  %v3502_v3 = vld [vmem:[%s3959_s3 + $0x164] ss:$8 sps:$4 sm:$0xff]  }
 0x12a   :  { %v3500_v50 = vld [vmem:[%s3959_s3 + $0x160] ss:$8 sps:$4 sm:$0xff]  }
 0x12c   :  { %1953 = vmatpush1.bf16.msra.mxu1 %v3404_v48  ;;  %v3541_v48 = vld [vmem:[%s3961_s5 + $0x28] sm:$0xff]  }
 0x12d   :  { %1954 = vmatprep.subr.bf16.mxu1 %v3409_v52  ;;  %v3505_v52 = vld [vmem:[%s3959_s3 + $0x174] ss:$8 sps:$4 sm:$0xff]  }
 0x130   :  { %1955 = vmatpush1.bf16.msra.mxu1 %v3407_v55  ;;  %v3506_v55 = vld [vmem:[%s3959_s3 + $0x180] ss:$8 sps:$4 sm:$0xff]  }
 0x131   :  { %1956 = vmatprep.subr.bf16.mxu1 %v3412_v56  ;;  %v3511_v56 = vld [vmem:[%s3959_s3 + $0x194] ss:$8 sps:$4 sm:$0xff]  }
 0x134   :  { %1957 = vmatpush1.bf16.msra.mxu1 %v3410_v58  ;;  %v3514_v58 = vld [vmem:[%s3959_s3 + $0x1a4] ss:$8 sps:$4 sm:$0xff]  }
 0x135   :  { %1958 = vmatprep.subr.bf16.mxu1 %v3415_v59  ;;  %v3512_v59 = vld [vmem:[%s3959_s3 + $0x1a0] ss:$8 sps:$4 sm:$0xff]  }
 0x138   :  { %1959 = vmatpush1.bf16.msra.mxu1 %v3413_v60  ;;  %v3517_v60 = vld [vmem:[%s3959_s3 + $0x1b4] ss:$8 sps:$4 sm:$0xff]  }
 0x139   :  { %1960 = vmatprep.subr.bf16.mxu1 %v3418_v61  ;;  %v3515_v61 = vld [vmem:[%s3959_s3 + $0x1b0] ss:$8 sps:$4 sm:$0xff]  }
 0x13c   :  { %1961 = vmatpush1.bf16.msra.mxu1 %v3416_v62  ;;  %v3520_v62 = vld [vmem:[%s3959_s3 + $0x1c4] ss:$8 sps:$4 sm:$0xff]  }
 0x13d   :  { %1962 = vmatprep.subr.bf16.mxu1 %v3421_v63  ;;  %v3518_v63 = vld [vmem:[%s3959_s3 + $0x1c0] ss:$8 sps:$4 sm:$0xff]  }
 0x140   :  { %1963 = vmatpush1.bf16.msra.mxu1 %v3419_v0  ;;  %v3523_v0 = vld [vmem:[%s3959_s3 + $0x1d4] ss:$8 sps:$4 sm:$0xff]  }
 0x141   :  { %1964 = vmatprep.subr.bf16.mxu1 %v3424_v1  ;;  %v3521_v1 = vld [vmem:[%s3959_s3 + $0x1d0] ss:$8 sps:$4 sm:$0xff]  }
 0x144   :  { %1965 = vmatpush1.bf16.msra.mxu1 %v3422_v2  ;;  %v3526_v2 = vld [vmem:[%s3959_s3 + $0x1e4] ss:$8 sps:$4 sm:$0xff]  }
 0x145   :  { %1966 = vmatprep.subr.bf16.mxu1 %v3427_v4  ;;  %v3524_v4 = vld [vmem:[%s3959_s3 + $0x1e0] ss:$8 sps:$4 sm:$0xff]  }
 0x148   :  { %1967 = vmatpush1.bf16.msra.mxu1 %v3425_v5  ;;  %v3529_v5 = vld [vmem:[%s3959_s3 + $0x1f4] ss:$8 sps:$4 sm:$0xff]  }
 0x149   :  { %1968 = vmatprep.subr.bf16.mxu1 %v3430_v6  ;;  %v3527_v6 = vld [vmem:[%s3959_s3 + $0x1f0] ss:$8 sps:$4 sm:$0xff]  }
 0x14c   :  { %1969 = vmatpush1.bf16.msra.mxu1 %v3428_v7  ;;  %v363_v7 = vsub.s32 2, %v3626_v43 }
 0x14d   :  { %1970 = vmatprep.subr.bf16.mxu1 %v3433_v8  ;;  %v367_v8 = vsub.s32 3, %v3626_v43 }
 0x14f   :  { %v368_v13 = vrot.slane %v3789_v11, %v367_v8 }
 0x150   :  { %1971 = vmatpush1.bf16.msra.mxu1 %v3431_v9  ;;  %v364_v9 = vrot.slane %v3789_v11, %v363_v7  ;;  %v3543_v11 = vld [vmem:[%s3961_s5 + $0x30] sm:$0xff]  }
 0x151   :  { %2990 = vmatprep.subr.bf16.mxu1 %v3530_v49 }
 0x153   :  { %1973 = vmatmul.mubr.bf16.vlgmr.msra.gmra.mrb[4].mxu1 %v3678_v37 }
 0x154   :  { %2991 = vmatpush3.bf16.msra.mxu1 %v3531_v32 }
 0x155   :  { %2992 = vmatprep.subr.bf16.mxu1 %v3532_v33 }
 0x158   :  { %2993 = vmatpush3.bf16.msra.mxu1 %v3533_v38 }
 0x159   :  { %2994 = vmatprep.subr.bf16.mxu1 %v3534_v39 }
 0x15c   :  { %2995 = vmatpush3.bf16.msra.mxu1 %v3535_v24 }
 0x15d   :  { %2996 = vmatprep.subr.bf16.mxu1 %v3536_v16 }
 0x160   :  { %2997 = vmatpush3.bf16.msra.mxu1 %v3537_v44 }
 0x161   :  { %2998 = vmatprep.subr.bf16.mxu1 %v3538_v30 }
 0x164   :  { %2999 = vmatpush3.bf16.msra.mxu1 %v3539_v45 }
 0x165   :  { %3000 = vmatprep.subr.bf16.mxu1 %v3540_v46 }
 0x168   :  { %3001 = vmatpush3.bf16.msra.mxu1 %v3541_v48 }
 0x1a7   :  { %v1810_v37 = vpop.f32.mrb[0].mxu0 }
 0x1a8   :  { %v3013_v19 = vadd.f32 %v1810_v37, %v1688_v15  ;;  %v1812_v20 = vpop.f32.mrb[1].mxu0 }
 0x1a9   :  { %v3015_v21 = vadd.f32 %v1812_v20, %v1690_v17  ;;  %v1814_v22 = vpop.f32.mrb[2].mxu0 }
 0x1aa   :  { %v1981_v23 = vmax.f32 %v3013_v19, 0.0  ;;  %v1815_v25 = vpop.f32.mrb[3].mxu0 }
 0x1ab   :  { %v1982_v26 = vmax.f32 %v3015_v21, 0.0 }
 0x1ac   :  { %v1985_v29 = vpack.c.bf16 %v1981_v23, %v1981_v23 }
 0x1ad   :  { %v1986_v27 = vpack.c.bf16 %v1982_v26, %v1982_v26  ;;  %v3542_v26 = vld [vmem:[%s3961_s5 + $0x70] sm:$0xff]  }
 0x1ae   :  { %3002 = vmatprep.subr.bf16.mxu1 %v3542_v26 }
 0x1af   :  { %2417 = vmatprep.mubr.bf16.mxu0 %v1986_v27  ;;  %3003 = vmatpush3.bf16.msra.mxu1 %v3543_v11  ;;  %v3544_v27 = vld [vmem:[%s3961_s5 + $0x78] sm:$0xff]  }
 0x1b0   :  { %2418 = vmatmul.mubr.bf16.vlgmr.msra.gmra.mrb[4].mxu0 %v1985_v29  ;;  %3004 = vmatprep.subr.bf16.mxu1 %v3544_v27  ;;  %v2053_v29 = vld [vmem:[%s3960_s4] sm:$0x3] }
 0x1b1   :  { %2427 = vmatpush1.bf16.msra.mxu0 %v3482_v28  ;;  %v3545_v28 = vld [vmem:[%s3961_s5 + $0x38] sm:$0xff]   ;;  %v2062_v49 = vrot.slane %v2053_v29, %v359_v12 }
 0x1b2   :  { %2428 = vmatprep.subr.bf16.mxu0 %v3487_v31  ;;  %v2058_v31 = vrot.slane %v2053_v29, %v355_v10  ;;  %v2973_v10 = vld [vmem:[%s3962_s6] ss:$0 sm:$0xff] }
 0x1b3   :  { %3005 = vmatpush3.bf16.msra.mxu1 %v3545_v28 }
 0x1b5   :  { %2429 = vmatpush1.bf16.msra.mxu0 %v3485_v35 }
 0x1b6   :  { %2430 = vmatprep.subr.bf16.mxu0 %v3490_v36 }
 0x1b9   :  { %2431 = vmatpush1.bf16.msra.mxu0 %v3488_v40 }
 0x1ba   :  { %2432 = vmatprep.subr.bf16.mxu0 %v3493_v41 }
 0x1bd   :  { %2433 = vmatpush1.bf16.msra.mxu0 %v3491_v18 }
 0x1be   :  { %2434 = vmatprep.subr.bf16.mxu0 %v3496_v42 }
 0x1c1   :  { %2435 = vmatpush1.bf16.msra.mxu0 %v3494_v51 }
 0x1c2   :  { %2436 = vmatprep.subr.bf16.mxu0 %v3499_v34 }
 0x1c5   :  { %2437 = vmatpush1.bf16.msra.mxu0 %v3497_v47 }
 0x1c6   :  { %2438 = vmatprep.subr.bf16.mxu0 %v3502_v3 }
 0x1c9   :  { %2439 = vmatpush1.bf16.msra.mxu0 %v3500_v50 }
 0x1ca   :  { %2440 = vmatprep.subr.bf16.mxu0 %v3505_v52 }
 0x1cd   :  { %2441 = vmatpush1.bf16.msra.mxu0 %v3503_v53 }
 0x1ce   :  { %2442 = vmatprep.subr.bf16.mxu0 %v3508_v54 }
 0x1d1   :  { %2443 = vmatpush1.bf16.msra.mxu0 %v3506_v55 }
 0x1d2   :  { %2444 = vmatprep.subr.bf16.mxu0 %v3511_v56 }
 0x1d5   :  { %2445 = vmatpush1.bf16.msra.mxu0 %v3509_v57 }
 0x1d6   :  { %2446 = vmatprep.subr.bf16.mxu0 %v3514_v58 }
 0x1d9   :  { %2447 = vmatpush1.bf16.msra.mxu0 %v3512_v59 }
 0x1da   :  { %2448 = vmatprep.subr.bf16.mxu0 %v3517_v60 }
 0x1dd   :  { %2449 = vmatpush1.bf16.msra.mxu0 %v3515_v61 }
 0x1de   :  { %2450 = vmatprep.subr.bf16.mxu0 %v3520_v62 }
 0x1e1   :  { %2451 = vmatpush1.bf16.msra.mxu0 %v3518_v63 }
 0x1e2   :  { %2452 = vmatprep.subr.bf16.mxu0 %v3523_v0 }
 0x1e5   :  { %2453 = vmatpush1.bf16.msra.mxu0 %v3521_v1 }
 0x1e6   :  { %2454 = vmatprep.subr.bf16.mxu0 %v3526_v2 }
 0x1e9   :  { %2455 = vmatpush1.bf16.msra.mxu0 %v3524_v4 }
 0x1ea   :  { %2456 = vmatprep.subr.bf16.mxu0 %v3529_v5 }
 0x1ed   :  { %2457 = vmatpush1.bf16.msra.mxu0 %v3527_v6 }
 0x226   :  { %v1974_v14 = vpop.f32.mrb[4].mxu1 }
 0x227   :  { %v3016_v15 = vadd.f32 %v1974_v14, %v364_v9  ;;  %v1976_v17 = vpop.f32.mrb[5].mxu1 }
 0x228   :  { %v3017_v37 = vadd.f32 %v1976_v17, %v368_v13  ;;  %v1978_v19 = vpop.f32.mrb[6].mxu1 }
 0x229   :  { %v1983_v20 = vmax.f32 %v3016_v15, 0.0  ;;  %v1979_v21 = vpop.f32.mrb[7].mxu1 }
 0x22a   :  { %v1984_v22 = vmax.f32 %v3017_v37, 0.0 }
 0x22b   :  { %v1987_v25 = vpack.c.bf16 %v1983_v20, %v1983_v20 }
 0x22c   :  { %v1988_v23 = vpack.c.bf16 %v1984_v22, %v1984_v22 }
 0x22e   :  { %2458 = vmatprep.mubr.bf16.mxu0 %v1988_v23 }
 0x22f   :  { %2459 = vmatmul.mubr.bf16.vlgmr.msra.gmra.mrb[4].mxu0 %v1987_v25 }
 0x302   :  { %v2460_v32 = vpop.f32.mrb[4].mxu0 }
 0x303   :  { %v3018_v33 = vadd.f32 %v2460_v32, %v2058_v31  ;;  %v2462_v35 = vpop.f32.mrb[5].mxu0 }
 0x304   :  { %v3019_v36 = vadd.f32 %v2462_v35, %v2062_v49  ;;  %v2464_v38 = vpop.f32.mrb[6].mxu0 }
 0x305   :  { %v2467_v39 = vmax.f32 %v3018_v33, 0.0  ;;  %v2465_v40 = vpop.f32.mrb[7].mxu0 }
 0x306   :  { %v2468_v41 = vmax.f32 %v3019_v36, 0.0 }
 0x307   :  { %v2469_v16 = vpack.c.bf16 %v2467_v39, %v2467_v39 }
 0x308   :  { %v2470_v24 = vpack.c.bf16 %v2468_v41, %v2468_v41 }
 0x30a   :  { %2638 = vmatprep.mubr.bf16.mxu1 %v2470_v24 }
 0x30b   :  { %2639 = vmatmul.mubr.bf16.vlgmr.msra.gmra.mrb[8].mxu1 %v2469_v16 }
 0x3de   :  { %v3006_v18 = vpop.f32.mrb[8].mxu1 }
 0x3df   :  { %v3007_v42 = vpop.f32.mrb[9].mxu1 }
 0x3e0   :  { %v3008_v43 = vadd.f32 %v3007_v42, %v3006_v18  ;;  %v3009_v12 = vpop.f32.mrb[10].mxu1 }
 0x3e1   :  { %v3010_v44 = vpop.f32.mrb[11].mxu1 }
 0x3e2   :  { %v2641_v30 = vadd.f32 %v3008_v43, %v2973_v10 }
 0x3e4   :  { %2647 = vst.msk [vmem:[%s3963_s7] sm:$0x3] %vm2646_vm0, %v2641_v30 }
 0x3e5   :  { %2652 = vsyncpa [#allocation3], 1 }

// kernel: pointnet_cls_forward.7
= control target key start
LH: loop header
LB: loop body
LE: loop exit
PB: predicated region body
PF: predicated region fallthrough
CT: control target
= control target key end

     0   :  { %v3580_v36 = vmov 1983009808   ;;  %v36_v38 = vlaneseq  ;;  %s4732_s0 = inlined_call_operand.vmem [shape: f32[2,1024], index: 0, kind: input, shape index: {}]   ;;  %s4733_s1 = inlined_call_operand.vmem [shape: bf16[1024,512], index: 1, kind: input, shape index: {}]   ;;  %s4734_s2 = inlined_call_operand.vmem [shape: f32[1,512], index: 2, kind: input, shape index: {}]   ;;  %s4735_s3 = inlined_call_operand.vmem [shape: bf16[512,256], index: 3, kind: input, shape index: {}]   ;;  %s4736_s4 = inlined_call_operand.vmem [shape: f32[1,256], index: 4, kind: input, shape index: {}]   ;;  %s4737_s5 = inlined_call_operand.vmem [shape: bf16[256,2], index: 5, kind: input, shape index: {}]   ;;  %s4738_s6 = inlined_call_operand.vmem [shape: f32[1,2], index: 6, kind: input, shape index: {}]   ;;  %s4739_s7 = inlined_call_operand.hbm [shape: f32[2,2], index: 7, kind: output, shape index: {}]  }
   0x1   :  { %v3054_v0 = vld [vmem:[%s4733_s1 + $0x4] ss:$16 sps:$4 sm:$0xff]   ;;  %v3058_v2 = vld [vmem:[%s4733_s1] ss:$16 sps:$4 sm:$0xff]   ;;  %v34_v37 = vunpack.c.l.s4 %v3580_v36 }
   0x2   :  { %v3056_v1 = vld [vmem:[%s4733_s1 + $0x204] ss:$16 sps:$4 sm:$0xff]   ;;  %1640 = vmatprep.subr.bf16.mxu1 %v3054_v0  ;;  %v3059_v3 = vld [vmem:[%s4733_s1 + $0x200] ss:$16 sps:$4 sm:$0xff]   ;;  %v3739_v43 = vshrl.u32 %v36_v38, 7 }
   0x3   :  { %1681 = vmatprep.subr.bf16.mxu0 %v3056_v1  ;;  %v3060_v4 = vld [vmem:[%s4733_s1 + $0x24] ss:$16 sps:$4 sm:$0xff]   ;;  %1641 = vmatpush1.bf16.msra.mxu1 %v3058_v2  ;;  %v3064_v6 = vld [vmem:[%s4733_s1 + $0x20] ss:$16 sps:$4 sm:$0xff]   ;;  %v35_v42 = vunpack.c.0.s8 %v34_v37  ;;  %v3186_v37 = vld [vmem:[%s4733_s1 + $0xac] ss:$16 sps:$4 sm:$0xff]  }
   0x4   :  { %1682 = vmatpush1.bf16.msra.mxu0 %v3059_v3  ;;  %v3062_v5 = vld [vmem:[%s4733_s1 + $0x224] ss:$16 sps:$4 sm:$0xff]   ;;  %1642 = vmatprep.subr.bf16.mxu1 %v3060_v4  ;;  %v3065_v7 = vld [vmem:[%s4733_s1 + $0x220] ss:$16 sps:$4 sm:$0xff]  }
   0x5   :  { %1683 = vmatprep.subr.bf16.mxu0 %v3062_v5  ;;  %v3066_v8 = vld [vmem:[%s4733_s1 + $0x44] ss:$16 sps:$4 sm:$0xff]   ;;  %v3070_v10 = vld [vmem:[%s4733_s1 + $0x40] ss:$16 sps:$4 sm:$0xff]   ;;  %v3757_v49 = vsub.s32 %v35_v42, %v3739_v43  ;;  %v3914_v42 = vld [vmem:[%s4732_s0 + $0x8] sm:$0xff] }
   0x6   :  { %v3068_v9 = vld [vmem:[%s4733_s1 + $0x244] ss:$16 sps:$4 sm:$0xff]   ;;  %v3071_v11 = vld [vmem:[%s4733_s1 + $0x240] ss:$16 sps:$4 sm:$0xff]  }
   0x7   :  { %1643 = vmatpush1.bf16.msra.mxu1 %v3064_v6  ;;  %v3072_v12 = vld [vmem:[%s4733_s1 + $0x64] ss:$16 sps:$4 sm:$0xff]   ;;  %v3076_v14 = vld [vmem:[%s4733_s1 + $0x60] ss:$16 sps:$4 sm:$0xff]  }
   0x8   :  { %1684 = vmatpush1.bf16.msra.mxu0 %v3065_v7  ;;  %1644 = vmatprep.subr.bf16.mxu1 %v3066_v8  ;;  %v3074_v13 = vld [vmem:[%s4733_s1 + $0x264] ss:$16 sps:$4 sm:$0xff]   ;;  %v3077_v15 = vld [vmem:[%s4733_s1 + $0x260] ss:$16 sps:$4 sm:$0xff]  }
   0x9   :  { %1685 = vmatprep.subr.bf16.mxu0 %v3068_v9  ;;  %v3078_v16 = vld [vmem:[%s4733_s1 + $0x84] ss:$16 sps:$4 sm:$0xff]   ;;  %v3082_v18 = vld [vmem:[%s4733_s1 + $0x80] ss:$16 sps:$4 sm:$0xff]  }
   0xa   :  { %v3080_v17 = vld [vmem:[%s4733_s1 + $0x284] ss:$16 sps:$4 sm:$0xff]   ;;  %v3083_v19 = vld [vmem:[%s4733_s1 + $0x280] ss:$16 sps:$4 sm:$0xff]  }
   0xb   :  { %1645 = vmatpush1.bf16.msra.mxu1 %v3070_v10  ;;  %v3084_v20 = vld [vmem:[%s4733_s1 + $0xa4] ss:$16 sps:$4 sm:$0xff]   ;;  %v3088_v22 = vld [vmem:[%s4733_s1 + $0xa0] ss:$16 sps:$4 sm:$0xff]  }
   0xc   :  { %1686 = vmatpush1.bf16.msra.mxu0 %v3071_v11  ;;  %1646 = vmatprep.subr.bf16.mxu1 %v3072_v12  ;;  %v3086_v21 = vld [vmem:[%s4733_s1 + $0x2a4] ss:$16 sps:$4 sm:$0xff]   ;;  %v3089_v23 = vld [vmem:[%s4733_s1 + $0x2a0] ss:$16 sps:$4 sm:$0xff]  }
   0xd   :  { %1687 = vmatprep.subr.bf16.mxu0 %v3074_v13  ;;  %v3090_v24 = vld [vmem:[%s4733_s1 + $0xc4] ss:$16 sps:$4 sm:$0xff]   ;;  %v3094_v26 = vld [vmem:[%s4733_s1 + $0xc0] ss:$16 sps:$4 sm:$0xff]  }
   0xe   :  { %v3092_v25 = vld [vmem:[%s4733_s1 + $0x2c4] ss:$16 sps:$4 sm:$0xff]   ;;  %v3095_v27 = vld [vmem:[%s4733_s1 + $0x2c0] ss:$16 sps:$4 sm:$0xff]  }
   0xf   :  { %1647 = vmatpush1.bf16.msra.mxu1 %v3076_v14  ;;  %v3096_v28 = vld [vmem:[%s4733_s1 + $0xe4] ss:$16 sps:$4 sm:$0xff]   ;;  %v3100_v30 = vld [vmem:[%s4733_s1 + $0xe0] ss:$16 sps:$4 sm:$0xff]  }
  0x10   :  { %1688 = vmatpush1.bf16.msra.mxu0 %v3077_v15  ;;  %1648 = vmatprep.subr.bf16.mxu1 %v3078_v16  ;;  %v3098_v29 = vld [vmem:[%s4733_s1 + $0x2e4] ss:$16 sps:$4 sm:$0xff]   ;;  %v3101_v31 = vld [vmem:[%s4733_s1 + $0x2e0] ss:$16 sps:$4 sm:$0xff]   ;;  %v3156_v15 = vld [vmem:[%s4733_s1 + $0xc] ss:$16 sps:$4 sm:$0xff]  }
  0x11   :  { %1689 = vmatprep.subr.bf16.mxu0 %v3080_v17  ;;  %v3102_v32 = vld [vmem:[%s4733_s1 + $0x104] ss:$16 sps:$4 sm:$0xff]   ;;  %v3106_v34 = vld [vmem:[%s4733_s1 + $0x100] ss:$16 sps:$4 sm:$0xff]  }
  0x12   :  { %v3104_v33 = vld [vmem:[%s4733_s1 + $0x304] ss:$16 sps:$4 sm:$0xff]   ;;  %v3107_v35 = vld [vmem:[%s4733_s1 + $0x300] ss:$16 sps:$4 sm:$0xff]  }
  0x13   :  { %1649 = vmatpush1.bf16.msra.mxu1 %v3082_v18  ;;  %v3108_v39 = vld [vmem:[%s4733_s1 + $0x124] ss:$16 sps:$4 sm:$0xff]   ;;  %v3112_v41 = vld [vmem:[%s4733_s1 + $0x120] ss:$16 sps:$4 sm:$0xff]  }
  0x14   :  { %1690 = vmatpush1.bf16.msra.mxu0 %v3083_v19  ;;  %1650 = vmatprep.subr.bf16.mxu1 %v3084_v20  ;;  %v3110_v40 = vld [vmem:[%s4733_s1 + $0x324] ss:$16 sps:$4 sm:$0xff]   ;;  %v3113_v44 = vld [vmem:[%s4733_s1 + $0x320] ss:$16 sps:$4 sm:$0xff]   ;;  %v3154_v19 = vld [vmem:[%s4733_s1 + $0x8] ss:$16 sps:$4 sm:$0xff]  }
  0x15   :  { %1691 = vmatprep.subr.bf16.mxu0 %v3086_v21  ;;  %v3114_v45 = vld [vmem:[%s4733_s1 + $0x144] ss:$16 sps:$4 sm:$0xff]   ;;  %v3118_v47 = vld [vmem:[%s4733_s1 + $0x140] ss:$16 sps:$4 sm:$0xff]   ;;  %v3162_v21 = vld [vmem:[%s4733_s1 + $0x2c] ss:$16 sps:$4 sm:$0xff]  }
  0x16   :  { %v3116_v46 = vld [vmem:[%s4733_s1 + $0x344] ss:$16 sps:$4 sm:$0xff]   ;;  %v3119_v48 = vld [vmem:[%s4733_s1 + $0x340] ss:$16 sps:$4 sm:$0xff]  }
  0x17   :  { %1651 = vmatpush1.bf16.msra.mxu1 %v3088_v22  ;;  %v3120_v50 = vld [vmem:[%s4733_s1 + $0x164] ss:$16 sps:$4 sm:$0xff]   ;;  %v3124_v53 = vld [vmem:[%s4733_s1 + $0x160] ss:$16 sps:$4 sm:$0xff]  }
  0x18   :  { %1692 = vmatpush1.bf16.msra.mxu0 %v3089_v23  ;;  %1652 = vmatprep.subr.bf16.mxu1 %v3090_v24  ;;  %v3122_v51 = vld [vmem:[%s4733_s1 + $0x364] ss:$16 sps:$4 sm:$0xff]   ;;  %v3125_v56 = vld [vmem:[%s4733_s1 + $0x360] ss:$16 sps:$4 sm:$0xff]   ;;  %v3160_v23 = vld [vmem:[%s4733_s1 + $0x28] ss:$16 sps:$4 sm:$0xff]  }
  0x19   :  { %1693 = vmatprep.subr.bf16.mxu0 %v3092_v25  ;;  %v28_v52 = vld [vmem:[%s4732_s0] sm:$0xff]  ;;  %v3168_v25 = vld [vmem:[%s4733_s1 + $0x4c] ss:$16 sps:$4 sm:$0xff]  }
  0x1a   :  { %v39_v54 = vrot.slane %v28_v52, %v3757_v49  ;;  %v32_v55 = vcombine.high %v28_v52, %v28_v52  ;;  %v3126_v57 = vld [vmem:[%s4733_s1 + $0x184] ss:$16 sps:$4 sm:$0xff]   ;;  %v3130_v61 = vld [vmem:[%s4733_s1 + $0x180] ss:$16 sps:$4 sm:$0xff]  }
  0x1b   :  { %1653 = vmatpush1.bf16.msra.mxu1 %v3094_v26  ;;  %v3128_v58 = vld [vmem:[%s4733_s1 + $0x384] ss:$16 sps:$4 sm:$0xff]   ;;  %v3131_v0 = vld [vmem:[%s4733_s1 + $0x380] ss:$16 sps:$4 sm:$0xff]  }
  0x1c   :  { %1694 = vmatpush1.bf16.msra.mxu0 %v3095_v27  ;;  %1654 = vmatprep.subr.bf16.mxu1 %v3096_v28  ;;  %v47_v59 = vcombine.high %v39_v54, %v39_v54  ;;  %v46_v60 = vrot.slane %v32_v55, %v3757_v49  ;;  %v3132_v1 = vld [vmem:[%s4733_s1 + $0x1a4] ss:$16 sps:$4 sm:$0xff]   ;;  %v3136_v4 = vld [vmem:[%s4733_s1 + $0x1a0] ss:$16 sps:$4 sm:$0xff]   ;;  %v3833_v16 = vpack.c.bf16 %v39_v54, %v39_v54  ;;  %v3166_v27 = vld [vmem:[%s4733_s1 + $0x48] ss:$16 sps:$4 sm:$0xff]  }
  0x1d   :  { %1695 = vmatprep.subr.bf16.mxu0 %v3098_v29  ;;  %v3134_v2 = vld [vmem:[%s4733_s1 + $0x3a4] ss:$16 sps:$4 sm:$0xff]   ;;  %v3137_v5 = vld [vmem:[%s4733_s1 + $0x3a0] ss:$16 sps:$4 sm:$0xff]   ;;  %v3174_v29 = vld [vmem:[%s4733_s1 + $0x6c] ss:$16 sps:$4 sm:$0xff]  }
  0x1e   :  { %v75_v62 = vpack.c.bf16 %v47_v59, %v47_v59  ;;  %v48_v63 = vcombine.high %v46_v60, %v46_v60  ;;  %v3138_v6 = vld [vmem:[%s4733_s1 + $0x1c4] ss:$16 sps:$4 sm:$0xff]   ;;  %v3142_v8 = vld [vmem:[%s4733_s1 + $0x1c0] ss:$16 sps:$4 sm:$0xff]   ;;  %v3838_v18 = vpack.c.bf16 %v46_v60, %v46_v60  ;;  %v3204_v55 = vld [vmem:[%s4733_s1 + $0x10c] ss:$16 sps:$4 sm:$0xff]  }
  0x1f   :  { %1655 = vmatpush1.bf16.msra.mxu1 %v3100_v30  ;;  %v3140_v7 = vld [vmem:[%s4733_s1 + $0x3c4] ss:$16 sps:$4 sm:$0xff]   ;;  %v3143_v9 = vld [vmem:[%s4733_s1 + $0x3c0] ss:$16 sps:$4 sm:$0xff]   ;;  %v3210_v59 = vld [vmem:[%s4733_s1 + $0x12c] ss:$16 sps:$4 sm:$0xff]  }
  0x20   :  { %1696 = vmatpush1.bf16.msra.mxu0 %v3101_v31  ;;  %1656 = vmatprep.subr.bf16.mxu1 %v3102_v32  ;;  %v3794_v3 = vpack.c.bf16 %v48_v63, %v48_v63  ;;  %v3144_v10 = vld [vmem:[%s4733_s1 + $0x1e4] ss:$16 sps:$4 sm:$0xff]   ;;  %v3148_v12 = vld [vmem:[%s4733_s1 + $0x1e0] ss:$16 sps:$4 sm:$0xff]   ;;  %v3172_v31 = vld [vmem:[%s4733_s1 + $0x68] ss:$16 sps:$4 sm:$0xff]  }
  0x21   :  { %1697 = vmatprep.subr.bf16.mxu0 %v3104_v33  ;;  %1672 = vmatprep.mubr.bf16.mxu1 %v75_v62  ;;  %v3146_v11 = vld [vmem:[%s4733_s1 + $0x3e4] ss:$16 sps:$4 sm:$0xff]   ;;  %v3149_v13 = vld [vmem:[%s4733_s1 + $0x3e0] ss:$16 sps:$4 sm:$0xff]   ;;  %v3180_v33 = vld [vmem:[%s4733_s1 + $0x8c] ss:$16 sps:$4 sm:$0xff]  }
  0x22   :  { %1713 = vmatprep.mubr.bf16.mxu0 %v3794_v3  ;;  %v3153_v14 = vld [vmem:[%s4733_s1 + $0x404] ss:$16 sps:$4 sm:$0xff]   ;;  %v3151_v17 = vld [vmem:[%s4733_s1 + $0x400] ss:$16 sps:$4 sm:$0xff]   ;;  %v3216_v63 = vld [vmem:[%s4733_s1 + $0x14c] ss:$16 sps:$4 sm:$0xff]  }
  0x23   :  { %1657 = vmatpush1.bf16.msra.mxu1 %v3106_v34  ;;  %v3159_v20 = vld [vmem:[%s4733_s1 + $0x424] ss:$16 sps:$4 sm:$0xff]   ;;  %v3157_v22 = vld [vmem:[%s4733_s1 + $0x420] ss:$16 sps:$4 sm:$0xff]  }
  0x24   :  { %1698 = vmatpush1.bf16.msra.mxu0 %v3107_v35  ;;  %1658 = vmatprep.subr.bf16.mxu1 %v3108_v39  ;;  %v3165_v24 = vld [vmem:[%s4733_s1 + $0x444] ss:$16 sps:$4 sm:$0xff]   ;;  %v3163_v26 = vld [vmem:[%s4733_s1 + $0x440] ss:$16 sps:$4 sm:$0xff]   ;;  %v3178_v35 = vld [vmem:[%s4733_s1 + $0x88] ss:$16 sps:$4 sm:$0xff]  }
  0x25   :  { %1699 = vmatprep.subr.bf16.mxu0 %v3110_v40  ;;  %v3171_v28 = vld [vmem:[%s4733_s1 + $0x464] ss:$16 sps:$4 sm:$0xff]   ;;  %v3169_v30 = vld [vmem:[%s4733_s1 + $0x460] ss:$16 sps:$4 sm:$0xff]   ;;  %v3184_v39 = vld [vmem:[%s4733_s1 + $0xa8] ss:$16 sps:$4 sm:$0xff]  }
  0x26   :  { %v3177_v32 = vld [vmem:[%s4733_s1 + $0x484] ss:$16 sps:$4 sm:$0xff]   ;;  %v3175_v34 = vld [vmem:[%s4733_s1 + $0x480] ss:$16 sps:$4 sm:$0xff]  }
  0x27   :  { %1659 = vmatpush1.bf16.msra.mxu1 %v3112_v41  ;;  %v3183_v36 = vld [vmem:[%s4733_s1 + $0x4a4] ss:$16 sps:$4 sm:$0xff]   ;;  %v3181_v38 = vld [vmem:[%s4733_s1 + $0x4a0] ss:$16 sps:$4 sm:$0xff]   ;;  %v3192_v41 = vld [vmem:[%s4733_s1 + $0xcc] ss:$16 sps:$4 sm:$0xff]  }
  0x28   :  { %1700 = vmatpush1.bf16.msra.mxu0 %v3113_v44  ;;  %1660 = vmatprep.subr.bf16.mxu1 %v3114_v45  ;;  %v3189_v40 = vld [vmem:[%s4733_s1 + $0x4c4] ss:$16 sps:$4 sm:$0xff]   ;;  %v3918_v44 = vrot.slane %v3914_v42, %v3757_v49  ;;  %v3187_v45 = vld [vmem:[%s4733_s1 + $0x4c0] ss:$16 sps:$4 sm:$0xff]  }
  0x29   :  { %1701 = vmatprep.subr.bf16.mxu0 %v3116_v46  ;;  %v3190_v46 = vld [vmem:[%s4733_s1 + $0xc8] ss:$16 sps:$4 sm:$0xff]   ;;  %v3193_v52 = vld [vmem:[%s4733_s1 + $0x4e0] ss:$16 sps:$4 sm:$0xff]   ;;  %v3201_v54 = vld [vmem:[%s4733_s1 + $0x504] ss:$16 sps:$4 sm:$0xff]  }
  0x2a   :  { %v3205_v60 = vld [vmem:[%s4733_s1 + $0x520] ss:$16 sps:$4 sm:$0xff]  }
  0x2b   :  { %1661 = vmatpush1.bf16.msra.mxu1 %v3118_v47  ;;  %v64_v47 = vcombine.high %v3918_v44, %v3918_v44 }
  0x2c   :  { %1702 = vmatpush1.bf16.msra.mxu0 %v3119_v48  ;;  %1662 = vmatprep.subr.bf16.mxu1 %v3120_v50  ;;  %v3195_v48 = vld [vmem:[%s4733_s1 + $0x4e4] ss:$16 sps:$4 sm:$0xff]   ;;  %v3198_v50 = vld [vmem:[%s4733_s1 + $0xec] ss:$16 sps:$4 sm:$0xff]  }
  0x2d   :  { %1703 = vmatprep.subr.bf16.mxu0 %v3122_v51  ;;  %v3934_v51 = vpack.c.bf16 %v64_v47, %v64_v47  ;;  %v3274_v47 = vld [vmem:[%s4733_s1 + $0x288] ss:$16 sps:$4 sm:$0xff]  }
  0x2f   :  { %1663 = vmatpush1.bf16.msra.mxu1 %v3124_v53  ;;  %v3196_v53 = vld [vmem:[%s4733_s1 + $0xe8] ss:$16 sps:$4 sm:$0xff]  }
  0x30   :  { %1704 = vmatpush1.bf16.msra.mxu0 %v3125_v56  ;;  %1664 = vmatprep.subr.bf16.mxu1 %v3126_v57  ;;  %v3199_v56 = vld [vmem:[%s4733_s1 + $0x500] ss:$16 sps:$4 sm:$0xff]   ;;  %v3202_v57 = vld [vmem:[%s4733_s1 + $0x108] ss:$16 sps:$4 sm:$0xff]  }
  0x31   :  { %1705 = vmatprep.subr.bf16.mxu0 %v3128_v58  ;;  %v3207_v58 = vld [vmem:[%s4733_s1 + $0x524] ss:$16 sps:$4 sm:$0xff]  }
  0x33   :  { %1665 = vmatpush1.bf16.msra.mxu1 %v3130_v61  ;;  %v3208_v61 = vld [vmem:[%s4733_s1 + $0x128] ss:$16 sps:$4 sm:$0xff]  }
  0x34   :  { %1706 = vmatpush1.bf16.msra.mxu0 %v3131_v0  ;;  %1666 = vmatprep.subr.bf16.mxu1 %v3132_v1  ;;  %v3211_v0 = vld [vmem:[%s4733_s1 + $0x540] ss:$16 sps:$4 sm:$0xff]   ;;  %v3214_v1 = vld [vmem:[%s4733_s1 + $0x148] ss:$16 sps:$4 sm:$0xff]  }
  0x35   :  { %1707 = vmatprep.subr.bf16.mxu0 %v3134_v2  ;;  %v3219_v2 = vld [vmem:[%s4733_s1 + $0x564] ss:$16 sps:$4 sm:$0xff]  }
  0x37   :  { %1667 = vmatpush1.bf16.msra.mxu1 %v3136_v4  ;;  %v3222_v4 = vld [vmem:[%s4733_s1 + $0x16c] ss:$16 sps:$4 sm:$0xff]  }
  0x38   :  { %1708 = vmatpush1.bf16.msra.mxu0 %v3137_v5  ;;  %1668 = vmatprep.subr.bf16.mxu1 %v3138_v6  ;;  %v3217_v5 = vld [vmem:[%s4733_s1 + $0x560] ss:$16 sps:$4 sm:$0xff]   ;;  %v3220_v6 = vld [vmem:[%s4733_s1 + $0x168] ss:$16 sps:$4 sm:$0xff]  }
  0x39   :  { %1709 = vmatprep.subr.bf16.mxu0 %v3140_v7  ;;  %v3225_v7 = vld [vmem:[%s4733_s1 + $0x584] ss:$16 sps:$4 sm:$0xff]  }
  0x3b   :  { %1669 = vmatpush1.bf16.msra.mxu1 %v3142_v8  ;;  %v3228_v8 = vld [vmem:[%s4733_s1 + $0x18c] ss:$16 sps:$4 sm:$0xff]  }
  0x3c   :  { %1710 = vmatpush1.bf16.msra.mxu0 %v3143_v9  ;;  %1670 = vmatprep.subr.bf16.mxu1 %v3144_v10  ;;  %v3223_v9 = vld [vmem:[%s4733_s1 + $0x580] ss:$16 sps:$4 sm:$0xff]   ;;  %v3226_v10 = vld [vmem:[%s4733_s1 + $0x188] ss:$16 sps:$4 sm:$0xff]  }
  0x3d   :  { %1711 = vmatprep.subr.bf16.mxu0 %v3146_v11  ;;  %v3231_v11 = vld [vmem:[%s4733_s1 + $0x5a4] ss:$16 sps:$4 sm:$0xff]  }
  0x3f   :  { %1671 = vmatpush1.bf16.msra.mxu1 %v3148_v12  ;;  %v3234_v12 = vld [vmem:[%s4733_s1 + $0x1ac] ss:$16 sps:$4 sm:$0xff]  }
  0x40   :  { %1712 = vmatpush1.bf16.msra.mxu0 %v3149_v13  ;;  %1804 = vmatprep.subr.bf16.mxu1 %v3156_v15  ;;  %v3229_v13 = vld [vmem:[%s4733_s1 + $0x5a0] ss:$16 sps:$4 sm:$0xff]   ;;  %v3237_v15 = vld [vmem:[%s4733_s1 + $0x5c4] ss:$16 sps:$4 sm:$0xff]  }
  0x41   :  { %1722 = vmatprep.subr.bf16.mxu0 %v3153_v14  ;;  %v3232_v14 = vld [vmem:[%s4733_s1 + $0x1a8] ss:$16 sps:$4 sm:$0xff]  }
  0x42   :  { %1673 = vmatmul.mubr.bf16.vlgmr.msra.gmra.mrb[0].mxu1 %v3833_v16 }
  0x43   :  { %1714 = vmatmul.mubr.bf16.vlgmr.msra.gmra.mrb[0].mxu0 %v3838_v18  ;;  %1805 = vmatpush1.bf16.msra.mxu1 %v3154_v19  ;;  %v49_v19 = vcombine.high %v3914_v42, %v3914_v42  ;;  %v3268_v42 = vld [vmem:[%s4733_s1 + $0x268] ss:$16 sps:$4 sm:$0xff]  }
  0x44   :  { %1723 = vmatpush1.bf16.msra.mxu0 %v3151_v17  ;;  %1806 = vmatprep.subr.bf16.mxu1 %v3162_v21  ;;  %v3240_v17 = vld [vmem:[%s4733_s1 + $0x1cc] ss:$16 sps:$4 sm:$0xff]   ;;  %v3238_v21 = vld [vmem:[%s4733_s1 + $0x1c8] ss:$16 sps:$4 sm:$0xff]  }
  0x45   :  { %1724 = vmatprep.subr.bf16.mxu0 %v3159_v20  ;;  %1836 = vmatprep.mubr.bf16.mxu1 %v75_v62  ;;  %v3213_v62 = vld [vmem:[%s4733_s1 + $0x544] ss:$16 sps:$4 sm:$0xff]   ;;  %v3235_v20 = vld [vmem:[%s4733_s1 + $0x5c0] ss:$16 sps:$4 sm:$0xff]  }
  0x46   :  { %1754 = vmatprep.mubr.bf16.mxu0 %v3934_v51 }
  0x47   :  { %1807 = vmatpush1.bf16.msra.mxu1 %v3160_v23  ;;  %v3246_v23 = vld [vmem:[%s4733_s1 + $0x1ec] ss:$16 sps:$4 sm:$0xff]  }
  0x48   :  { %1725 = vmatpush1.bf16.msra.mxu0 %v3157_v22  ;;  %1808 = vmatprep.subr.bf16.mxu1 %v3168_v25  ;;  %v3243_v22 = vld [vmem:[%s4733_s1 + $0x5e4] ss:$16 sps:$4 sm:$0xff]   ;;  %v3241_v25 = vld [vmem:[%s4733_s1 + $0x5e0] ss:$16 sps:$4 sm:$0xff]  }
  0x49   :  { %1726 = vmatprep.subr.bf16.mxu0 %v3165_v24  ;;  %v4036_v24 = vrot.slane %v49_v19, %v3757_v49  ;;  %v3252_v49 = vld [vmem:[%s4733_s1 + $0x20c] ss:$16 sps:$4 sm:$0xff]   ;;  %v3319_v19 = vld [vmem:[%s4733_s1 + $0x780] ss:$16 sps:$4 sm:$0xff]  }
  0x4b   :  { %1809 = vmatpush1.bf16.msra.mxu1 %v3166_v27  ;;  %v3249_v27 = vld [vmem:[%s4733_s1 + $0x604] ss:$16 sps:$4 sm:$0xff]  }
  0x4c   :  { %1727 = vmatpush1.bf16.msra.mxu0 %v3163_v26  ;;  %1810 = vmatprep.subr.bf16.mxu1 %v3174_v29  ;;  %v3244_v26 = vld [vmem:[%s4733_s1 + $0x1e8] ss:$16 sps:$4 sm:$0xff]   ;;  %v4054_v29 = vpack.c.bf16 %v3918_v44, %v3918_v44  ;;  %v3273_v44 = vld [vmem:[%s4733_s1 + $0x684] ss:$16 sps:$4 sm:$0xff]  }
  0x4d   :  { %1728 = vmatprep.subr.bf16.mxu0 %v3171_v28  ;;  %v65_v28 = vcombine.high %v4036_v24, %v4036_v24 }
  0x4f   :  { %1811 = vmatpush1.bf16.msra.mxu1 %v3172_v31  ;;  %v3250_v31 = vld [vmem:[%s4733_s1 + $0x208] ss:$16 sps:$4 sm:$0xff]  }
  0x50   :  { %1729 = vmatpush1.bf16.msra.mxu0 %v3169_v30  ;;  %1812 = vmatprep.subr.bf16.mxu1 %v3180_v33  ;;  %v3247_v30 = vld [vmem:[%s4733_s1 + $0x600] ss:$16 sps:$4 sm:$0xff]   ;;  %v3258_v33 = vld [vmem:[%s4733_s1 + $0x22c] ss:$16 sps:$4 sm:$0xff]  }
  0x51   :  { %1730 = vmatprep.subr.bf16.mxu0 %v3177_v32  ;;  %v3255_v32 = vld [vmem:[%s4733_s1 + $0x624] ss:$16 sps:$4 sm:$0xff]  }
  0x53   :  { %1813 = vmatpush1.bf16.msra.mxu1 %v3178_v35  ;;  %v3253_v35 = vld [vmem:[%s4733_s1 + $0x620] ss:$16 sps:$4 sm:$0xff]  }
  0x54   :  { %1731 = vmatpush1.bf16.msra.mxu0 %v3175_v34  ;;  %1814 = vmatprep.subr.bf16.mxu1 %v3186_v37  ;;  %v4068_v34 = vpack.c.bf16 %v65_v28, %v65_v28  ;;  %v3261_v37 = vld [vmem:[%s4733_s1 + $0x644] ss:$16 sps:$4 sm:$0xff]   ;;  %v3334_v28 = vld [vmem:[%s4733_s1 + $0x3c8] ss:$16 sps:$4 sm:$0xff]  }
  0x55   :  { %1732 = vmatprep.subr.bf16.mxu0 %v3183_v36  ;;  %v3256_v36 = vld [vmem:[%s4733_s1 + $0x228] ss:$16 sps:$4 sm:$0xff]  }
  0x57   :  { %1815 = vmatpush1.bf16.msra.mxu1 %v3184_v39  ;;  %v3262_v39 = vld [vmem:[%s4733_s1 + $0x248] ss:$16 sps:$4 sm:$0xff]  }
  0x58   :  { %1733 = vmatpush1.bf16.msra.mxu0 %v3181_v38  ;;  %1816 = vmatprep.subr.bf16.mxu1 %v3192_v41  ;;  %v3259_v38 = vld [vmem:[%s4733_s1 + $0x640] ss:$16 sps:$4 sm:$0xff]  }
  0x59   :  { %1734 = vmatprep.subr.bf16.mxu0 %v3189_v40  ;;  %v3267_v40 = vld [vmem:[%s4733_s1 + $0x664] ss:$16 sps:$4 sm:$0xff]   ;;  %v3265_v41 = vld [vmem:[%s4733_s1 + $0x660] ss:$16 sps:$4 sm:$0xff]  }
  0x5b   :  { %1817 = vmatpush1.bf16.msra.mxu1 %v3190_v46  ;;  %v3271_v46 = vld [vmem:[%s4733_s1 + $0x680] ss:$16 sps:$4 sm:$0xff]  }
  0x5c   :  { %1735 = vmatpush1.bf16.msra.mxu0 %v3187_v45  ;;  %1818 = vmatprep.subr.bf16.mxu1 %v3198_v50  ;;  %v3276_v45 = vld [vmem:[%s4733_s1 + $0x28c] ss:$16 sps:$4 sm:$0xff]  }
  0x5d   :  { %1736 = vmatprep.subr.bf16.mxu0 %v3195_v48  ;;  %v3279_v48 = vld [vmem:[%s4733_s1 + $0x6a4] ss:$16 sps:$4 sm:$0xff]   ;;  %v3282_v50 = vld [vmem:[%s4733_s1 + $0x2ac] ss:$16 sps:$4 sm:$0xff]  }
  0x5f   :  { %1819 = vmatpush1.bf16.msra.mxu1 %v3196_v53  ;;  %v3280_v53 = vld [vmem:[%s4733_s1 + $0x2a8] ss:$16 sps:$4 sm:$0xff]  }
  0x60   :  { %1737 = vmatpush1.bf16.msra.mxu0 %v3193_v52  ;;  %1820 = vmatprep.subr.bf16.mxu1 %v3204_v55  ;;  %v3277_v52 = vld [vmem:[%s4733_s1 + $0x6a0] ss:$16 sps:$4 sm:$0xff]   ;;  %v3288_v55 = vld [vmem:[%s4733_s1 + $0x2cc] ss:$16 sps:$4 sm:$0xff]  }
  0x61   :  { %1738 = vmatprep.subr.bf16.mxu0 %v3201_v54  ;;  %v3285_v54 = vld [vmem:[%s4733_s1 + $0x6c4] ss:$16 sps:$4 sm:$0xff]  }
  0x63   :  { %1821 = vmatpush1.bf16.msra.mxu1 %v3202_v57  ;;  %v3286_v57 = vld [vmem:[%s4733_s1 + $0x2c8] ss:$16 sps:$4 sm:$0xff]  }
  0x64   :  { %1739 = vmatpush1.bf16.msra.mxu0 %v3199_v56  ;;  %1822 = vmatprep.subr.bf16.mxu1 %v3210_v59  ;;  %v3283_v56 = vld [vmem:[%s4733_s1 + $0x6c0] ss:$16 sps:$4 sm:$0xff]   ;;  %v3294_v59 = vld [vmem:[%s4733_s1 + $0x2ec] ss:$16 sps:$4 sm:$0xff]  }
  0x65   :  { %1740 = vmatprep.subr.bf16.mxu0 %v3207_v58  ;;  %v3291_v58 = vld [vmem:[%s4733_s1 + $0x6e4] ss:$16 sps:$4 sm:$0xff]  }
  0x67   :  { %1823 = vmatpush1.bf16.msra.mxu1 %v3208_v61  ;;  %v3292_v61 = vld [vmem:[%s4733_s1 + $0x2e8] ss:$16 sps:$4 sm:$0xff]  }
  0x68   :  { %1741 = vmatpush1.bf16.msra.mxu0 %v3205_v60  ;;  %1824 = vmatprep.subr.bf16.mxu1 %v3216_v63  ;;  %v3289_v60 = vld [vmem:[%s4733_s1 + $0x6e0] ss:$16 sps:$4 sm:$0xff]   ;;  %v3300_v63 = vld [vmem:[%s4733_s1 + $0x30c] ss:$16 sps:$4 sm:$0xff]  }
  0x69   :  { %1742 = vmatprep.subr.bf16.mxu0 %v3213_v62  ;;  %v3297_v62 = vld [vmem:[%s4733_s1 + $0x704] ss:$16 sps:$4 sm:$0xff]  }
  0x6b   :  { %1825 = vmatpush1.bf16.msra.mxu1 %v3214_v1  ;;  %v3298_v1 = vld [vmem:[%s4733_s1 + $0x308] ss:$16 sps:$4 sm:$0xff]  }
  0x6c   :  { %1743 = vmatpush1.bf16.msra.mxu0 %v3211_v0  ;;  %1826 = vmatprep.subr.bf16.mxu1 %v3222_v4  ;;  %v3295_v0 = vld [vmem:[%s4733_s1 + $0x700] ss:$16 sps:$4 sm:$0xff]   ;;  %v3306_v4 = vld [vmem:[%s4733_s1 + $0x32c] ss:$16 sps:$4 sm:$0xff]  }
  0x6d   :  { %1744 = vmatprep.subr.bf16.mxu0 %v3219_v2  ;;  %v3303_v2 = vld [vmem:[%s4733_s1 + $0x724] ss:$16 sps:$4 sm:$0xff]  }
  0x6f   :  { %1827 = vmatpush1.bf16.msra.mxu1 %v3220_v6  ;;  %v3304_v6 = vld [vmem:[%s4733_s1 + $0x328] ss:$16 sps:$4 sm:$0xff]  }
  0x70   :  { %1745 = vmatpush1.bf16.msra.mxu0 %v3217_v5  ;;  %1828 = vmatprep.subr.bf16.mxu1 %v3228_v8  ;;  %v3301_v5 = vld [vmem:[%s4733_s1 + $0x720] ss:$16 sps:$4 sm:$0xff]   ;;  %v3312_v8 = vld [vmem:[%s4733_s1 + $0x34c] ss:$16 sps:$4 sm:$0xff]  }
  0x71   :  { %1746 = vmatprep.subr.bf16.mxu0 %v3225_v7  ;;  %v3309_v7 = vld [vmem:[%s4733_s1 + $0x744] ss:$16 sps:$4 sm:$0xff]  }
  0x73   :  { %1829 = vmatpush1.bf16.msra.mxu1 %v3226_v10  ;;  %v3310_v10 = vld [vmem:[%s4733_s1 + $0x348] ss:$16 sps:$4 sm:$0xff]  }
  0x74   :  { %1747 = vmatpush1.bf16.msra.mxu0 %v3223_v9  ;;  %1830 = vmatprep.subr.bf16.mxu1 %v3234_v12  ;;  %v3307_v9 = vld [vmem:[%s4733_s1 + $0x740] ss:$16 sps:$4 sm:$0xff]   ;;  %v3318_v12 = vld [vmem:[%s4733_s1 + $0x36c] ss:$16 sps:$4 sm:$0xff]  }
  0x75   :  { %1748 = vmatprep.subr.bf16.mxu0 %v3231_v11  ;;  %v3315_v11 = vld [vmem:[%s4733_s1 + $0x764] ss:$16 sps:$4 sm:$0xff]  }
  0x77   :  { %1831 = vmatpush1.bf16.msra.mxu1 %v3232_v14  ;;  %v3316_v14 = vld [vmem:[%s4733_s1 + $0x368] ss:$16 sps:$4 sm:$0xff]  }
  0x78   :  { %1749 = vmatpush1.bf16.msra.mxu0 %v3229_v13  ;;  %1832 = vmatprep.subr.bf16.mxu1 %v3240_v17  ;;  %v3313_v13 = vld [vmem:[%s4733_s1 + $0x760] ss:$16 sps:$4 sm:$0xff]   ;;  %v3324_v17 = vld [vmem:[%s4733_s1 + $0x38c] ss:$16 sps:$4 sm:$0xff]  }
  0x79   :  { %1750 = vmatprep.subr.bf16.mxu0 %v3237_v15  ;;  %v3321_v15 = vld [vmem:[%s4733_s1 + $0x784] ss:$16 sps:$4 sm:$0xff]  }
  0x7b   :  { %1833 = vmatpush1.bf16.msra.mxu1 %v3238_v21  ;;  %v3327_v21 = vld [vmem:[%s4733_s1 + $0x7a4] ss:$16 sps:$4 sm:$0xff]  }
  0x7c   :  { %1751 = vmatpush1.bf16.msra.mxu0 %v3235_v20  ;;  %1834 = vmatprep.subr.bf16.mxu1 %v3246_v23  ;;  %v3322_v20 = vld [vmem:[%s4733_s1 + $0x388] ss:$16 sps:$4 sm:$0xff]   ;;  %v3325_v23 = vld [vmem:[%s4733_s1 + $0x7a0] ss:$16 sps:$4 sm:$0xff]  }
  0x7d   :  { %1752 = vmatprep.subr.bf16.mxu0 %v3243_v22  ;;  %v3330_v22 = vld [vmem:[%s4733_s1 + $0x3ac] ss:$16 sps:$4 sm:$0xff]  }
  0x7f   :  { %1835 = vmatpush1.bf16.msra.mxu1 %v3244_v26  ;;  %v3333_v26 = vld [vmem:[%s4733_s1 + $0x7c4] ss:$16 sps:$4 sm:$0xff]  }
  0x80   :  { %1753 = vmatpush1.bf16.msra.mxu0 %v3241_v25  ;;  %1845 = vmatprep.subr.bf16.mxu1 %v3252_v49  ;;  %v3328_v25 = vld [vmem:[%s4733_s1 + $0x3a8] ss:$16 sps:$4 sm:$0xff]   ;;  %v3331_v49 = vld [vmem:[%s4733_s1 + $0x7c0] ss:$16 sps:$4 sm:$0xff]  }
  0x81   :  { %1763 = vmatprep.subr.bf16.mxu0 %v3249_v27  ;;  %v3336_v27 = vld [vmem:[%s4733_s1 + $0x3cc] ss:$16 sps:$4 sm:$0xff]  }
  0x82   :  { %1837 = vmatmul.mubr.bf16.vlgmr.msra.gmra.mrb[4].mxu1 %v3833_v16  ;;  %v3264_v16 = vld [vmem:[%s4733_s1 + $0x24c] ss:$16 sps:$4 sm:$0xff]  }
  0x83   :  { %1755 = vmatmul.mubr.bf16.vlgmr.msra.gmra.mrb[0].mxu0 %v4054_v29  ;;  %1846 = vmatpush1.bf16.msra.mxu1 %v3250_v31  ;;  %v3342_v31 = vld [vmem:[%s4733_s1 + $0x3ec] ss:$16 sps:$4 sm:$0xff]  }
  0x84   :  { %1764 = vmatpush1.bf16.msra.mxu0 %v3247_v30  ;;  %1847 = vmatprep.subr.bf16.mxu1 %v3258_v33  ;;  %v3339_v30 = vld [vmem:[%s4733_s1 + $0x7e4] ss:$16 sps:$4 sm:$0xff]   ;;  %v3340_v33 = vld [vmem:[%s4733_s1 + $0x3e8] ss:$16 sps:$4 sm:$0xff]  }
  0x85   :  { %1765 = vmatprep.subr.bf16.mxu0 %v3255_v32  ;;  %1795 = vmatprep.mubr.bf16.mxu0 %v4068_v34  ;;  %v3337_v32 = vld [vmem:[%s4733_s1 + $0x7e0] ss:$16 sps:$4 sm:$0xff]  }
  0x86   :  { %1877 = vmatprep.mubr.bf16.mxu1 %v3794_v3  ;;  %v3270_v3 = vld [vmem:[%s4733_s1 + $0x26c] ss:$16 sps:$4 sm:$0xff]  }
  0x87   :  { %1848 = vmatpush1.bf16.msra.mxu1 %v3256_v36  ;;  %v3344_v36 = vld [vmem:[%s4733_s1 + $0x408] ss:$16 sps:$4 sm:$0xff]  }
  0x88   :  { %1766 = vmatpush1.bf16.msra.mxu0 %v3253_v35  ;;  %1849 = vmatprep.subr.bf16.mxu1 %v3264_v16  ;;  %v3346_v35 = vld [vmem:[%s4733_s1 + $0x40c] ss:$16 sps:$4 sm:$0xff]  }
  0x89   :  { %1767 = vmatprep.subr.bf16.mxu0 %v3261_v37  ;;  %v4256_v37 = vpack.c.bf16 %v4036_v24, %v4036_v24  ;;  %v3349_v16 = vld [vmem:[%s4733_s1 + $0x42c] ss:$16 sps:$4 sm:$0xff]  }
  0x8a   :  { %v3442_v24 = vld [vmem:[%s4735_s3 + $0x4] ss:$8 sps:$4 sm:$0xff]  }
  0x8b   :  { %1850 = vmatpush1.bf16.msra.mxu1 %v3262_v39  ;;  %v3347_v39 = vld [vmem:[%s4733_s1 + $0x428] ss:$16 sps:$4 sm:$0xff]  }
  0x8c   :  { %1768 = vmatpush1.bf16.msra.mxu0 %v3259_v38  ;;  %1851 = vmatprep.subr.bf16.mxu1 %v3270_v3  ;;  %v3440_v38 = vld [vmem:[%s4735_s3] ss:$8 sps:$4 sm:$0xff]   ;;  %v3443_v3 = vld [vmem:[%s4735_s3 + $0x10] ss:$8 sps:$4 sm:$0xff]  }
  0x8d   :  { %1769 = vmatprep.subr.bf16.mxu0 %v3267_v40  ;;  %v3445_v40 = vld [vmem:[%s4735_s3 + $0x14] ss:$8 sps:$4 sm:$0xff]  }
  0x8f   :  { %1852 = vmatpush1.bf16.msra.mxu1 %v3268_v42  ;;  %v3355_v42 = vld [vmem:[%s4733_s1 + $0x46c] ss:$16 sps:$4 sm:$0xff]  }
  0x90   :  { %1770 = vmatpush1.bf16.msra.mxu0 %v3265_v41  ;;  %1853 = vmatprep.subr.bf16.mxu1 %v3276_v45  ;;  %v3350_v41 = vld [vmem:[%s4733_s1 + $0x448] ss:$16 sps:$4 sm:$0xff]  }
  0x91   :  { %1771 = vmatprep.subr.bf16.mxu0 %v3273_v44  ;;  %v3446_v44 = vld [vmem:[%s4735_s3 + $0x20] ss:$8 sps:$4 sm:$0xff]  }
  0x92   :  { %v3353_v45 = vld [vmem:[%s4733_s1 + $0x468] ss:$16 sps:$4 sm:$0xff]  }
  0x93   :  { %1854 = vmatpush1.bf16.msra.mxu1 %v3274_v47  ;;  %v3451_v47 = vld [vmem:[%s4735_s3 + $0x34] ss:$8 sps:$4 sm:$0xff]  }
  0x94   :  { %1772 = vmatpush1.bf16.msra.mxu0 %v3271_v46  ;;  %1855 = vmatprep.subr.bf16.mxu1 %v3282_v50  ;;  %v3358_v46 = vld [vmem:[%s4733_s1 + $0x48c] ss:$16 sps:$4 sm:$0xff]  }
  0x95   :  { %1773 = vmatprep.subr.bf16.mxu0 %v3279_v48  ;;  %v3449_v48 = vld [vmem:[%s4735_s3 + $0x30] ss:$8 sps:$4 sm:$0xff]   ;;  %v3454_v50 = vld [vmem:[%s4735_s3 + $0x44] ss:$8 sps:$4 sm:$0xff]  }
  0x97   :  { %1856 = vmatpush1.bf16.msra.mxu1 %v3280_v53  ;;  %v3361_v53 = vld [vmem:[%s4733_s1 + $0x4ac] ss:$16 sps:$4 sm:$0xff]  }
  0x98   :  { %1774 = vmatpush1.bf16.msra.mxu0 %v3277_v52  ;;  %1857 = vmatprep.subr.bf16.mxu1 %v3288_v55  ;;  %v3356_v52 = vld [vmem:[%s4733_s1 + $0x488] ss:$16 sps:$4 sm:$0xff]   ;;  %v3457_v55 = vld [vmem:[%s4735_s3 + $0x54] ss:$8 sps:$4 sm:$0xff]  }
  0x99   :  { %1775 = vmatprep.subr.bf16.mxu0 %v3285_v54  ;;  %v3452_v54 = vld [vmem:[%s4735_s3 + $0x40] ss:$8 sps:$4 sm:$0xff]  }
  0x9b   :  { %1858 = vmatpush1.bf16.msra.mxu1 %v3286_v57  ;;  %v3364_v57 = vld [vmem:[%s4733_s1 + $0x4cc] ss:$16 sps:$4 sm:$0xff]  }
  0x9c   :  { %1776 = vmatpush1.bf16.msra.mxu0 %v3283_v56  ;;  %1859 = vmatprep.subr.bf16.mxu1 %v3294_v59  ;;  %v3359_v56 = vld [vmem:[%s4733_s1 + $0x4a8] ss:$16 sps:$4 sm:$0xff]  }
  0x9d   :  { %1777 = vmatprep.subr.bf16.mxu0 %v3291_v58 }
  0x9f   :  { %1860 = vmatpush1.bf16.msra.mxu1 %v3292_v61 }
  0xa0   :  { %1778 = vmatpush1.bf16.msra.mxu0 %v3289_v60  ;;  %1861 = vmatprep.subr.bf16.mxu1 %v3300_v63 }
  0xa1   :  { %1779 = vmatprep.subr.bf16.mxu0 %v3297_v62 }
  0xa3   :  { %1862 = vmatpush1.bf16.msra.mxu1 %v3298_v1 }
  0xa4   :  { %1780 = vmatpush1.bf16.msra.mxu0 %v3295_v0  ;;  %1863 = vmatprep.subr.bf16.mxu1 %v3306_v4 }
  0xa5   :  { %1781 = vmatprep.subr.bf16.mxu0 %v3303_v2 }
  0xa7   :  { %1864 = vmatpush1.bf16.msra.mxu1 %v3304_v6 }
  0xa8   :  { %1782 = vmatpush1.bf16.msra.mxu0 %v3301_v5  ;;  %1865 = vmatprep.subr.bf16.mxu1 %v3312_v8 }
  0xa9   :  { %1783 = vmatprep.subr.bf16.mxu0 %v3309_v7 }
  0xab   :  { %1866 = vmatpush1.bf16.msra.mxu1 %v3310_v10 }
  0xac   :  { %1784 = vmatpush1.bf16.msra.mxu0 %v3307_v9  ;;  %1867 = vmatprep.subr.bf16.mxu1 %v3318_v12 }
  0xad   :  { %1785 = vmatprep.subr.bf16.mxu0 %v3315_v11 }
  0xaf   :  { %1868 = vmatpush1.bf16.msra.mxu1 %v3316_v14 }
  0xb0   :  { %1786 = vmatpush1.bf16.msra.mxu0 %v3313_v13  ;;  %1869 = vmatprep.subr.bf16.mxu1 %v3324_v17 }
  0xb1   :  { %1787 = vmatprep.subr.bf16.mxu0 %v3321_v15 }
  0xb3   :  { %1870 = vmatpush1.bf16.msra.mxu1 %v3322_v20 }
  0xb4   :  { %1788 = vmatpush1.bf16.msra.mxu0 %v3319_v19  ;;  %1871 = vmatprep.subr.bf16.mxu1 %v3330_v22 }
  0xb5   :  { %1789 = vmatprep.subr.bf16.mxu0 %v3327_v21 }
  0xb7   :  { %1872 = vmatpush1.bf16.msra.mxu1 %v3328_v25 }
  0xb8   :  { %1790 = vmatpush1.bf16.msra.mxu0 %v3325_v23  ;;  %1873 = vmatprep.subr.bf16.mxu1 %v3336_v27 }
  0xb9   :  { %1791 = vmatprep.subr.bf16.mxu0 %v3333_v26 }
  0xbb   :  { %1874 = vmatpush1.bf16.msra.mxu1 %v3334_v28 }
  0xbc   :  { %1792 = vmatpush1.bf16.msra.mxu0 %v3331_v49  ;;  %1875 = vmatprep.subr.bf16.mxu1 %v3342_v31 }
  0xbd   :  { %1793 = vmatprep.subr.bf16.mxu0 %v3339_v30 }
  0xbf   :  { %1876 = vmatpush1.bf16.msra.mxu1 %v3340_v33 }
  0xc0   :  { %1794 = vmatpush1.bf16.msra.mxu0 %v3337_v32  ;;  %1886 = vmatprep.subr.bf16.mxu1 %v3346_v35 }
  0xc1   :  { %2372 = vmatprep.subr.bf16.mxu0 %v3442_v24 }
  0xc2   :  { %1878 = vmatmul.mubr.bf16.vlgmr.msra.gmra.mrb[4].mxu1 %v3838_v18  ;;  %v3352_v18 = vld [vmem:[%s4733_s1 + $0x44c] ss:$16 sps:$4 sm:$0xff]  }
  0xc3   :  { %1796 = vmatmul.mubr.bf16.vlgmr.msra.gmra.mrb[0].mxu0 %v4256_v37  ;;  %1887 = vmatpush1.bf16.msra.mxu1 %v3344_v36 }
  0xc4   :  { %1918 = vmatprep.mubr.bf16.mxu1 %v3934_v51  ;;  %1888 = vmatprep.subr.bf16.mxu1 %v3349_v16  ;;  %v3448_v51 = vld [vmem:[%s4735_s3 + $0x24] ss:$8 sps:$4 sm:$0xff]  }
  0xc5   :  { %2373 = vmatpush1.bf16.msra.mxu0 %v3440_v38 }
  0xc6   :  { %2374 = vmatprep.subr.bf16.mxu0 %v3445_v40 }
  0xc7   :  { %1889 = vmatpush1.bf16.msra.mxu1 %v3347_v39 }
  0xc8   :  { %1890 = vmatprep.subr.bf16.mxu1 %v3352_v18 }
  0xc9   :  { %2375 = vmatpush1.bf16.msra.mxu0 %v3443_v3 }
  0xca   :  { %2376 = vmatprep.subr.bf16.mxu0 %v3448_v51 }
  0xcb   :  { %1891 = vmatpush1.bf16.msra.mxu1 %v3350_v41 }
  0xcc   :  { %1892 = vmatprep.subr.bf16.mxu1 %v3355_v42 }
  0xcd   :  { %2377 = vmatpush1.bf16.msra.mxu0 %v3446_v44 }
  0xce   :  { %2378 = vmatprep.subr.bf16.mxu0 %v3451_v47 }
  0xcf   :  { %1893 = vmatpush1.bf16.msra.mxu1 %v3353_v45 }
  0xd0   :  { %1894 = vmatprep.subr.bf16.mxu1 %v3358_v46 }
  0xd1   :  { %2379 = vmatpush1.bf16.msra.mxu0 %v3449_v48 }
  0xd2   :  { %2380 = vmatprep.subr.bf16.mxu0 %v3454_v50 }
  0xd3   :  { %1895 = vmatpush1.bf16.msra.mxu1 %v3356_v52 }
  0xd4   :  { %1896 = vmatprep.subr.bf16.mxu1 %v3361_v53 }
  0xd5   :  { %12 = vsyncpa [#allocation3], 0  ;;  %2381 = vmatpush1.bf16.msra.mxu0 %v3452_v54  ;;  %v3455_v58 = vld [vmem:[%s4735_s3 + $0x50] ss:$8 sps:$4 sm:$0xff]   ;;  %v3460_v59 = vld [vmem:[%s4735_s3 + $0x64] ss:$8 sps:$4 sm:$0xff]  }
  0xd6   :  { %2382 = vmatprep.subr.bf16.mxu0 %v3457_v55  ;;  %v3362_v60 = vld [vmem:[%s4733_s1 + $0x4c8] ss:$16 sps:$4 sm:$0xff]   ;;  %v3367_v61 = vld [vmem:[%s4733_s1 + $0x4ec] ss:$16 sps:$4 sm:$0xff]   ;;  %vm2633_vm0 = vcmask 9216  }
  0xd7   :  { %1897 = vmatpush1.bf16.msra.mxu1 %v3359_v56  ;;  %v3458_v62 = vld [vmem:[%s4735_s3 + $0x60] ss:$8 sps:$4 sm:$0xff]   ;;  %v3463_v63 = vld [vmem:[%s4735_s3 + $0x74] ss:$8 sps:$4 sm:$0xff]   ;;  %v3461_v2 = vld [vmem:[%s4735_s3 + $0x70] ss:$8 sps:$4 sm:$0xff]  }
  0xd8   :  { %1898 = vmatprep.subr.bf16.mxu1 %v3364_v57  ;;  %v3365_v0 = vld [vmem:[%s4733_s1 + $0x4e8] ss:$16 sps:$4 sm:$0xff]   ;;  %v3370_v1 = vld [vmem:[%s4733_s1 + $0x50c] ss:$16 sps:$4 sm:$0xff]  }
  0xd9   :  { %2383 = vmatpush1.bf16.msra.mxu0 %v3455_v58  ;;  %v3466_v4 = vld [vmem:[%s4735_s3 + $0x84] ss:$8 sps:$4 sm:$0xff]   ;;  %v3368_v5 = vld [vmem:[%s4733_s1 + $0x508] ss:$16 sps:$4 sm:$0xff]   ;;  %v3469_v8 = vld [vmem:[%s4735_s3 + $0x94] ss:$8 sps:$4 sm:$0xff]  }
  0xda   :  { %2384 = vmatprep.subr.bf16.mxu0 %v3460_v59  ;;  %v3373_v6 = vld [vmem:[%s4733_s1 + $0x52c] ss:$16 sps:$4 sm:$0xff]   ;;  %v3464_v7 = vld [vmem:[%s4735_s3 + $0x80] ss:$8 sps:$4 sm:$0xff]   ;;  %v3467_v11 = vld [vmem:[%s4735_s3 + $0x90] ss:$8 sps:$4 sm:$0xff]  }
  0xdb   :  { %1899 = vmatpush1.bf16.msra.mxu1 %v3362_v60  ;;  %v3371_v9 = vld [vmem:[%s4733_s1 + $0x528] ss:$16 sps:$4 sm:$0xff]   ;;  %v3376_v10 = vld [vmem:[%s4733_s1 + $0x54c] ss:$16 sps:$4 sm:$0xff]  }
  0xdc   :  { %1900 = vmatprep.subr.bf16.mxu1 %v3367_v61  ;;  %v3472_v12 = vld [vmem:[%s4735_s3 + $0xa4] ss:$8 sps:$4 sm:$0xff]   ;;  %v3374_v13 = vld [vmem:[%s4733_s1 + $0x548] ss:$16 sps:$4 sm:$0xff]   ;;  %v3475_v17 = vld [vmem:[%s4735_s3 + $0xb4] ss:$8 sps:$4 sm:$0xff]  }
  0xdd   :  { %2385 = vmatpush1.bf16.msra.mxu0 %v3458_v62  ;;  %v3379_v14 = vld [vmem:[%s4733_s1 + $0x56c] ss:$16 sps:$4 sm:$0xff]   ;;  %v3470_v15 = vld [vmem:[%s4735_s3 + $0xa0] ss:$8 sps:$4 sm:$0xff]   ;;  %v3473_v21 = vld [vmem:[%s4735_s3 + $0xb0] ss:$8 sps:$4 sm:$0xff]  }
  0xde   :  { %2386 = vmatprep.subr.bf16.mxu0 %v3463_v63  ;;  %v3377_v19 = vld [vmem:[%s4733_s1 + $0x568] ss:$16 sps:$4 sm:$0xff]   ;;  %v3382_v20 = vld [vmem:[%s4733_s1 + $0x58c] ss:$16 sps:$4 sm:$0xff]  }
  0xdf   :  { %1901 = vmatpush1.bf16.msra.mxu1 %v3365_v0  ;;  %v3478_v22 = vld [vmem:[%s4735_s3 + $0xc4] ss:$8 sps:$4 sm:$0xff]   ;;  %v3380_v23 = vld [vmem:[%s4733_s1 + $0x588] ss:$16 sps:$4 sm:$0xff]   ;;  %v3481_v27 = vld [vmem:[%s4735_s3 + $0xd4] ss:$8 sps:$4 sm:$0xff]  }
  0xe0   :  { %1902 = vmatprep.subr.bf16.mxu1 %v3370_v1  ;;  %v3385_v25 = vld [vmem:[%s4733_s1 + $0x5ac] ss:$16 sps:$4 sm:$0xff]   ;;  %v3476_v26 = vld [vmem:[%s4735_s3 + $0xc0] ss:$8 sps:$4 sm:$0xff]   ;;  %v3479_v30 = vld [vmem:[%s4735_s3 + $0xd0] ss:$8 sps:$4 sm:$0xff]  }
  0xe1   :  { %2387 = vmatpush1.bf16.msra.mxu0 %v3461_v2  ;;  %v3383_v49 = vld [vmem:[%s4733_s1 + $0x5a8] ss:$16 sps:$4 sm:$0xff]   ;;  %v3388_v28 = vld [vmem:[%s4733_s1 + $0x5cc] ss:$16 sps:$4 sm:$0xff]  }
  0xe2   :  { %2388 = vmatprep.subr.bf16.mxu0 %v3466_v4  ;;  %v3386_v31 = vld [vmem:[%s4733_s1 + $0x5c8] ss:$16 sps:$4 sm:$0xff]   ;;  %v3391_v32 = vld [vmem:[%s4733_s1 + $0x5ec] ss:$16 sps:$4 sm:$0xff]  }
  0xe3   :  { %1903 = vmatpush1.bf16.msra.mxu1 %v3368_v5  ;;  %v3389_v33 = vld [vmem:[%s4733_s1 + $0x5e8] ss:$16 sps:$4 sm:$0xff]   ;;  %v3394_v35 = vld [vmem:[%s4733_s1 + $0x60c] ss:$16 sps:$4 sm:$0xff]  }
  0xe4   :  { %1904 = vmatprep.subr.bf16.mxu1 %v3373_v6  ;;  %v3392_v36 = vld [vmem:[%s4733_s1 + $0x608] ss:$16 sps:$4 sm:$0xff]   ;;  %v3397_v16 = vld [vmem:[%s4733_s1 + $0x62c] ss:$16 sps:$4 sm:$0xff]  }
  0xe5   :  { %2389 = vmatpush1.bf16.msra.mxu0 %v3464_v7  ;;  %v3395_v38 = vld [vmem:[%s4733_s1 + $0x628] ss:$16 sps:$4 sm:$0xff]   ;;  %v3400_v24 = vld [vmem:[%s4733_s1 + $0x64c] ss:$16 sps:$4 sm:$0xff]  }
  0xe6   :  { %2390 = vmatprep.subr.bf16.mxu0 %v3469_v8  ;;  %v3398_v39 = vld [vmem:[%s4733_s1 + $0x648] ss:$16 sps:$4 sm:$0xff]   ;;  %v3406_v40 = vld [vmem:[%s4733_s1 + $0x68c] ss:$16 sps:$4 sm:$0xff]  }
  0xe7   :  { %1905 = vmatpush1.bf16.msra.mxu1 %v3371_v9  ;;  %v3404_v18 = vld [vmem:[%s4733_s1 + $0x688] ss:$16 sps:$4 sm:$0xff]   ;;  %v3409_v3 = vld [vmem:[%s4733_s1 + $0x6ac] ss:$16 sps:$4 sm:$0xff]  }
  0xe8   :  { %1906 = vmatprep.subr.bf16.mxu1 %v3376_v10  ;;  %v3407_v51 = vld [vmem:[%s4733_s1 + $0x6a8] ss:$16 sps:$4 sm:$0xff]   ;;  %v3412_v41 = vld [vmem:[%s4733_s1 + $0x6cc] ss:$16 sps:$4 sm:$0xff]   ;;  %v342_v10 = vsub.s32 0, %v3739_v43 }
  0xe9   :  { %2391 = vmatpush1.bf16.msra.mxu0 %v3467_v11  ;;  %v3484_v42 = vld [vmem:[%s4735_s3 + $0xe4] ss:$8 sps:$4 sm:$0xff]   ;;  %v3482_v45 = vld [vmem:[%s4735_s3 + $0xe0] ss:$8 sps:$4 sm:$0xff]   ;;  %v3487_v53 = vld [vmem:[%s4735_s3 + $0xf4] ss:$8 sps:$4 sm:$0xff]  }
  0xea   :  { %2392 = vmatprep.subr.bf16.mxu0 %v3472_v12  ;;  %v3410_v48 = vld [vmem:[%s4733_s1 + $0x6c8] ss:$16 sps:$4 sm:$0xff]   ;;  %v3415_v52 = vld [vmem:[%s4733_s1 + $0x6ec] ss:$16 sps:$4 sm:$0xff]   ;;  %v4553_v11 = vld [vmem:[%s4734_s2] sm:$0xf] }
  0xeb   :  { %1907 = vmatpush1.bf16.msra.mxu1 %v3374_v13  ;;  %v3485_v54 = vld [vmem:[%s4735_s3 + $0xf0] ss:$8 sps:$4 sm:$0xff]   ;;  %v3418_v56 = vld [vmem:[%s4733_s1 + $0x70c] ss:$16 sps:$4 sm:$0xff]   ;;  %v346_v12 = vsub.s32 1, %v3739_v43  ;;  %v343_v13 = vrot.slane %v4553_v11, %v342_v10 }
  0xec   :  { %1908 = vmatprep.subr.bf16.mxu1 %v3379_v14  ;;  %v3413_v55 = vld [vmem:[%s4733_s1 + $0x6e8] ss:$16 sps:$4 sm:$0xff]   ;;  %v3490_v57 = vld [vmem:[%s4735_s3 + $0x104] ss:$8 sps:$4 sm:$0xff]  }
  0xed   :  { %2393 = vmatpush1.bf16.msra.mxu0 %v3470_v15  ;;  %v3416_v58 = vld [vmem:[%s4733_s1 + $0x708] ss:$16 sps:$4 sm:$0xff]   ;;  %v3421_v59 = vld [vmem:[%s4733_s1 + $0x72c] ss:$16 sps:$4 sm:$0xff]   ;;  %v347_v14 = vrot.slane %v4553_v11, %v346_v12 }
  0xee   :  { %2394 = vmatprep.subr.bf16.mxu0 %v3475_v17  ;;  %v3419_v60 = vld [vmem:[%s4733_s1 + $0x728] ss:$16 sps:$4 sm:$0xff]   ;;  %v3424_v61 = vld [vmem:[%s4733_s1 + $0x74c] ss:$16 sps:$4 sm:$0xff]  }
  0xef   :  { %1909 = vmatpush1.bf16.msra.mxu1 %v3377_v19  ;;  %v3422_v62 = vld [vmem:[%s4733_s1 + $0x748] ss:$16 sps:$4 sm:$0xff]   ;;  %v3427_v63 = vld [vmem:[%s4733_s1 + $0x76c] ss:$16 sps:$4 sm:$0xff]  }
  0xf0   :  { %1910 = vmatprep.subr.bf16.mxu1 %v3382_v20  ;;  %v3425_v0 = vld [vmem:[%s4733_s1 + $0x768] ss:$16 sps:$4 sm:$0xff]   ;;  %v3430_v1 = vld [vmem:[%s4733_s1 + $0x78c] ss:$16 sps:$4 sm:$0xff]  }
  0xf1   :  { %2395 = vmatpush1.bf16.msra.mxu0 %v3473_v21  ;;  %v3428_v2 = vld [vmem:[%s4733_s1 + $0x788] ss:$16 sps:$4 sm:$0xff]   ;;  %v3433_v4 = vld [vmem:[%s4733_s1 + $0x7ac] ss:$16 sps:$4 sm:$0xff]  }
  0xf2   :  { %2396 = vmatprep.subr.bf16.mxu0 %v3478_v22  ;;  %v3431_v5 = vld [vmem:[%s4733_s1 + $0x7a8] ss:$16 sps:$4 sm:$0xff]   ;;  %v3436_v6 = vld [vmem:[%s4733_s1 + $0x7cc] ss:$16 sps:$4 sm:$0xff]  }
  0xf3   :  { %1911 = vmatpush1.bf16.msra.mxu1 %v3380_v23  ;;  %v3434_v7 = vld [vmem:[%s4733_s1 + $0x7c8] ss:$16 sps:$4 sm:$0xff]   ;;  %v3439_v8 = vld [vmem:[%s4733_s1 + $0x7ec] ss:$16 sps:$4 sm:$0xff]  }
  0xf4   :  { %1912 = vmatprep.subr.bf16.mxu1 %v3385_v25  ;;  %v3437_v9 = vld [vmem:[%s4733_s1 + $0x7e8] ss:$16 sps:$4 sm:$0xff]  }
  0xf5   :  { %2397 = vmatpush1.bf16.msra.mxu0 %v3476_v26 }
  0xf6   :  { %2398 = vmatprep.subr.bf16.mxu0 %v3481_v27 }
  0xf7   :  { %1913 = vmatpush1.bf16.msra.mxu1 %v3383_v49  ;;  %v3488_v49 = vld [vmem:[%s4735_s3 + $0x100] ss:$8 sps:$4 sm:$0xff]  }
  0xf8   :  { %1914 = vmatprep.subr.bf16.mxu1 %v3388_v28 }
  0xf9   :  { %2399 = vmatpush1.bf16.msra.mxu0 %v3479_v30  ;;  %v3493_v30 = vld [vmem:[%s4735_s3 + $0x114] ss:$8 sps:$4 sm:$0xff]  }
  0xfa   :  { %2400 = vmatprep.subr.bf16.mxu0 %v3484_v42  ;;  %v3505_v42 = vld [vmem:[%s4735_s3 + $0x154] ss:$8 sps:$4 sm:$0xff]  }
  0xfb   :  { %1915 = vmatpush1.bf16.msra.mxu1 %v3386_v31  ;;  %v3536_v31 = vld [vmem:[%s4737_s5 + $0x40] sm:$0xff]  }
  0xfc   :  { %1916 = vmatprep.subr.bf16.mxu1 %v3391_v32  ;;  %v3537_v32 = vld [vmem:[%s4737_s5] sm:$0xff]  }
  0xfd   :  { %2401 = vmatpush1.bf16.msra.mxu0 %v3482_v45  ;;  %v3546_v45 = vld [vmem:[%s4737_s5 + $0x68] sm:$0xff]  }
  0xfe   :  { %2402 = vmatprep.subr.bf16.mxu0 %v3487_v53  ;;  %v3509_v53 = vld [vmem:[%s4735_s3 + $0x170] ss:$8 sps:$4 sm:$0xff]  }
  0xff   :  { %1917 = vmatpush1.bf16.msra.mxu1 %v3389_v33  ;;  %v3538_v33 = vld [vmem:[%s4737_s5 + $0x48] sm:$0xff]  }
 0x100   :  { %1927 = vmatprep.subr.bf16.mxu1 %v3394_v35  ;;  %v3491_v35 = vld [vmem:[%s4735_s3 + $0x110] ss:$8 sps:$4 sm:$0xff]  }
 0x101   :  { %2403 = vmatpush1.bf16.msra.mxu0 %v3485_v54  ;;  %v3514_v54 = vld [vmem:[%s4735_s3 + $0x184] ss:$8 sps:$4 sm:$0xff]  }
 0x102   :  { %1919 = vmatmul.mubr.bf16.vlgmr.msra.gmra.mrb[4].mxu1 %v4054_v29  ;;  %v3403_v29 = vld [vmem:[%s4733_s1 + $0x66c] ss:$16 sps:$4 sm:$0xff]   ;;  %2413 = vmatprep.subr.bf16.mxu0 %v3490_v57  ;;  %v3515_v57 = vld [vmem:[%s4735_s3 + $0x190] ss:$8 sps:$4 sm:$0xff]  }
 0x103   :  { %1928 = vmatpush1.bf16.msra.mxu1 %v3392_v36  ;;  %1959 = vmatprep.mubr.bf16.mxu1 %v4068_v34  ;;  %v3401_v34 = vld [vmem:[%s4733_s1 + $0x668] ss:$16 sps:$4 sm:$0xff]   ;;  %v3496_v36 = vld [vmem:[%s4735_s3 + $0x124] ss:$8 sps:$4 sm:$0xff]  }
 0x104   :  { %1929 = vmatprep.subr.bf16.mxu1 %v3397_v16  ;;  %v3539_v16 = vld [vmem:[%s4737_s5 + $0x8] sm:$0xff]  }
 0x107   :  { %1930 = vmatpush1.bf16.msra.mxu1 %v3395_v38  ;;  %v3540_v38 = vld [vmem:[%s4737_s5 + $0x50] sm:$0xff]  }
 0x108   :  { %1931 = vmatprep.subr.bf16.mxu1 %v3400_v24  ;;  %v3494_v24 = vld [vmem:[%s4735_s3 + $0x120] ss:$8 sps:$4 sm:$0xff]  }
 0x10b   :  { %1932 = vmatpush1.bf16.msra.mxu1 %v3398_v39  ;;  %v3499_v39 = vld [vmem:[%s4735_s3 + $0x134] ss:$8 sps:$4 sm:$0xff]  }
 0x10c   :  { %1933 = vmatprep.subr.bf16.mxu1 %v3403_v29  ;;  %v3541_v29 = vld [vmem:[%s4737_s5 + $0x10] sm:$0xff]  }
 0x10f   :  { %1934 = vmatpush1.bf16.msra.mxu1 %v3401_v34  ;;  %v3542_v34 = vld [vmem:[%s4737_s5 + $0x58] sm:$0xff]  }
 0x110   :  { %1935 = vmatprep.subr.bf16.mxu1 %v3406_v40  ;;  %v3497_v40 = vld [vmem:[%s4735_s3 + $0x130] ss:$8 sps:$4 sm:$0xff]  }
 0x113   :  { %1936 = vmatpush1.bf16.msra.mxu1 %v3404_v18  ;;  %v3502_v18 = vld [vmem:[%s4735_s3 + $0x144] ss:$8 sps:$4 sm:$0xff]  }
 0x114   :  { %1937 = vmatprep.subr.bf16.mxu1 %v3409_v3  ;;  %v3543_v3 = vld [vmem:[%s4737_s5 + $0x18] sm:$0xff]  }
 0x115   :  { %v1674_v44 = vpop.f32.mrb[0].mxu1 }
 0x116   :  { %v1676_v46 = vpop.f32.mrb[1].mxu1  ;;  %v1675_v15 = vadd.f32 %v1674_v44, %v343_v13  ;;  %v3545_v44 = vld [vmem:[%s4737_s5 + $0x20] sm:$0xff]  }
 0x117   :  { %v1678_v47 = vpop.f32.mrb[2].mxu1  ;;  %1938 = vmatpush1.bf16.msra.mxu1 %v3407_v51  ;;  %v1677_v17 = vadd.f32 %v1676_v46, %v347_v14  ;;  %v3544_v51 = vld [vmem:[%s4737_s5 + $0x60] sm:$0xff]   ;;  %v3503_v46 = vld [vmem:[%s4735_s3 + $0x150] ss:$8 sps:$4 sm:$0xff]  }
 0x118   :  { %v1679_v50 = vpop.f32.mrb[3].mxu1  ;;  %1939 = vmatprep.subr.bf16.mxu1 %v3412_v41  ;;  %v3500_v41 = vld [vmem:[%s4735_s3 + $0x140] ss:$8 sps:$4 sm:$0xff]   ;;  %v3508_v47 = vld [vmem:[%s4735_s3 + $0x164] ss:$8 sps:$4 sm:$0xff]  }
 0x119   :  { %v3506_v50 = vld [vmem:[%s4735_s3 + $0x160] ss:$8 sps:$4 sm:$0xff]  }
 0x11b   :  { %1940 = vmatpush1.bf16.msra.mxu1 %v3410_v48  ;;  %v3547_v48 = vld [vmem:[%s4737_s5 + $0x28] sm:$0xff]  }
 0x11c   :  { %1941 = vmatprep.subr.bf16.mxu1 %v3415_v52  ;;  %v3511_v52 = vld [vmem:[%s4735_s3 + $0x174] ss:$8 sps:$4 sm:$0xff]  }
 0x11f   :  { %1942 = vmatpush1.bf16.msra.mxu1 %v3413_v55  ;;  %v3512_v55 = vld [vmem:[%s4735_s3 + $0x180] ss:$8 sps:$4 sm:$0xff]  }
 0x120   :  { %1943 = vmatprep.subr.bf16.mxu1 %v3418_v56  ;;  %v3517_v56 = vld [vmem:[%s4735_s3 + $0x194] ss:$8 sps:$4 sm:$0xff]  }
 0x123   :  { %1944 = vmatpush1.bf16.msra.mxu1 %v3416_v58  ;;  %v3520_v58 = vld [vmem:[%s4735_s3 + $0x1a4] ss:$8 sps:$4 sm:$0xff]  }
 0x124   :  { %1945 = vmatprep.subr.bf16.mxu1 %v3421_v59  ;;  %v3518_v59 = vld [vmem:[%s4735_s3 + $0x1a0] ss:$8 sps:$4 sm:$0xff]  }
 0x127   :  { %1946 = vmatpush1.bf16.msra.mxu1 %v3419_v60  ;;  %v3523_v60 = vld [vmem:[%s4735_s3 + $0x1b4] ss:$8 sps:$4 sm:$0xff]  }
 0x128   :  { %1947 = vmatprep.subr.bf16.mxu1 %v3424_v61  ;;  %v3521_v61 = vld [vmem:[%s4735_s3 + $0x1b0] ss:$8 sps:$4 sm:$0xff]  }
 0x12b   :  { %1948 = vmatpush1.bf16.msra.mxu1 %v3422_v62  ;;  %v3526_v62 = vld [vmem:[%s4735_s3 + $0x1c4] ss:$8 sps:$4 sm:$0xff]  }
 0x12c   :  { %1949 = vmatprep.subr.bf16.mxu1 %v3427_v63  ;;  %v3524_v63 = vld [vmem:[%s4735_s3 + $0x1c0] ss:$8 sps:$4 sm:$0xff]  }
 0x12f   :  { %1950 = vmatpush1.bf16.msra.mxu1 %v3425_v0  ;;  %v3529_v0 = vld [vmem:[%s4735_s3 + $0x1d4] ss:$8 sps:$4 sm:$0xff]  }
 0x130   :  { %1951 = vmatprep.subr.bf16.mxu1 %v3430_v1  ;;  %v3527_v1 = vld [vmem:[%s4735_s3 + $0x1d0] ss:$8 sps:$4 sm:$0xff]  }
 0x133   :  { %1952 = vmatpush1.bf16.msra.mxu1 %v3428_v2  ;;  %v3532_v2 = vld [vmem:[%s4735_s3 + $0x1e4] ss:$8 sps:$4 sm:$0xff]  }
 0x134   :  { %1953 = vmatprep.subr.bf16.mxu1 %v3433_v4  ;;  %v3530_v4 = vld [vmem:[%s4735_s3 + $0x1e0] ss:$8 sps:$4 sm:$0xff]  }
 0x137   :  { %1954 = vmatpush1.bf16.msra.mxu1 %v3431_v5  ;;  %v3535_v5 = vld [vmem:[%s4735_s3 + $0x1f4] ss:$8 sps:$4 sm:$0xff]  }
 0x138   :  { %1955 = vmatprep.subr.bf16.mxu1 %v3436_v6  ;;  %v3533_v6 = vld [vmem:[%s4735_s3 + $0x1f0] ss:$8 sps:$4 sm:$0xff]  }
 0x13b   :  { %1956 = vmatpush1.bf16.msra.mxu1 %v3434_v7  ;;  %v350_v7 = vsub.s32 2, %v3739_v43 }
 0x13c   :  { %1957 = vmatprep.subr.bf16.mxu1 %v3439_v8  ;;  %v354_v8 = vsub.s32 3, %v3739_v43 }
 0x13e   :  { %v355_v13 = vrot.slane %v4553_v11, %v354_v8 }
 0x13f   :  { %1958 = vmatpush1.bf16.msra.mxu1 %v3437_v9  ;;  %v351_v9 = vrot.slane %v4553_v11, %v350_v7  ;;  %v3549_v11 = vld [vmem:[%s4737_s5 + $0x30] sm:$0xff]  }
 0x140   :  { %2998 = vmatprep.subr.bf16.mxu1 %v3536_v31 }
 0x142   :  { %1960 = vmatmul.mubr.bf16.vlgmr.msra.gmra.mrb[4].mxu1 %v4256_v37 }
 0x143   :  { %2999 = vmatpush3.bf16.msra.mxu1 %v3537_v32 }
 0x144   :  { %3000 = vmatprep.subr.bf16.mxu1 %v3538_v33 }
 0x147   :  { %3001 = vmatpush3.bf16.msra.mxu1 %v3539_v16 }
 0x148   :  { %3002 = vmatprep.subr.bf16.mxu1 %v3540_v38 }
 0x14b   :  { %3003 = vmatpush3.bf16.msra.mxu1 %v3541_v29 }
 0x14c   :  { %3004 = vmatprep.subr.bf16.mxu1 %v3542_v34 }
 0x14f   :  { %3005 = vmatpush3.bf16.msra.mxu1 %v3543_v3 }
 0x150   :  { %3006 = vmatprep.subr.bf16.mxu1 %v3544_v51 }
 0x153   :  { %3007 = vmatpush3.bf16.msra.mxu1 %v3545_v44 }
 0x154   :  { %3008 = vmatprep.subr.bf16.mxu1 %v3546_v45 }
 0x157   :  { %3009 = vmatpush3.bf16.msra.mxu1 %v3547_v48 }
 0x196   :  { %v1797_v37 = vpop.f32.mrb[0].mxu0 }
 0x197   :  { %v3021_v19 = vadd.f32 %v1797_v37, %v1675_v15  ;;  %v1799_v20 = vpop.f32.mrb[1].mxu0 }
 0x198   :  { %v3023_v21 = vadd.f32 %v1799_v20, %v1677_v17  ;;  %v1801_v22 = vpop.f32.mrb[2].mxu0 }
 0x199   :  { %v1968_v23 = vmax.f32 %v3021_v19, 0.0  ;;  %v1802_v25 = vpop.f32.mrb[3].mxu0 }
 0x19a   :  { %v1969_v26 = vmax.f32 %v3023_v21, 0.0 }
 0x19b   :  { %v1972_v28 = vpack.c.bf16 %v1968_v23, %v1968_v23 }
 0x19c   :  { %v1973_v27 = vpack.c.bf16 %v1969_v26, %v1969_v26  ;;  %v3548_v26 = vld [vmem:[%s4737_s5 + $0x70] sm:$0xff]  }
 0x19d   :  { %3010 = vmatprep.subr.bf16.mxu1 %v3548_v26 }
 0x19e   :  { %2404 = vmatprep.mubr.bf16.mxu0 %v1973_v27  ;;  %3011 = vmatpush3.bf16.msra.mxu1 %v3549_v11  ;;  %v3550_v27 = vld [vmem:[%s4737_s5 + $0x78] sm:$0xff]  }
 0x19f   :  { %2405 = vmatmul.mubr.bf16.vlgmr.msra.gmra.mrb[4].mxu0 %v1972_v28  ;;  %3012 = vmatprep.subr.bf16.mxu1 %v3550_v27  ;;  %v2040_v28 = vld [vmem:[%s4736_s4] sm:$0x3] }
 0x1a0   :  { %2414 = vmatpush1.bf16.msra.mxu0 %v3488_v49  ;;  %v3551_v49 = vld [vmem:[%s4737_s5 + $0x38] sm:$0xff]   ;;  %v2049_v31 = vrot.slane %v2040_v28, %v346_v12 }
 0x1a1   :  { %2415 = vmatprep.subr.bf16.mxu0 %v3493_v30  ;;  %v2045_v30 = vrot.slane %v2040_v28, %v342_v10  ;;  %v2981_v10 = vld [vmem:[%s4738_s6] ss:$0 sm:$0xff]  ;;  %s3581_s6 = smov [#allocation2]  }
 0x1a2   :  { %3013 = vmatpush3.bf16.msra.mxu1 %v3551_v49  ;;  %s2653_s30 = sshll.u32 %s3581_s6, 4  ;;  %s2654_s30 = int_to_ptr.vmem [resolvable:$true] %s2653_s30 }
 0x1a3   :  { %s3556_s8 = scalar_lea.vmem %s2654_s30, 32  ;;  %p3561_p1 = scmp.lt.s32.totalorder %s2654_s30, %s2654_s30 }
 0x1a4   :  { %2416 = vmatpush1.bf16.msra.mxu0 %v3491_v35  ;;  %p3557_p0 = scmp.ne.s32.totalorder %s2654_s30, %s3556_s8  ;;  %p3562_p2 = scmp.lt.s32.totalorder %s3556_s8, %s3556_s8 }
 0x1a5   :  { %2417 = vmatprep.subr.bf16.mxu0 %v3496_v36 }
 0x1a6   :  { %p3563_p3 = por %p3562_p2, %p3561_p1 }
 0x1a8   :  { %2418 = vmatpush1.bf16.msra.mxu0 %v3494_v24  ;;  %p3564_p4 = pnand %p3563_p3, %p3557_p0 }
 0x1a9   :  { %2419 = vmatprep.subr.bf16.mxu0 %v3499_v39 }
 0x1ac   :  { %2420 = vmatpush1.bf16.msra.mxu0 %v3497_v40 }
 0x1ad   :  { %2421 = vmatprep.subr.bf16.mxu0 %v3502_v18 }
 0x1b0   :  { %2422 = vmatpush1.bf16.msra.mxu0 %v3500_v41 }
 0x1b1   :  { %2423 = vmatprep.subr.bf16.mxu0 %v3505_v42 }
 0x1b4   :  { %2424 = vmatpush1.bf16.msra.mxu0 %v3503_v46 }
 0x1b5   :  { %2425 = vmatprep.subr.bf16.mxu0 %v3508_v47 }
 0x1b8   :  { %2426 = vmatpush1.bf16.msra.mxu0 %v3506_v50 }
 0x1b9   :  { %2427 = vmatprep.subr.bf16.mxu0 %v3511_v52 }
 0x1bc   :  { %2428 = vmatpush1.bf16.msra.mxu0 %v3509_v53 }
 0x1bd   :  { %2429 = vmatprep.subr.bf16.mxu0 %v3514_v54 }
 0x1c0   :  { %2430 = vmatpush1.bf16.msra.mxu0 %v3512_v55 }
 0x1c1   :  { %2431 = vmatprep.subr.bf16.mxu0 %v3517_v56 }
 0x1c4   :  { %2432 = vmatpush1.bf16.msra.mxu0 %v3515_v57 }
 0x1c5   :  { %2433 = vmatprep.subr.bf16.mxu0 %v3520_v58 }
 0x1c8   :  { %2434 = vmatpush1.bf16.msra.mxu0 %v3518_v59 }
 0x1c9   :  { %2435 = vmatprep.subr.bf16.mxu0 %v3523_v60 }
 0x1cc   :  { %2436 = vmatpush1.bf16.msra.mxu0 %v3521_v61 }
 0x1cd   :  { %2437 = vmatprep.subr.bf16.mxu0 %v3526_v62 }
 0x1d0   :  { %2438 = vmatpush1.bf16.msra.mxu0 %v3524_v63 }
 0x1d1   :  { %2439 = vmatprep.subr.bf16.mxu0 %v3529_v0 }
 0x1d4   :  { %2440 = vmatpush1.bf16.msra.mxu0 %v3527_v1 }
 0x1d5   :  { %2441 = vmatprep.subr.bf16.mxu0 %v3532_v2 }
 0x1d8   :  { %2442 = vmatpush1.bf16.msra.mxu0 %v3530_v4 }
 0x1d9   :  { %2443 = vmatprep.subr.bf16.mxu0 %v3535_v5 }
 0x1dc   :  { %2444 = vmatpush1.bf16.msra.mxu0 %v3533_v6 }
 0x215   :  { %v1961_v14 = vpop.f32.mrb[4].mxu1 }
 0x216   :  { %v3024_v15 = vadd.f32 %v1961_v14, %v351_v9  ;;  %v1963_v17 = vpop.f32.mrb[5].mxu1 }
 0x217   :  { %v3025_v37 = vadd.f32 %v1963_v17, %v355_v13  ;;  %v1965_v19 = vpop.f32.mrb[6].mxu1 }
 0x218   :  { %v1970_v20 = vmax.f32 %v3024_v15, 0.0  ;;  %v1966_v21 = vpop.f32.mrb[7].mxu1 }
 0x219   :  { %v1971_v22 = vmax.f32 %v3025_v37, 0.0 }
 0x21a   :  { %v1974_v25 = vpack.c.bf16 %v1970_v20, %v1970_v20 }
 0x21b   :  { %v1975_v23 = vpack.c.bf16 %v1971_v22, %v1971_v22 }
 0x21d   :  { %2445 = vmatprep.mubr.bf16.mxu0 %v1975_v23 }
 0x21e   :  { %2446 = vmatmul.mubr.bf16.vlgmr.msra.gmra.mrb[4].mxu0 %v1974_v25 }
 0x2f1   :  { %v2447_v32 = vpop.f32.mrb[4].mxu0 }
 0x2f2   :  { %v3026_v33 = vadd.f32 %v2447_v32, %v2045_v30  ;;  %v2449_v35 = vpop.f32.mrb[5].mxu0 }
 0x2f3   :  { %v3027_v36 = vadd.f32 %v2449_v35, %v2049_v31  ;;  %v2451_v16 = vpop.f32.mrb[6].mxu0 }
 0x2f4   :  { %v2454_v38 = vmax.f32 %v3026_v33, 0.0  ;;  %v2452_v24 = vpop.f32.mrb[7].mxu0 }
 0x2f5   :  { %v2455_v39 = vmax.f32 %v3027_v36, 0.0 }
 0x2f6   :  { %v2456_v34 = vpack.c.bf16 %v2454_v38, %v2454_v38 }
 0x2f7   :  { %v2457_v29 = vpack.c.bf16 %v2455_v39, %v2455_v39 }
 0x2f9   :  { %2625 = vmatprep.mubr.bf16.mxu1 %v2457_v29 }
 0x2fa   :  { %2626 = vmatmul.mubr.bf16.vlgmr.msra.gmra.mrb[8].mxu1 %v2456_v34 }
 0x3cd   :  { %v3014_v40 = vpop.f32.mrb[8].mxu1 }
 0x3ce   :  { %v3015_v18 = vpop.f32.mrb[9].mxu1 }
 0x3cf   :  { %v3016_v43 = vadd.f32 %v3015_v18, %v3014_v40  ;;  %v3017_v12 = vpop.f32.mrb[10].mxu1 }
 0x3d0   :  { %v3018_v3 = vpop.f32.mrb[11].mxu1 }
 0x3d1   :  { %v2628_v51 = vadd.f32 %v3016_v43, %v2981_v10 }
 0x3d3   :  { %v2634_v41 = vsel %vm2633_vm0, %v2628_v51, -inf }
 0x3d4   :  { %2635 = vmax.xlane.f32.xlu0 %v2634_v41 }
 0x461   :  { %v2636_v42 = vpop.xlane.xlu0 %2635 }
 0x462   :  { %v2637_v44 = vsub.f32 %v2628_v51, %v2636_v42 }
 0x464   :  { %v2638_v45 = vmul.f32 1.442695, %v2637_v44 }
 0x466   :  { %3552 = vpow2.f32 %v2638_v45 }
 0x470   :  { %v3553_v46 = vpop.eup %3552 }
 0x471   :  { %v2640_v47 = vsel %vm2633_vm0, %v3553_v46, 0.0 }
 0x472   :  { %2641 = vadd.xlane.f32.xlu0 %v2640_v47 }
 0x4ff   :  { %v2642_v48 = vpop.xlane.xlu0 %2641 }
 0x500   :  { %3554 = vlog2.f32 %v2642_v48 }
 0x50a   :  { %v3555_v50 = vpop.eup %3554 }
 0x50b   :  { %v2644_v52 = vmul.f32 0.6931472, %v3555_v50 }
 0x50d   :  { %v2645_v53 = vsub.f32 %v2637_v44, %v2644_v52 }
 0x50f   :  { %2646 = vst.msk [vmem:[#allocation2] sm:$0x3] %vm2633_vm0, %v2645_v53 }
 0x510   :  { %3567 = shalt.err (!%p3564_p4)
}
 0x511   :  { %s3568_s11 = scalar_lea.hbm %s4739_s7, 32 }
 0x512   :  { %p3569_p5 = scmp.ne.s32.totalorder %s4739_s7, %s3568_s11  ;;  %p3572_p6 = scmp.lt.u32.totalorder %s3568_s11, %s4739_s7 }
 0x514   :  { %p3574_p7 = pnand %p3572_p6, %p3569_p5 }
 0x516   :  { %3577 = shalt.err (!%p3574_p7)
}
 0x517   :  { %2656 = dma.vmem_to_hbm [thread:$0]  %s2654_s30, 32, %s4739_s7, [#allocation3]  }
 0x518   :  { %3578 = dma.done.wait [#allocation3], 32  }
 0x519   :  { %3579 = vsyncadd [#allocation3], 4294967264 }
 0x51a   :  { %2660 = vsyncpa [#allocation3], 1 }

</bundles_post_ra>
